<compile_context>
chip_gen: v6e
topology: v6e:2x2x1
jax: 0.10.0
libtpu: 0.0.40
codegen_flags: <defaults>
</compile_context>

<pallas_src>
import functools
import math

import jax
import jax.numpy as jnp
from jax.experimental import pallas as pl
from jax.experimental.pallas import tpu as pltpu


_TABLE_LANES = 128   # vreg lane width; fused-gather path keeps tables <=128 rows


# ---------------------------------------------------------------------------
# Kernels
# ---------------------------------------------------------------------------

def _bcast_idx_row(idx_ref, row, nrows, tb, stride0):
    """(nrows, tb) copy of index row `row`, broadcast across sublanes."""
    if stride0:
        # Stride-0 sublane-broadcast load: performed in the vld slot instead of
        # spending VPU ops on an explicit broadcast.
        return idx_ref[pl.ds(row, nrows, stride=0), :]
    return jnp.broadcast_to(idx_ref[row:row + 1, :], (nrows, tb))


def _gather_xlu_kernel(idx_ref, ent_t_ref, rel_t_ref, out_ref, *, stride0):
    """Dynamic-lane-gather scoring path (XLU).

    idx_ref:   (8, tb) int32  rows = (h, r, t, tt, ch, cr, ct, ctt)
    ent_t_ref: (D, 128) f32   entity table, transposed & lane-padded
    rel_t_ref: (D, 128) f32   relation table, transposed & lane-padded
    out_ref:   (2, tb) f32    row 0 = correct, row 1 = corrupt
    """
    ent_t = ent_t_ref[...]
    rel_t = rel_t_ref[...]
    d = ent_t.shape[0]
    tb = out_ref.shape[1]

    def gather(table_t, row):
        ind = _bcast_idx_row(idx_ref, row, d, tb, stride0)
        return jnp.take_along_axis(table_t, ind, axis=1,
                                   mode="promise_in_bounds")

    # correct: E[h] + R[r] + R[tt] - E[t]   (transposed layout: (D, tb))
    diff_pos = (gather(ent_t, 0) + gather(rel_t, 1)
                + gather(rel_t, 3) - gather(ent_t, 2))
    out_ref[0:1, :] = jnp.sum(diff_pos * diff_pos, axis=0, keepdims=True)

    # corrupt: E[ch] + R[cr] + R[ctt] - E[ct]
    diff_neg = (gather(ent_t, 4) + gather(rel_t, 5)
                + gather(rel_t, 7) - gather(ent_t, 6))
    out_ref[1:2, :] = jnp.sum(diff_neg * diff_neg, axis=0, keepdims=True)


def _onehot_mxu_kernel(idx_ref, ent_t_ref, rel_t_ref, out_ref, *, stride0):
    """MXU one-hot-contraction scoring path (for v6e/v7x per review).

    diff = ent_t @ (onehot(h) - onehot(t)) + rel_t @ (onehot(r) + onehot(tt))
    so the +/- of the score is fused into the signed one-hots and the row
    lookup runs on the otherwise-idle MXU instead of the 2-port XLU.
    """
    ent_t = ent_t_ref[...]                    # (D, 128)
    rel_t = rel_t_ref[...]                    # (D, 128)
    n = ent_t.shape[1]                        # padded table height (128)
    tb = out_ref.shape[1]

    row_iota = jax.lax.broadcasted_iota(jnp.int32, (n, tb), 0)

    def onehot(row):
        ind = _bcast_idx_row(idx_ref, row, n, tb, stride0)
        return (row_iota == ind).astype(jnp.float32)

    def score(h_row, r_row, t_row, tt_row):
        oh_ent = onehot(h_row) - onehot(t_row)     # signed one-hot: E[h]-E[t]
        oh_rel = onehot(r_row) + onehot(tt_row)    # summed one-hot: R[r]+R[tt]
        diff = (jnp.dot(ent_t, oh_ent, preferred_element_type=jnp.float32)
                + jnp.dot(rel_t, oh_rel, preferred_element_type=jnp.float32))
        return jnp.sum(diff * diff, axis=0, keepdims=True)    # (1, tb)

    out_ref[0:1, :] = score(0, 1, 2, 3)
    out_ref[1:2, :] = score(4, 5, 6, 7)


_KERNELS = {
    "gather_xlu": _gather_xlu_kernel,
    "onehot_mxu": _onehot_mxu_kernel,
}


# ---------------------------------------------------------------------------
# Hot path: just the pallas_call
# ---------------------------------------------------------------------------

@functools.partial(jax.jit, static_argnames=("tile_b", "mode", "conservative"))
def ttranse_scores(ent_t, rel_t, all_idx, *, tile_b, mode="onehot_mxu",
                   conservative=False):
    """ent_t, rel_t: (D, 128) f32 pre-transposed, lane-padded tables
                     (prepare_tables(); hoist out of the training step).
       all_idx:      (8, B) int32, rows = (h, r, t, tt, ch, cr, ct, ctt)
                     (pack_indices(); ideally emitted directly by the pipeline).
       Returns (correct, corrupt), each (B,) f32."""
    D, n_lanes = ent_t.shape
    B = all_idx.shape[1]
    assert rel_t.shape == (D, n_lanes)
    assert D % 8 == 0, "emb dim should be a multiple of 8 (sublane layout)"
    assert tile_b % 128 == 0, "tile_b must be a multiple of 128 lanes"
    assert B % tile_b == 0, "batch must be a multiple of tile_b"

    kernel = functools.partial(_KERNELS[mode], stride0=not conservative)

    if conservative:
        table_specs = [pl.BlockSpec((D, n_lanes), lambda i: (0, 0))
                       for _ in range(2)]
    else:
        # Tables are grid-resident (constant index_map) -> single buffer.
        table_specs = [pl.BlockSpec((D, n_lanes), lambda i: (0, 0),
                                    pipeline_mode=pl.Buffered(1))
                       for _ in range(2)]

    out = pl.pallas_call(
        kernel,
        out_shape=jax.ShapeDtypeStruct((2, B), jnp.float32),
        grid_spec=pltpu.PrefetchScalarGridSpec(
            num_scalar_prefetch=0,
            grid=(B // tile_b,),
            in_specs=[pl.BlockSpec((8, tile_b), lambda i: (0, i))]
                     + table_specs,
            out_specs=pl.BlockSpec((2, tile_b), lambda i: (0, i)),
        ),
        compiler_params=pltpu.CompilerParams(
            dimension_semantics=("parallel",)),
    )(all_idx, ent_t, rel_t)

    return out[0], out[1]


# ---------------------------------------------------------------------------
# One-time prep (hoisted out of the per-step path)
# ---------------------------------------------------------------------------

def prepare_tables(entity_emb, relation_emb):
    """Transpose to (D, N) so the embedding dim lies on sublanes, and zero-pad
    the row axis to the 128-lane vreg width. Do this once, not per call."""
    def prep(tbl):
        t = jnp.asarray(tbl, jnp.float32).T            # (D, N)
        n = t.shape[1]
        assert n <= _TABLE_LANES, "fused-gather path needs tables <=128 rows"
        # TODO(synk): tables with >128 rows need the memory_space=pl.ANY +
        # manual make_async_copy row-gather variant instead of resident tables.
        if n < _TABLE_LANES:
            t = jnp.pad(t, ((0, 0), (0, _TABLE_LANES - n)))
        return t
    return prep(entity_emb), prep(relation_emb)


def pack_indices(batch_idx, corrupt_idx):
    """Pack into a single (8, B) int32 operand (ideally done by the pipeline)."""
    return jnp.concatenate([batch_idx.T, corrupt_idx.T],
                           axis=0).astype(jnp.int32)


def validate_indices(all_idx, entity_num, relation_num):
    """Host-side sanity check: zero-padded lanes would otherwise turn an
    out-of-range index into a silently-wrong score."""
    ent_rows = all_idx[jnp.array([0, 2, 4, 6]), :]
    rel_rows = all_idx[jnp.array([1, 3, 5, 7]), :]
    ok = bool(jnp.all((ent_rows >= 0) & (ent_rows < entity_num))
              & jnp.all((rel_rows >= 0) & (rel_rows < relation_num)))
    if not ok:
        raise ValueError("TTransE kernel: index out of table range")


def pick_tile_b(batch_size):
    """Largest 128-multiple tile <=1024 that divides the batch, preferring
    >=2 grid steps so v7x can shard the grid across both TensorCores."""
    candidates = (1024, 512, 256, 128)
    for t in candidates:
        if batch_size % t == 0 and batch_size // t >= 2:
            return t
    for t in candidates:
        if batch_size % t == 0:
            return t
    raise ValueError("batch size must be a multiple of 128")


def ttranse_forward(entity_emb, relation_emb, batch_idx, corrupt_idx, *,
                    mode="onehot_mxu", tile_b=None, conservative=False):
    """Convenience wrapper matching TTransE.forward(batch, corrupt_batch).
    In a training loop, call prepare_tables()/pack_indices() once and then
    call ttranse_scores() directly (that is the hot path)."""
    ent_t, rel_t = prepare_tables(entity_emb, relation_emb)
    all_idx = pack_indices(batch_idx, corrupt_idx)
    if tile_b is None:
        tile_b = pick_tile_b(all_idx.shape[1])
    return ttranse_scores(ent_t, rel_t, all_idx, tile_b=tile_b, mode=mode,
                          conservative=conservative)


def _init_params(key, entity_num, relation_num, emb_dim):
    """Deterministic synthetic init matching TTransE.__init__:
    uniform(-6/sqrt(d), 6/sqrt(d)) then L2-normalize each row."""
    bound = 6.0 / math.sqrt(emb_dim)
    k_e, k_r = jax.random.split(key)
    ent = jax.random.uniform(k_e, (entity_num, emb_dim),
                             minval=-bound, maxval=bound, dtype=jnp.float32)
    rel = jax.random.uniform(k_r, (relation_num, emb_dim),
                             minval=-bound, maxval=bound, dtype=jnp.float32)
    ent = ent / jnp.linalg.norm(ent, axis=1, keepdims=True)
    rel = rel / jnp.linalg.norm(rel, axis=1, keepdims=True)
    return ent, rel


if __name__ == "__main__":
    EMB_DIM = 64          # Emb_dimension
    ENTITY_NUM = 128
    RELATION_NUM = 128
    BATCH = 1024          # Batch_size; tile_b=512 -> 2 parallel grid steps

    key = jax.random.PRNGKey(0)
    k_param, k_b, k_cb = jax.random.split(key, 3)

    entity_emb, relation_emb = _init_params(k_param, ENTITY_NUM, RELATION_NUM,
                                            EMB_DIM)

    def sample_triples(k, n):
        kh, kr, kt, ktt = jax.random.split(k, 4)
        return jnp.stack([
            jax.random.randint(kh, (n,), 0, ENTITY_NUM),
            jax.random.randint(kr, (n,), 0, RELATION_NUM),
            jax.random.randint(kt, (n,), 0, ENTITY_NUM),
            jax.random.randint(ktt, (n,), 0, RELATION_NUM),
        ], axis=1).astype(jnp.int32)

    batch_idx = sample_triples(k_b, BATCH)
    corrupt_idx = sample_triples(k_cb, BATCH)

    # --- hoisted prep (done once, outside the per-step hot path) ---
    ent_t, rel_t = prepare_tables(entity_emb, relation_emb)
    all_idx = pack_indices(batch_idx, corrupt_idx)
    ent_t, rel_t, all_idx = jax.block_until_ready((ent_t, rel_t, all_idx))
    validate_indices(all_idx, ENTITY_NUM, RELATION_NUM)
    tile_b = pick_tile_b(BATCH)

    # --- pure-JAX reference ---
    def ref_score(idx):
        h = entity_emb[idx[:, 0]]
        r = relation_emb[idx[:, 1]]
        t = entity_emb[idx[:, 2]]
        tt = relation_emb[idx[:, 3]]
        return jnp.sum((h + r + tt - t) ** 2, axis=1)

    ref_correct = ref_score(batch_idx)
    ref_corrupt = ref_score(corrupt_idx)

    def run_mode(mode):
        # Prefer the fully-optimized variant (stride-0 broadcast loads +
        # single-buffered resident tables); fall back to the conservative
        # variant if this jax/libtpu build rejects or mis-handles them.
        for conservative in (False, True):
            try:
                c, n = ttranse_scores(ent_t, rel_t, all_idx, tile_b=tile_b,
                                      mode=mode, conservative=conservative)
                c, n = jax.block_until_ready((c, n))
            except Exception:
                if conservative:
                    raise
                continue
            if (jnp.allclose(c, ref_correct, atol=1e-4, rtol=1e-4)
                    and jnp.allclose(n, ref_corrupt, atol=1e-4, rtol=1e-4)):
                return c, n
        raise AssertionError(f"TTransE kernel mismatch for mode={mode}")

    for mode in ("onehot_mxu", "gather_xlu"):
        run_mode(mode)

    print("KERNEL_OK")
</pallas_src>

<mosaic_0001>
module attributes {stable_mosaic.version = 11 : i64} {
  func.func @_onehot_mxu_kernel(%arg0: i32, %arg1: memref<8x512xi32, #tpu.memory_space<vmem>>, %arg2: memref<64x128xf32, #tpu.memory_space<vmem>>, %arg3: memref<64x128xf32, #tpu.memory_space<vmem>>, %arg4: memref<2x512xf32, #tpu.memory_space<vmem>>) attributes {dimension_semantics = [#tpu.dimension_semantics<parallel>], iteration_bounds = array<i64: 2>, scalar_prefetch = 0 : i64, scratch_operands = 0 : i64, tpu.core_type = #tpu.core_type<tc>, window_params = [{transform_indices = @transform_0, window_bounds = array<i64: 8, 512>}, {pipeline_mode = #tpu.pipeline_mode<synchronous>, transform_indices = @transform_1, window_bounds = array<i64: 64, 128>}, {pipeline_mode = #tpu.pipeline_mode<synchronous>, transform_indices = @transform_2, window_bounds = array<i64: 64, 128>}, {transform_indices = @transform_3, window_bounds = array<i64: 2, 512>}]} {
    %c0 = arith.constant 0 : index
    %c0_0 = arith.constant 0 : index
    %0 = vector.load %arg2[%c0, %c0_0] : memref<64x128xf32, #tpu.memory_space<vmem>>, vector<64x128xf32>
    %c0_1 = arith.constant 0 : index
    %c0_2 = arith.constant 0 : index
    %1 = vector.load %arg3[%c0_1, %c0_2] : memref<64x128xf32, #tpu.memory_space<vmem>>, vector<64x128xf32>
    %2 = tpu.iota {dimensions = array<i32: 0>} : vector<128x512xi32>
    %c0_3 = arith.constant 0 : index
    %c0_4 = arith.constant 0 : index
    %3 = tpu.strided_load %arg1[%c0_3, %c0_4] {strides = array<i32: 0, 1>} : memref<8x512xi32, #tpu.memory_space<vmem>>, vector<128x512xi32>
    %4 = arith.cmpi eq, %2, %3 : vector<128x512xi32>
    %5 = arith.extui %4 : vector<128x512xi1> to vector<128x512xi32>
    %6 = arith.sitofp %5 : vector<128x512xi32> to vector<128x512xf32>
    %c2 = arith.constant 2 : index
    %c0_5 = arith.constant 0 : index
    %7 = tpu.strided_load %arg1[%c2, %c0_5] {strides = array<i32: 0, 1>} : memref<8x512xi32, #tpu.memory_space<vmem>>, vector<128x512xi32>
    %8 = arith.cmpi eq, %2, %7 : vector<128x512xi32>
    %9 = arith.extui %8 : vector<128x512xi1> to vector<128x512xi32>
    %10 = arith.sitofp %9 : vector<128x512xi32> to vector<128x512xf32>
    %11 = arith.subf %6, %10 : vector<128x512xf32>
    %c1 = arith.constant 1 : index
    %c0_6 = arith.constant 0 : index
    %12 = tpu.strided_load %arg1[%c1, %c0_6] {strides = array<i32: 0, 1>} : memref<8x512xi32, #tpu.memory_space<vmem>>, vector<128x512xi32>
    %13 = arith.cmpi eq, %2, %12 : vector<128x512xi32>
    %14 = arith.extui %13 : vector<128x512xi1> to vector<128x512xi32>
    %15 = arith.sitofp %14 : vector<128x512xi32> to vector<128x512xf32>
    %c3 = arith.constant 3 : index
    %c0_7 = arith.constant 0 : index
    %16 = tpu.strided_load %arg1[%c3, %c0_7] {strides = array<i32: 0, 1>} : memref<8x512xi32, #tpu.memory_space<vmem>>, vector<128x512xi32>
    %17 = arith.cmpi eq, %2, %16 : vector<128x512xi32>
    %18 = arith.extui %17 : vector<128x512xi1> to vector<128x512xi32>
    %19 = arith.sitofp %18 : vector<128x512xi32> to vector<128x512xf32>
    %20 = arith.addf %15, %19 : vector<128x512xf32>
    %cst = arith.constant dense<0.000000e+00> : vector<64x512xf32>
    %21 = tpu.matmul %0, %11, %cst {dimension_numbers = #tpu.dot_dimension_numbers<[1], [0], [0], [1], [0, 0, 1, 1], [], []>} : vector<64x128xf32>, vector<128x512xf32>, vector<64x512xf32> -> vector<64x512xf32>
    %cst_8 = arith.constant dense<0.000000e+00> : vector<64x512xf32>
    %22 = tpu.matmul %1, %20, %cst_8 {dimension_numbers = #tpu.dot_dimension_numbers<[1], [0], [0], [1], [0, 0, 1, 1], [], []>} : vector<64x128xf32>, vector<128x512xf32>, vector<64x512xf32> -> vector<64x512xf32>
    %23 = arith.addf %21, %22 : vector<64x512xf32>
    %24 = arith.mulf %23, %23 : vector<64x512xf32>
    %cst_9 = arith.constant dense<0.000000e+00> : vector<512xf32>
    %25 = vector.multi_reduction <add>, %24, %cst_9 [0] : vector<64x512xf32> to vector<512xf32>
    %26 = vector.shape_cast %25 : vector<512xf32> to vector<1x512xf32>
    %c0_10 = arith.constant 0 : index
    %c0_11 = arith.constant 0 : index
    %27 = vector.load %arg4[%c0_10, %c0_11] : memref<2x512xf32, #tpu.memory_space<vmem>>, vector<1x512xf32>
    tpu.vector_store %arg4[%c0_10, %c0_11], %26 {strides = array<i32>} : memref<2x512xf32, #tpu.memory_space<vmem>>, vector<1x512xf32>,
    %c4 = arith.constant 4 : index
    %c0_12 = arith.constant 0 : index
    %28 = tpu.strided_load %arg1[%c4, %c0_12] {strides = array<i32: 0, 1>} : memref<8x512xi32, #tpu.memory_space<vmem>>, vector<128x512xi32>
    %29 = arith.cmpi eq, %2, %28 : vector<128x512xi32>
    %30 = arith.extui %29 : vector<128x512xi1> to vector<128x512xi32>
    %31 = arith.sitofp %30 : vector<128x512xi32> to vector<128x512xf32>
    %c6 = arith.constant 6 : index
    %c0_13 = arith.constant 0 : index
    %32 = tpu.strided_load %arg1[%c6, %c0_13] {strides = array<i32: 0, 1>} : memref<8x512xi32, #tpu.memory_space<vmem>>, vector<128x512xi32>
    %33 = arith.cmpi eq, %2, %32 : vector<128x512xi32>
    %34 = arith.extui %33 : vector<128x512xi1> to vector<128x512xi32>
    %35 = arith.sitofp %34 : vector<128x512xi32> to vector<128x512xf32>
    %36 = arith.subf %31, %35 : vector<128x512xf32>
    %c5 = arith.constant 5 : index
    %c0_14 = arith.constant 0 : index
    %37 = tpu.strided_load %arg1[%c5, %c0_14] {strides = array<i32: 0, 1>} : memref<8x512xi32, #tpu.memory_space<vmem>>, vector<128x512xi32>
    %38 = arith.cmpi eq, %2, %37 : vector<128x512xi32>
    %39 = arith.extui %38 : vector<128x512xi1> to vector<128x512xi32>
    %40 = arith.sitofp %39 : vector<128x512xi32> to vector<128x512xf32>
    %c7 = arith.constant 7 : index
    %c0_15 = arith.constant 0 : index
    %41 = tpu.strided_load %arg1[%c7, %c0_15] {strides = array<i32: 0, 1>} : memref<8x512xi32, #tpu.memory_space<vmem>>, vector<128x512xi32>
    %42 = arith.cmpi eq, %2, %41 : vector<128x512xi32>
    %43 = arith.extui %42 : vector<128x512xi1> to vector<128x512xi32>
    %44 = arith.sitofp %43 : vector<128x512xi32> to vector<128x512xf32>
    %45 = arith.addf %40, %44 : vector<128x512xf32>
    %cst_16 = arith.constant dense<0.000000e+00> : vector<64x512xf32>
    %46 = tpu.matmul %0, %36, %cst_16 {dimension_numbers = #tpu.dot_dimension_numbers<[1], [0], [0], [1], [0, 0, 1, 1], [], []>} : vector<64x128xf32>, vector<128x512xf32>, vector<64x512xf32> -> vector<64x512xf32>
    %cst_17 = arith.constant dense<0.000000e+00> : vector<64x512xf32>
    %47 = tpu.matmul %1, %45, %cst_17 {dimension_numbers = #tpu.dot_dimension_numbers<[1], [0], [0], [1], [0, 0, 1, 1], [], []>} : vector<64x128xf32>, vector<128x512xf32>, vector<64x512xf32> -> vector<64x512xf32>
    %48 = arith.addf %46, %47 : vector<64x512xf32>
    %49 = arith.mulf %48, %48 : vector<64x512xf32>
    %cst_18 = arith.constant dense<0.000000e+00> : vector<512xf32>
    %50 = vector.multi_reduction <add>, %49, %cst_18 [0] : vector<64x512xf32> to vector<512xf32>
    %51 = vector.shape_cast %50 : vector<512xf32> to vector<1x512xf32>
    %c1_19 = arith.constant 1 : index
    %c0_20 = arith.constant 0 : index
    %52 = vector.load %arg4[%c1_19, %c0_20] : memref<2x512xf32, #tpu.memory_space<vmem>>, vector<1x512xf32>
    tpu.vector_store %arg4[%c1_19, %c0_20], %51 {strides = array<i32>} : memref<2x512xf32, #tpu.memory_space<vmem>>, vector<1x512xf32>,
    return
  }
  func.func @transform_0(%arg0: i32) -> (i32, i32) {
    %c0_i32 = arith.constant 0 : i32
    %c0_i32_0 = arith.constant 0 : i32
    return %c0_i32, %arg0 : i32, i32
  }
  func.func @transform_1(%arg0: i32) -> (i32, i32) {
    %c0_i32 = arith.constant 0 : i32
    %c0_i32_0 = arith.constant 0 : i32
    %c0_i32_1 = arith.constant 0 : i32
    return %c0_i32, %c0_i32_0 : i32, i32
  }
  func.func @transform_2(%arg0: i32) -> (i32, i32) {
    %c0_i32 = arith.constant 0 : i32
    %c0_i32_0 = arith.constant 0 : i32
    %c0_i32_1 = arith.constant 0 : i32
    return %c0_i32, %c0_i32_0 : i32, i32
  }
  func.func @transform_3(%arg0: i32) -> (i32, i32) {
    %c0_i32 = arith.constant 0 : i32
    %c0_i32_0 = arith.constant 0 : i32
    return %c0_i32, %arg0 : i32, i32
  }
}

module attributes {stable_mosaic.version = 11 : i64} {
  func.func @_onehot_mxu_kernel(%arg0: i32, %arg1: memref<8x512xi32, #tpu.memory_space<vmem>>, %arg2: memref<64x128xf32, #tpu.memory_space<vmem>>, %arg3: memref<64x128xf32, #tpu.memory_space<vmem>>, %arg4: memref<2x512xf32, #tpu.memory_space<vmem>>) attributes {dimension_semantics = [#tpu.dimension_semantics<parallel>], iteration_bounds = array<i64: 2>, scalar_prefetch = 0 : i64, scratch_operands = 0 : i64, tpu.core_type = #tpu.core_type<tc>, window_params = [{transform_indices = @transform_0, window_bounds = array<i64: 8, 512>}, {pipeline_mode = #tpu.pipeline_mode<synchronous>, transform_indices = @transform_1, window_bounds = array<i64: 64, 128>}, {pipeline_mode = #tpu.pipeline_mode<synchronous>, transform_indices = @transform_2, window_bounds = array<i64: 64, 128>}, {transform_indices = @transform_3, window_bounds = array<i64: 2, 512>}]} {
    %c0 = arith.constant 0 : index
    %c0_0 = arith.constant 0 : index
    %0 = vector.load %arg2[%c0, %c0_0] : memref<64x128xf32, #tpu.memory_space<vmem>>, vector<64x128xf32>
    %c0_1 = arith.constant 0 : index
    %c0_2 = arith.constant 0 : index
    %1 = vector.load %arg3[%c0_1, %c0_2] : memref<64x128xf32, #tpu.memory_space<vmem>>, vector<64x128xf32>
    %2 = tpu.iota {dimensions = array<i32: 0>} : vector<128x512xi32>
    %c0_3 = arith.constant 0 : index
    %c0_4 = arith.constant 0 : index
    %3 = vector.load %arg1[%c0_3, %c0_4] : memref<8x512xi32, #tpu.memory_space<vmem>>, vector<1x512xi32>
    %4 = vector.shape_cast %3 : vector<1x512xi32> to vector<1x512xi32>
    %5 = vector.broadcast %4 : vector<1x512xi32> to vector<128x512xi32>
    %6 = arith.cmpi eq, %2, %5 : vector<128x512xi32>
    %7 = arith.extui %6 : vector<128x512xi1> to vector<128x512xi32>
    %8 = arith.sitofp %7 : vector<128x512xi32> to vector<128x512xf32>
    %c2 = arith.constant 2 : index
    %c0_5 = arith.constant 0 : index
    %9 = vector.load %arg1[%c2, %c0_5] : memref<8x512xi32, #tpu.memory_space<vmem>>, vector<1x512xi32>
    %10 = vector.shape_cast %9 : vector<1x512xi32> to vector<1x512xi32>
    %11 = vector.broadcast %10 : vector<1x512xi32> to vector<128x512xi32>
    %12 = arith.cmpi eq, %2, %11 : vector<128x512xi32>
    %13 = arith.extui %12 : vector<128x512xi1> to vector<128x512xi32>
    %14 = arith.sitofp %13 : vector<128x512xi32> to vector<128x512xf32>
    %15 = arith.subf %8, %14 : vector<128x512xf32>
    %c1 = arith.constant 1 : index
    %c0_6 = arith.constant 0 : index
    %16 = vector.load %arg1[%c1, %c0_6] : memref<8x512xi32, #tpu.memory_space<vmem>>, vector<1x512xi32>
    %17 = vector.shape_cast %16 : vector<1x512xi32> to vector<1x512xi32>
    %18 = vector.broadcast %17 : vector<1x512xi32> to vector<128x512xi32>
    %19 = arith.cmpi eq, %2, %18 : vector<128x512xi32>
    %20 = arith.extui %19 : vector<128x512xi1> to vector<128x512xi32>
    %21 = arith.sitofp %20 : vector<128x512xi32> to vector<128x512xf32>
    %c3 = arith.constant 3 : index
    %c0_7 = arith.constant 0 : index
    %22 = vector.load %arg1[%c3, %c0_7] : memref<8x512xi32, #tpu.memory_space<vmem>>, vector<1x512xi32>
    %23 = vector.shape_cast %22 : vector<1x512xi32> to vector<1x512xi32>
    %24 = vector.broadcast %23 : vector<1x512xi32> to vector<128x512xi32>
    %25 = arith.cmpi eq, %2, %24 : vector<128x512xi32>
    %26 = arith.extui %25 : vector<128x512xi1> to vector<128x512xi32>
    %27 = arith.sitofp %26 : vector<128x512xi32> to vector<128x512xf32>
    %28 = arith.addf %21, %27 : vector<128x512xf32>
    %cst = arith.constant dense<0.000000e+00> : vector<64x512xf32>
    %29 = tpu.matmul %0, %15, %cst {dimension_numbers = #tpu.dot_dimension_numbers<[1], [0], [0], [1], [0, 0, 1, 1], [], []>} : vector<64x128xf32>, vector<128x512xf32>, vector<64x512xf32> -> vector<64x512xf32>
    %cst_8 = arith.constant dense<0.000000e+00> : vector<64x512xf32>
    %30 = tpu.matmul %1, %28, %cst_8 {dimension_numbers = #tpu.dot_dimension_numbers<[1], [0], [0], [1], [0, 0, 1, 1], [], []>} : vector<64x128xf32>, vector<128x512xf32>, vector<64x512xf32> -> vector<64x512xf32>
    %31 = arith.addf %29, %30 : vector<64x512xf32>
    %32 = arith.mulf %31, %31 : vector<64x512xf32>
    %cst_9 = arith.constant dense<0.000000e+00> : vector<512xf32>
    %33 = vector.multi_reduction <add>, %32, %cst_9 [0] : vector<64x512xf32> to vector<512xf32>
    %34 = vector.shape_cast %33 : vector<512xf32> to vector<1x512xf32>
    %c0_10 = arith.constant 0 : index
    %c0_11 = arith.constant 0 : index
    %35 = vector.load %arg4[%c0_10, %c0_11] : memref<2x512xf32, #tpu.memory_space<vmem>>, vector<1x512xf32>
    tpu.vector_store %arg4[%c0_10, %c0_11], %34 {strides = array<i32>} : memref<2x512xf32, #tpu.memory_space<vmem>>, vector<1x512xf32>,
    %c4 = arith.constant 4 : index
    %c0_12 = arith.constant 0 : index
    %36 = vector.load %arg1[%c4, %c0_12] : memref<8x512xi32, #tpu.memory_space<vmem>>, vector<1x512xi32>
    %37 = vector.shape_cast %36 : vector<1x512xi32> to vector<1x512xi32>
    %38 = vector.broadcast %37 : vector<1x512xi32> to vector<128x512xi32>
    %39 = arith.cmpi eq, %2, %38 : vector<128x512xi32>
    %40 = arith.extui %39 : vector<128x512xi1> to vector<128x512xi32>
    %41 = arith.sitofp %40 : vector<128x512xi32> to vector<128x512xf32>
    %c6 = arith.constant 6 : index
    %c0_13 = arith.constant 0 : index
    %42 = vector.load %arg1[%c6, %c0_13] : memref<8x512xi32, #tpu.memory_space<vmem>>, vector<1x512xi32>
    %43 = vector.shape_cast %42 : vector<1x512xi32> to vector<1x512xi32>
    %44 = vector.broadcast %43 : vector<1x512xi32> to vector<128x512xi32>
    %45 = arith.cmpi eq, %2, %44 : vector<128x512xi32>
    %46 = arith.extui %45 : vector<128x512xi1> to vector<128x512xi32>
    %47 = arith.sitofp %46 : vector<128x512xi32> to vector<128x512xf32>
    %48 = arith.subf %41, %47 : vector<128x512xf32>
    %c5 = arith.constant 5 : index
    %c0_14 = arith.constant 0 : index
    %49 = vector.load %arg1[%c5, %c0_14] : memref<8x512xi32, #tpu.memory_space<vmem>>, vector<1x512xi32>
    %50 = vector.shape_cast %49 : vector<1x512xi32> to vector<1x512xi32>
    %51 = vector.broadcast %50 : vector<1x512xi32> to vector<128x512xi32>
    %52 = arith.cmpi eq, %2, %51 : vector<128x512xi32>
    %53 = arith.extui %52 : vector<128x512xi1> to vector<128x512xi32>
    %54 = arith.sitofp %53 : vector<128x512xi32> to vector<128x512xf32>
    %c7 = arith.constant 7 : index
    %c0_15 = arith.constant 0 : index
    %55 = vector.load %arg1[%c7, %c0_15] : memref<8x512xi32, #tpu.memory_space<vmem>>, vector<1x512xi32>
    %56 = vector.shape_cast %55 : vector<1x512xi32> to vector<1x512xi32>
    %57 = vector.broadcast %56 : vector<1x512xi32> to vector<128x512xi32>
    %58 = arith.cmpi eq, %2, %57 : vector<128x512xi32>
    %59 = arith.extui %58 : vector<128x512xi1> to vector<128x512xi32>
    %60 = arith.sitofp %59 : vector<128x512xi32> to vector<128x512xf32>
    %61 = arith.addf %54, %60 : vector<128x512xf32>
    %cst_16 = arith.constant dense<0.000000e+00> : vector<64x512xf32>
    %62 = tpu.matmul %0, %48, %cst_16 {dimension_numbers = #tpu.dot_dimension_numbers<[1], [0], [0], [1], [0, 0, 1, 1], [], []>} : vector<64x128xf32>, vector<128x512xf32>, vector<64x512xf32> -> vector<64x512xf32>
    %cst_17 = arith.constant dense<0.000000e+00> : vector<64x512xf32>
    %63 = tpu.matmul %1, %61, %cst_17 {dimension_numbers = #tpu.dot_dimension_numbers<[1], [0], [0], [1], [0, 0, 1, 1], [], []>} : vector<64x128xf32>, vector<128x512xf32>, vector<64x512xf32> -> vector<64x512xf32>
    %64 = arith.addf %62, %63 : vector<64x512xf32>
    %65 = arith.mulf %64, %64 : vector<64x512xf32>
    %cst_18 = arith.constant dense<0.000000e+00> : vector<512xf32>
    %66 = vector.multi_reduction <add>, %65, %cst_18 [0] : vector<64x512xf32> to vector<512xf32>
    %67 = vector.shape_cast %66 : vector<512xf32> to vector<1x512xf32>
    %c1_19 = arith.constant 1 : index
    %c0_20 = arith.constant 0 : index
    %68 = vector.load %arg4[%c1_19, %c0_20] : memref<2x512xf32, #tpu.memory_space<vmem>>, vector<1x512xf32>
    tpu.vector_store %arg4[%c1_19, %c0_20], %67 {strides = array<i32>} : memref<2x512xf32, #tpu.memory_space<vmem>>, vector<1x512xf32>,
    return
  }
  func.func @transform_0(%arg0: i32) -> (i32, i32) {
    %c0_i32 = arith.constant 0 : i32
    %c0_i32_0 = arith.constant 0 : i32
    return %c0_i32, %arg0 : i32, i32
  }
  func.func @transform_1(%arg0: i32) -> (i32, i32) {
    %c0_i32 = arith.constant 0 : i32
    %c0_i32_0 = arith.constant 0 : i32
    %c0_i32_1 = arith.constant 0 : i32
    return %c0_i32, %c0_i32_0 : i32, i32
  }
  func.func @transform_2(%arg0: i32) -> (i32, i32) {
    %c0_i32 = arith.constant 0 : i32
    %c0_i32_0 = arith.constant 0 : i32
    %c0_i32_1 = arith.constant 0 : i32
    return %c0_i32, %c0_i32_0 : i32, i32
  }
  func.func @transform_3(%arg0: i32) -> (i32, i32) {
    %c0_i32 = arith.constant 0 : i32
    %c0_i32_0 = arith.constant 0 : i32
    return %c0_i32, %arg0 : i32, i32
  }
}

</mosaic_0001>

<bundles_post_ra>
// kernel: ttranse_scores.1
= control target key start
LH: loop header
LB: loop body
LE: loop exit
PB: predicated region body
PF: predicated region fallthrough
CT: control target
= control target key end

     0   :  { %8 = vsyncpa [#allocation3], 0  ;;  %s6242_s0 = inlined_call_operand.hbm [shape: s32[8,1024], index: 0, kind: input, shape index: {}]   ;;  %s6243_s1 = inlined_call_operand.hbm [shape: f32[64,128], index: 1, kind: input, shape index: {}]   ;;  %s6244_s2 = inlined_call_operand.hbm [shape: f32[64,128], index: 2, kind: input, shape index: {}]   ;;  %s6245_s3 = inlined_call_operand.vmem [shape: f32[2,1024], index: 3, kind: output, shape index: {}]  }
   0x1   :  { %10 = vsyncpa [#allocation3 + $0x1], 0 }
   0x2   :  { %11 = vsyncpa [#allocation5], 0  ;;  %s4176_s12 = smov 0   ;;  %s4178_s13 = smov 0  }
   0x3   :  { %s4180_s14 = smov 0   ;;  %s4182_s15 = smov 0  }
   0x4 LB: > { %s3411_s16 = sadd.s32 4294967295, %s4147_s15   ;;  %p37_p0 = scmp.ne.s32.totalorder %s4139_s13, %s4135_s12  ;;  %s4147_s15 = sphi %s4182_s15, %s6263_s15   ;;  %s4143_s14 = sphi %s4180_s14, %s6262_s14   ;;  %s4139_s13 = sphi %s4178_s13, %s6261_s13   ;;  %s4135_s12 = sphi %s4176_s12, %s6260_s12  }
   0x5   : > { %p4198_p1 = scmp.eq.s32.totalorder %s3411_s16, 0  ;;  %p3413_p2 = scmp.ge.s32.totalorder %s4147_s15, 1 }
   0x6   : > { %p116_p3 = scmp.lt.s32.totalorder %s4147_s15, 3  ;;  %s4149_s20 = smov [#allocation4]  }
   0x7   : > { %s6250_s17 = scalar_select %p4198_p1, 1, 0 }
   0x8   : > { %p4206_p4 = por %p4198_p1, %p37_p0  ;;  %p4210_p5 = pnand %p3413_p2, %p116_p3 }
   0x9   : > { %s128_s21 = sshll.u32 %s4149_s20, 4  ;;  %s4150_s23 = smov [#allocation6]   ;;  %s129_s21 = int_to_ptr.vmem [resolvable:$true] %s128_s21 }
   0xa   : > { %s6251_s18 = scalar_select %p4206_p4, 1, 0 }
   0xb   : > { %s6252_s19 = scalar_select %p4210_p5, 1, 0 }
   0xc   : > { %p3959_p6 = pneg %p4210_p5  ;;  %s141_s24 = sshll.u32 %s4150_s23, 4  ;;  %s142_s24 = int_to_ptr.vmem [resolvable:$true] %s141_s24 }
   0xd   : > { %s4040_s25 = scalar_lea.vmem %s129_s21, 1024  ;;  %p4048_p12 = scmp.lt.s32.totalorder %s129_s21, %s129_s21 }
   0xe   : > { %p4218_p7 = pnand %p3959_p6, %p4198_p1  ;;  %p4041_p9 = scmp.ne.s32.totalorder %s129_s21, %s4040_s25 }
   0xf   : > { %p4049_p13 = scmp.lt.s32.totalorder %s4040_s25, %s4040_s25 }
  0x10   : > { %p4031_p8 = pneg %p4218_p7 }
  0x11   : > { %p4050_p0 = por %p4049_p13, %p4048_p12 }
  0x12   : > { %p4043_p10 = pnand %p4041_p9, %p4031_p8 }
  0x14   : > { %p4044_p11 = pneg %p4043_p10 }
  0x16   : > { %p4051_p2 = pnand %p4050_p0, %p4044_p11 }
  0x18   : > { %4054 = shalt.err (!%p4051_p2)
}
  0x19   : > { %s4151_s26 = smov 128   ;;  %s4152_s27 = smov 8  }
  0x1a   : > { %3962 = dma.hbm_to_vmem [thread:$0]  (!%p4218_p7), %s6243_s1, 1024, %s129_s21, [#allocation5], %s4151_s26, %s4151_s26, %s4152_s27  }
  0x1b   : > { %s4066_s30 = scalar_lea.vmem %s142_s24, 1024  ;;  %p4074_p10 = scmp.lt.s32.totalorder %s142_s24, %s142_s24 }
  0x1c   : > { %p4067_p3 = scmp.ne.s32.totalorder %s142_s24, %s4066_s30  ;;  %p4075_p1 = scmp.lt.s32.totalorder %s4066_s30, %s4066_s30 }
  0x1e   : > { %p4069_p6 = pnand %p4067_p3, %p4031_p8  ;;  %p4076_p12 = por %p4075_p1, %p4074_p10 }
  0x20   : > { %p4070_p9 = pneg %p4069_p6 }
  0x22   : > { %p4077_p11 = pnand %p4076_p12, %p4070_p9 }
  0x24   : > { %4080 = shalt.err (!%p4077_p11)
}
  0x25   : > { %3965 = dma.hbm_to_vmem [thread:$0]  (!%p4218_p7), %s6244_s2, 1024, %s142_s24, [#allocation5], %s4151_s26, %s4151_s26, %s4152_s27  }
  0x26   : > { %s4241_s6 = sadd.s32 1, %s4147_s15   ;;  %s24_s7 = sadd.s32 1, %s4143_s14 }
  0x27   : > { %s21_s8 = ssub.s32 %s4147_s15, %s4241_s6  ;;  %p31_p1 = scmp.ne.s32.totalorder %s4143_s14, %s4139_s13 }
  0x28   : > { %p22_p8 = scmp.eq.s32.totalorder %s21_s8, 0  ;;  %p32_p13 = scmp.eq.s32.totalorder %s4147_s15, 0 }
  0x29   : > { %p3972_p0 = scmp.lt.s32.totalorder %s4147_s15, 2  ;;  %s155_s9 = sand.u32 1, %s4143_s14  }
  0x2a   : > { %s4252_s10 = scalar_select %p22_p8, %s4143_s14, %s24_s7  }
  0x2b   : > { %p33_p2 = por %p32_p13, %p31_p1  ;;  %s3417_s11 = sshll.u32 %s155_s9, 5 }
  0x2c   : > { %s3948_s12 = sshll.u32 %s4147_s15, 9  ;;  %s159_s23 = scalar_lea.vmem [#allocation2], %s3417_s11 }
  0x2d   : > { %s4258_s22 = scalar_lea.hbm %s6242_s0, %s3948_s12  ;;  %s167_s24 = sshll.u32 %s159_s23, 4  ;;  %s168_s24 = int_to_ptr.vmem [resolvable:$true] %s167_s24 }
  0x2e   : > { %p4260_p7 = pnand %p3972_p0, %p33_p2  ;;  %s156_s26 = scalar_lea.sflag [#allocation3], %s155_s9 }
  0x2f   : > { %s4081_s27 = scalar_lea.hbm %s4258_s22, 512  ;;  %s4086_s30 = scalar_lea.hbm %s6242_s0, 1024 }
  0x30   : > { %p4082_p3 = scmp.ne.s32.totalorder %s4258_s22, %s4081_s27  ;;  %p4083_p6 = pneg %p4260_p7 }
  0x31   : > { %p4087_p12 = scmp.lt.s32.totalorder %s4258_s22, %s6242_s0  ;;  %p4088_p11 = scmp.lt.s32.totalorder %s4086_s30, %s4081_s27 }
  0x32   : > { %p4084_p9 = pnand %p4083_p6, %p4082_p3 }
  0x33   : > { %p4089_p1 = por %p4088_p11, %p4087_p12 }
  0x34   : > { %p4085_p10 = pneg %p4084_p9 }
  0x36   : > { %p4090_p8 = pnand %p4089_p1, %p4085_p10 }
  0x38   : > { %4093 = shalt.err (!%p4090_p8)
}
  0x39   : > { %s4094_s7 = scalar_lea.vmem %s168_s24, 512  ;;  %s4153_s8 = smov [#allocation2]  }
  0x3a   : > { %p4095_p13 = scmp.ne.s32.totalorder %s168_s24, %s4094_s7  ;;  %s4099_s9 = sshll.u32 %s4153_s8, 4  ;;  %s4100_s9 = int_to_ptr.vmem [resolvable:$false] %s4099_s9 }
  0x3b   : > { %s4101_s11 = scalar_lea.vmem %s4100_s9, 1024  ;;  %p4102_p3 = scmp.lt.s32.totalorder %s168_s24, %s4100_s9 }
  0x3c   : > { %p4097_p0 = pnand %p4095_p13, %p4083_p6  ;;  %p4103_p9 = scmp.lt.s32.totalorder %s4101_s11, %s4094_s7 }
  0x3e   : > { %p4098_p2 = pneg %p4097_p0  ;;  %p4104_p4 = por %p4103_p9, %p4102_p3 }
  0x40   : > { %p4105_p5 = pnand %p4104_p4, %p4098_p2 }
  0x42   : > { %4108 = shalt.err (!%p4105_p5)
}
  0x43   : > { %3969 = dma.hbm_to_vmem [thread:$0]  (!%p4260_p7), %s4258_s22, 512, %s168_s24, %s156_s26  }
  0x44   : > { %p6255_p10 = scmp.ne.s32.totalorder %s6252_s19, 0 }
  0x45   : > { %s178_s12 = sand.u32 (!%p6255_p10), 1, %s4139_s13   ;;  %p6256_p6 = scmp.ne.s32.totalorder (!%p6255_p10), %s6251_s18, 0 }
  0x46   : > { %176 = sbr.rel (%p6255_p10) target bundleno = 669 (0x29d), region = 32  ;;  %s3421_s20 = sshll.u32 (!%p6255_p10), %s178_s12, 5 }
  0x47   : > { %s179_s21 = scalar_lea.sflag (!%p6255_p10), [#allocation3], %s178_s12  ;;  %s4281_s23 = scalar_lea.vmem (!%p6255_p10), [#allocation2], %s3421_s20 }
  0x4b   : > { %4126 = dma.done.wait (%p6256_p6), %s179_s21, 512  }
  0x4c   : > { %4128 = vsyncadd (%p6256_p6), %s179_s21, 4294966784  ;;  %p6257_p4 = scmp.ne.s32.totalorder %s6250_s17, 0 }
  0x4e   : > { %4130 = dma.done.wait (%p6257_p4), [#allocation5], 2048  }
  0x4f   : > { %4132 = vsyncadd (%p6257_p4), [#allocation5], 4294965248  ;;  %v236_v0 = vlaneseq  ;;  %v4154_v1 = vmov 0.0   ;;  %v3555_v15 = vld [vmem:[%s4281_s23 + $0x1] ss:$8 sm:$0xf] }
  0x50   : > { %1284 = vmatprep.mubr.f32.mxu0 %v4154_v1  ;;  %1397 = vmatprep.mubr.f32.mxu1 %v4154_v1  ;;  %v3620_v16 = vld [vmem:[%s4281_s23 + $0x3] ss:$8 sm:$0xf]  ;;  %s3424_s17 = sshll.u32 %s3411_s16, 2 }
  0x51   : > { %v4294_v2 = vshrl.u32 %v236_v0, 7  ;;  %p215_p5 = scmp.lt.s32.totalorder %s3424_s17, 7 }
  0x53   : > { %v4297_v3 = vadd.s32 120, %v4294_v2  ;;  %v4300_v4 = vsub.s32 1, %v4294_v2  ;;  %v4303_v5 = vsub.s32 3, %v4294_v2  ;;  %v4306_v6 = vsub.s32 0, %v4294_v2  ;;  %s6265_s17 = smov (!%p215_p5, %s3424_s17), 7 }
  0x54   : > { %v4309_v7 = vsub.s32 2, %v4294_v2  ;;  %v4312_v8 = vadd.s32 112, %v4294_v2  ;;  %v4315_v9 = vadd.s32 104, %v4294_v2  ;;  %v4318_v10 = vadd.s32 96, %v4294_v2  ;;  %s3425_s15 = sshll.u32 %s6265_s17, 1 }
  0x55   : > { %v4321_v11 = vadd.s32 88, %v4294_v2  ;;  %v4324_v12 = vadd.s32 80, %v4294_v2  ;;  %v4327_v13 = vadd.s32 72, %v4294_v2  ;;  %v4330_v14 = vadd.s32 64, %v4294_v2  ;;  %s6164_s19 = scalar_lea.vmem %s6245_s3, %s3425_s15 }
  0x56   : > { %v4335_v17 = vrot.slane %v3555_v15, %v4300_v4  ;;  %v4338_v18 = vrot.slane %v3620_v16, %v4300_v4  ;;  %v4341_v19 = vrot.slane %v3555_v15, %v4303_v5  ;;  %v4344_v20 = vrot.slane %v3620_v16, %v4303_v5 }
  0x57   : > { %v4347_v21 = vrot.slane %v3555_v15, %v4306_v6  ;;  %v4350_v22 = vrot.slane %v3620_v16, %v4306_v6  ;;  %v4353_v23 = vrot.slane %v3555_v15, %v4309_v7  ;;  %v4356_v24 = vrot.slane %v3620_v16, %v4309_v7 }
  0x58   : > { %vm815_vm0 = vcmp.eq.s32.totalorder %v4297_v3, %v4335_v17  ;;  %vm1025_vm1 = vcmp.eq.s32.totalorder %v4297_v3, %v4338_v18  ;;  %vm817_vm2 = vcmp.eq.s32.totalorder %v4297_v3, %v4341_v19  ;;  %vm1027_vm3 = vcmp.eq.s32.totalorder %v4297_v3, %v4344_v20 }
  0x59   : > { %v3617_v25 = vsel %vm815_vm0, 1.0, %v4154_v1  ;;  %v3682_v26 = vsel %vm1025_vm1, 1.0, %v4154_v1  ;;  %v3619_v27 = vsel %vm817_vm2, 1.0, %v4154_v1  ;;  %v3684_v28 = vsel %vm1027_vm3, 1.0, %v4154_v1 }
  0x5a   : > { %v1217_v29 = vadd.f32 %v3682_v26, %v3617_v25  ;;  %v1219_v30 = vadd.f32 %v3684_v28, %v3619_v27  ;;  %vm814_vm4 = vcmp.eq.s32.totalorder %v4297_v3, %v4347_v21  ;;  %vm1024_vm5 = vcmp.eq.s32.totalorder %v4297_v3, %v4350_v22 }
  0x5b   : > { %v3616_v31 = vsel %vm814_vm4, 1.0, %v4154_v1  ;;  %v3681_v32 = vsel %vm1024_vm5, 1.0, %v4154_v1  ;;  %vm816_vm6 = vcmp.eq.s32.totalorder %v4297_v3, %v4353_v23  ;;  %vm1026_vm7 = vcmp.eq.s32.totalorder %v4297_v3, %v4356_v24 }
  0x5c   : > { %1220 = vmatprep.subr.mxu0 %v1217_v29  ;;  %1333 = vmatprep.subr.mxu1 %v1219_v30  ;;  %v1216_v33 = vadd.f32 %v3681_v32, %v3616_v31  ;;  %v3618_v34 = vsel %vm816_vm6, 1.0, %v4154_v1  ;;  %v3683_v35 = vsel %vm1026_vm7, 1.0, %v4154_v1  ;;  %vm811_vm8 = vcmp.eq.s32.totalorder %v4312_v8, %v4335_v17 }
  0x5d   : > { %v1218_v36 = vadd.f32 %v3683_v35, %v3618_v34  ;;  %v3613_v37 = vsel %vm811_vm8, 1.0, %v4154_v1  ;;  %vm1021_vm9 = vcmp.eq.s32.totalorder %v4312_v8, %v4338_v18  ;;  %vm813_vm10 = vcmp.eq.s32.totalorder %v4312_v8, %v4341_v19 }
  0x5e   : > { %1221 = vmatpush1.msra.mxu0 %v1216_v33  ;;  %v3678_v38 = vsel %vm1021_vm9, 1.0, %v4154_v1  ;;  %v3615_v39 = vsel %vm813_vm10, 1.0, %v4154_v1  ;;  %vm1023_vm11 = vcmp.eq.s32.totalorder %v4312_v8, %v4344_v20  ;;  %vm810_vm12 = vcmp.eq.s32.totalorder %v4312_v8, %v4347_v21 }
  0x5f   : > { %1334 = vmatpush1.msra.mxu1 %v1218_v36  ;;  %v1213_v40 = vadd.f32 %v3678_v38, %v3613_v37  ;;  %v3680_v41 = vsel %vm1023_vm11, 1.0, %v4154_v1  ;;  %v3612_v42 = vsel %vm810_vm12, 1.0, %v4154_v1  ;;  %vm1020_vm13 = vcmp.eq.s32.totalorder %v4312_v8, %v4350_v22 }
  0x60   : > { %v1215_v43 = vadd.f32 %v3680_v41, %v3615_v39  ;;  %v3677_v44 = vsel %vm1020_vm13, 1.0, %v4154_v1  ;;  %vm812_vm14 = vcmp.eq.s32.totalorder %v4312_v8, %v4353_v23  ;;  %vm1022_vm15 = vcmp.eq.s32.totalorder %v4312_v8, %v4356_v24 }
  0x61   : > { %1222 = vmatprep.subr.mxu0 %v1213_v40  ;;  %v1212_v45 = vadd.f32 %v3677_v44, %v3612_v42  ;;  %v3614_v46 = vsel %vm812_vm14, 1.0, %v4154_v1  ;;  %v3679_v47 = vsel %vm1022_vm15, 1.0, %v4154_v1  ;;  %vm807_vm0 = vcmp.eq.s32.totalorder %v4315_v9, %v4335_v17 }
  0x62   : > { %1335 = vmatprep.subr.mxu1 %v1215_v43  ;;  %v1214_v48 = vadd.f32 %v3679_v47, %v3614_v46  ;;  %v3609_v49 = vsel %vm807_vm0, 1.0, %v4154_v1  ;;  %vm1017_vm1 = vcmp.eq.s32.totalorder %v4315_v9, %v4338_v18  ;;  %vm809_vm2 = vcmp.eq.s32.totalorder %v4315_v9, %v4341_v19 }
  0x63   : > { %1223 = vmatpush1.msra.mxu0 %v1212_v45  ;;  %v3674_v50 = vsel %vm1017_vm1, 1.0, %v4154_v1  ;;  %v3611_v51 = vsel %vm809_vm2, 1.0, %v4154_v1  ;;  %vm1019_vm3 = vcmp.eq.s32.totalorder %v4315_v9, %v4344_v20  ;;  %vm806_vm4 = vcmp.eq.s32.totalorder %v4315_v9, %v4347_v21 }
  0x64   : > { %1336 = vmatpush1.msra.mxu1 %v1214_v48  ;;  %v1209_v52 = vadd.f32 %v3674_v50, %v3609_v49  ;;  %v3676_v53 = vsel %vm1019_vm3, 1.0, %v4154_v1  ;;  %v3608_v54 = vsel %vm806_vm4, 1.0, %v4154_v1  ;;  %vm1016_vm5 = vcmp.eq.s32.totalorder %v4315_v9, %v4350_v22 }
  0x65   : > { %v1211_v55 = vadd.f32 %v3676_v53, %v3611_v51  ;;  %v3673_v56 = vsel %vm1016_vm5, 1.0, %v4154_v1  ;;  %vm808_vm6 = vcmp.eq.s32.totalorder %v4315_v9, %v4353_v23  ;;  %vm1018_vm7 = vcmp.eq.s32.totalorder %v4315_v9, %v4356_v24 }
  0x66   : > { %1224 = vmatprep.subr.mxu0 %v1209_v52  ;;  %v1208_v57 = vadd.f32 %v3673_v56, %v3608_v54  ;;  %v3610_v58 = vsel %vm808_vm6, 1.0, %v4154_v1  ;;  %v3675_v59 = vsel %vm1018_vm7, 1.0, %v4154_v1  ;;  %vm803_vm8 = vcmp.eq.s32.totalorder %v4318_v10, %v4335_v17 }
  0x67   : > { %1337 = vmatprep.subr.mxu1 %v1211_v55  ;;  %v1210_v60 = vadd.f32 %v3675_v59, %v3610_v58  ;;  %v3605_v61 = vsel %vm803_vm8, 1.0, %v4154_v1  ;;  %vm1013_vm9 = vcmp.eq.s32.totalorder %v4318_v10, %v4338_v18  ;;  %vm805_vm10 = vcmp.eq.s32.totalorder %v4318_v10, %v4341_v19 }
  0x68   : > { %1225 = vmatpush1.msra.mxu0 %v1208_v57  ;;  %v3670_v62 = vsel %vm1013_vm9, 1.0, %v4154_v1  ;;  %v3607_v63 = vsel %vm805_vm10, 1.0, %v4154_v1  ;;  %vm1015_vm11 = vcmp.eq.s32.totalorder %v4318_v10, %v4344_v20  ;;  %vm802_vm12 = vcmp.eq.s32.totalorder %v4318_v10, %v4347_v21 }
  0x69   : > { %1338 = vmatpush1.msra.mxu1 %v1210_v60  ;;  %v1205_v15 = vadd.f32 %v3670_v62, %v3605_v61  ;;  %v3672_v16 = vsel %vm1015_vm11, 1.0, %v4154_v1  ;;  %v3604_v25 = vsel %vm802_vm12, 1.0, %v4154_v1  ;;  %vm1012_vm13 = vcmp.eq.s32.totalorder %v4318_v10, %v4350_v22 }
  0x6a   : > { %v1207_v26 = vadd.f32 %v3672_v16, %v3607_v63  ;;  %v3669_v27 = vsel %vm1012_vm13, 1.0, %v4154_v1  ;;  %vm804_vm14 = vcmp.eq.s32.totalorder %v4318_v10, %v4353_v23  ;;  %vm1014_vm15 = vcmp.eq.s32.totalorder %v4318_v10, %v4356_v24 }
  0x6b   : > { %1226 = vmatprep.subr.mxu0 %v1205_v15  ;;  %v1204_v28 = vadd.f32 %v3669_v27, %v3604_v25  ;;  %v3606_v29 = vsel %vm804_vm14, 1.0, %v4154_v1  ;;  %v3671_v30 = vsel %vm1014_vm15, 1.0, %v4154_v1  ;;  %vm799_vm0 = vcmp.eq.s32.totalorder %v4321_v11, %v4335_v17 }
  0x6c   : > { %1339 = vmatprep.subr.mxu1 %v1207_v26  ;;  %v1206_v31 = vadd.f32 %v3671_v30, %v3606_v29  ;;  %v3601_v32 = vsel %vm799_vm0, 1.0, %v4154_v1  ;;  %vm1009_vm1 = vcmp.eq.s32.totalorder %v4321_v11, %v4338_v18  ;;  %vm801_vm2 = vcmp.eq.s32.totalorder %v4321_v11, %v4341_v19 }
  0x6d   : > { %1227 = vmatpush1.msra.mxu0 %v1204_v28  ;;  %v3666_v33 = vsel %vm1009_vm1, 1.0, %v4154_v1  ;;  %v3603_v34 = vsel %vm801_vm2, 1.0, %v4154_v1  ;;  %vm1011_vm3 = vcmp.eq.s32.totalorder %v4321_v11, %v4344_v20  ;;  %vm798_vm4 = vcmp.eq.s32.totalorder %v4321_v11, %v4347_v21 }
  0x6e   : > { %1340 = vmatpush1.msra.mxu1 %v1206_v31  ;;  %v1201_v35 = vadd.f32 %v3666_v33, %v3601_v32  ;;  %v3668_v36 = vsel %vm1011_vm3, 1.0, %v4154_v1  ;;  %v3600_v37 = vsel %vm798_vm4, 1.0, %v4154_v1  ;;  %vm1008_vm5 = vcmp.eq.s32.totalorder %v4321_v11, %v4350_v22 }
  0x6f   : > { %v1203_v38 = vadd.f32 %v3668_v36, %v3603_v34  ;;  %v3665_v39 = vsel %vm1008_vm5, 1.0, %v4154_v1  ;;  %vm800_vm6 = vcmp.eq.s32.totalorder %v4321_v11, %v4353_v23  ;;  %vm1010_vm7 = vcmp.eq.s32.totalorder %v4321_v11, %v4356_v24 }
  0x70   : > { %1228 = vmatprep.subr.mxu0 %v1201_v35  ;;  %v1200_v40 = vadd.f32 %v3665_v39, %v3600_v37  ;;  %v3602_v41 = vsel %vm800_vm6, 1.0, %v4154_v1  ;;  %v3667_v42 = vsel %vm1010_vm7, 1.0, %v4154_v1  ;;  %vm795_vm8 = vcmp.eq.s32.totalorder %v4324_v12, %v4335_v17 }
  0x71   : > { %1341 = vmatprep.subr.mxu1 %v1203_v38  ;;  %v1202_v43 = vadd.f32 %v3667_v42, %v3602_v41  ;;  %v3597_v44 = vsel %vm795_vm8, 1.0, %v4154_v1  ;;  %vm1005_vm9 = vcmp.eq.s32.totalorder %v4324_v12, %v4338_v18  ;;  %vm797_vm10 = vcmp.eq.s32.totalorder %v4324_v12, %v4341_v19 }
  0x72   : > { %1229 = vmatpush1.msra.mxu0 %v1200_v40  ;;  %v3662_v45 = vsel %vm1005_vm9, 1.0, %v4154_v1  ;;  %v3599_v46 = vsel %vm797_vm10, 1.0, %v4154_v1  ;;  %vm1007_vm11 = vcmp.eq.s32.totalorder %v4324_v12, %v4344_v20  ;;  %vm794_vm12 = vcmp.eq.s32.totalorder %v4324_v12, %v4347_v21 }
  0x73   : > { %1342 = vmatpush1.msra.mxu1 %v1202_v43  ;;  %v1197_v47 = vadd.f32 %v3662_v45, %v3597_v44  ;;  %v3664_v48 = vsel %vm1007_vm11, 1.0, %v4154_v1  ;;  %v3596_v49 = vsel %vm794_vm12, 1.0, %v4154_v1  ;;  %vm1004_vm13 = vcmp.eq.s32.totalorder %v4324_v12, %v4350_v22 }
  0x74   : > { %v1199_v50 = vadd.f32 %v3664_v48, %v3599_v46  ;;  %v3661_v51 = vsel %vm1004_vm13, 1.0, %v4154_v1  ;;  %vm796_vm14 = vcmp.eq.s32.totalorder %v4324_v12, %v4353_v23  ;;  %vm1006_vm15 = vcmp.eq.s32.totalorder %v4324_v12, %v4356_v24 }
  0x75   : > { %1230 = vmatprep.subr.mxu0 %v1197_v47  ;;  %v1196_v52 = vadd.f32 %v3661_v51, %v3596_v49  ;;  %v3598_v53 = vsel %vm796_vm14, 1.0, %v4154_v1  ;;  %v3663_v54 = vsel %vm1006_vm15, 1.0, %v4154_v1  ;;  %vm791_vm0 = vcmp.eq.s32.totalorder %v4327_v13, %v4335_v17 }
  0x76   : > { %1343 = vmatprep.subr.mxu1 %v1199_v50  ;;  %v1198_v55 = vadd.f32 %v3663_v54, %v3598_v53  ;;  %v3593_v56 = vsel %vm791_vm0, 1.0, %v4154_v1  ;;  %vm1001_vm1 = vcmp.eq.s32.totalorder %v4327_v13, %v4338_v18  ;;  %vm793_vm2 = vcmp.eq.s32.totalorder %v4327_v13, %v4341_v19 }
  0x77   : > { %1231 = vmatpush1.msra.mxu0 %v1196_v52  ;;  %v3658_v57 = vsel %vm1001_vm1, 1.0, %v4154_v1  ;;  %v3595_v58 = vsel %vm793_vm2, 1.0, %v4154_v1  ;;  %vm1003_vm3 = vcmp.eq.s32.totalorder %v4327_v13, %v4344_v20  ;;  %vm790_vm4 = vcmp.eq.s32.totalorder %v4327_v13, %v4347_v21 }
  0x78   : > { %1344 = vmatpush1.msra.mxu1 %v1198_v55  ;;  %v1193_v59 = vadd.f32 %v3658_v57, %v3593_v56  ;;  %v3660_v60 = vsel %vm1003_vm3, 1.0, %v4154_v1  ;;  %v3592_v61 = vsel %vm790_vm4, 1.0, %v4154_v1  ;;  %vm1000_vm5 = vcmp.eq.s32.totalorder %v4327_v13, %v4350_v22 }
  0x79   : > { %v1195_v62 = vadd.f32 %v3660_v60, %v3595_v58  ;;  %v3657_v63 = vsel %vm1000_vm5, 1.0, %v4154_v1  ;;  %vm792_vm6 = vcmp.eq.s32.totalorder %v4327_v13, %v4353_v23  ;;  %vm1002_vm7 = vcmp.eq.s32.totalorder %v4327_v13, %v4356_v24 }
  0x7a   : > { %1232 = vmatprep.subr.mxu0 %v1193_v59  ;;  %v1192_v15 = vadd.f32 %v3657_v63, %v3592_v61  ;;  %v3594_v16 = vsel %vm792_vm6, 1.0, %v4154_v1  ;;  %v3659_v25 = vsel %vm1002_vm7, 1.0, %v4154_v1  ;;  %vm787_vm8 = vcmp.eq.s32.totalorder %v4330_v14, %v4335_v17 }
  0x7b   : > { %1345 = vmatprep.subr.mxu1 %v1195_v62  ;;  %v1194_v26 = vadd.f32 %v3659_v25, %v3594_v16  ;;  %v3589_v27 = vsel %vm787_vm8, 1.0, %v4154_v1  ;;  %vm997_vm9 = vcmp.eq.s32.totalorder %v4330_v14, %v4338_v18  ;;  %vm789_vm10 = vcmp.eq.s32.totalorder %v4330_v14, %v4341_v19 }
  0x7c   : > { %1233 = vmatpush1.msra.mxu0 %v1192_v15  ;;  %v3654_v28 = vsel %vm997_vm9, 1.0, %v4154_v1  ;;  %v3591_v29 = vsel %vm789_vm10, 1.0, %v4154_v1  ;;  %vm999_vm11 = vcmp.eq.s32.totalorder %v4330_v14, %v4344_v20  ;;  %vm786_vm12 = vcmp.eq.s32.totalorder %v4330_v14, %v4347_v21 }
  0x7d   : > { %1346 = vmatpush1.msra.mxu1 %v1194_v26  ;;  %v1189_v30 = vadd.f32 %v3654_v28, %v3589_v27  ;;  %v3656_v31 = vsel %vm999_vm11, 1.0, %v4154_v1  ;;  %v3588_v32 = vsel %vm786_vm12, 1.0, %v4154_v1  ;;  %vm996_vm13 = vcmp.eq.s32.totalorder %v4330_v14, %v4350_v22 }
  0x7e   : > { %v1191_v33 = vadd.f32 %v3656_v31, %v3591_v29  ;;  %v3653_v34 = vsel %vm996_vm13, 1.0, %v4154_v1  ;;  %vm788_vm14 = vcmp.eq.s32.totalorder %v4330_v14, %v4353_v23  ;;  %vm998_vm15 = vcmp.eq.s32.totalorder %v4330_v14, %v4356_v24 }
  0x7f   : > { %1234 = vmatprep.subr.mxu0 %v1189_v30  ;;  %v1188_v35 = vadd.f32 %v3653_v34, %v3588_v32  ;;  %v3590_v36 = vsel %vm788_vm14, 1.0, %v4154_v1  ;;  %v3655_v37 = vsel %vm998_vm15, 1.0, %v4154_v1  ;;  %v4551_v38 = vadd.s32 56, %v4294_v2 }
  0x80   : > { %1347 = vmatprep.subr.mxu1 %v1191_v33  ;;  %v1190_v39 = vadd.f32 %v3655_v37, %v3590_v36  ;;  %v4554_v40 = vadd.s32 48, %v4294_v2  ;;  %v4557_v41 = vadd.s32 40, %v4294_v2  ;;  %v4560_v42 = vadd.s32 32, %v4294_v2 }
  0x81   : > { %1235 = vmatpush1.msra.mxu0 %v1188_v35  ;;  %vm783_vm0 = vcmp.eq.s32.totalorder %v4551_v38, %v4335_v17  ;;  %vm993_vm1 = vcmp.eq.s32.totalorder %v4551_v38, %v4338_v18  ;;  %vm785_vm2 = vcmp.eq.s32.totalorder %v4551_v38, %v4341_v19  ;;  %vm995_vm3 = vcmp.eq.s32.totalorder %v4551_v38, %v4344_v20 }
  0x82   : > { %1348 = vmatpush1.msra.mxu1 %v1190_v39  ;;  %v3585_v43 = vsel %vm783_vm0, 1.0, %v4154_v1  ;;  %v3650_v44 = vsel %vm993_vm1, 1.0, %v4154_v1  ;;  %v3587_v45 = vsel %vm785_vm2, 1.0, %v4154_v1  ;;  %v3652_v46 = vsel %vm995_vm3, 1.0, %v4154_v1 }
  0x83   : > { %v1185_v47 = vadd.f32 %v3650_v44, %v3585_v43  ;;  %v1187_v48 = vadd.f32 %v3652_v46, %v3587_v45  ;;  %vm782_vm4 = vcmp.eq.s32.totalorder %v4551_v38, %v4347_v21  ;;  %vm992_vm5 = vcmp.eq.s32.totalorder %v4551_v38, %v4350_v22 }
  0x84   : > { %v3584_v49 = vsel %vm782_vm4, 1.0, %v4154_v1  ;;  %v3649_v50 = vsel %vm992_vm5, 1.0, %v4154_v1  ;;  %vm784_vm6 = vcmp.eq.s32.totalorder %v4551_v38, %v4353_v23  ;;  %vm994_vm7 = vcmp.eq.s32.totalorder %v4551_v38, %v4356_v24 }
  0x85   : > { %1236 = vmatprep.subr.mxu0 %v1185_v47  ;;  %1349 = vmatprep.subr.mxu1 %v1187_v48  ;;  %v1184_v51 = vadd.f32 %v3649_v50, %v3584_v49  ;;  %v3586_v52 = vsel %vm784_vm6, 1.0, %v4154_v1  ;;  %v3651_v53 = vsel %vm994_vm7, 1.0, %v4154_v1  ;;  %vm779_vm8 = vcmp.eq.s32.totalorder %v4554_v40, %v4335_v17 }
  0x86   : > { %v1186_v54 = vadd.f32 %v3651_v53, %v3586_v52  ;;  %v3581_v55 = vsel %vm779_vm8, 1.0, %v4154_v1  ;;  %vm989_vm9 = vcmp.eq.s32.totalorder %v4554_v40, %v4338_v18  ;;  %vm781_vm10 = vcmp.eq.s32.totalorder %v4554_v40, %v4341_v19 }
  0x87   : > { %1237 = vmatpush1.msra.mxu0 %v1184_v51  ;;  %v3646_v56 = vsel %vm989_vm9, 1.0, %v4154_v1  ;;  %v3583_v57 = vsel %vm781_vm10, 1.0, %v4154_v1  ;;  %vm991_vm11 = vcmp.eq.s32.totalorder %v4554_v40, %v4344_v20  ;;  %vm778_vm12 = vcmp.eq.s32.totalorder %v4554_v40, %v4347_v21 }
  0x88   : > { %1350 = vmatpush1.msra.mxu1 %v1186_v54  ;;  %v1181_v58 = vadd.f32 %v3646_v56, %v3581_v55  ;;  %v3648_v59 = vsel %vm991_vm11, 1.0, %v4154_v1  ;;  %v3580_v60 = vsel %vm778_vm12, 1.0, %v4154_v1  ;;  %vm988_vm13 = vcmp.eq.s32.totalorder %v4554_v40, %v4350_v22 }
  0x89   : > { %v1183_v61 = vadd.f32 %v3648_v59, %v3583_v57  ;;  %v3645_v62 = vsel %vm988_vm13, 1.0, %v4154_v1  ;;  %vm780_vm14 = vcmp.eq.s32.totalorder %v4554_v40, %v4353_v23  ;;  %vm990_vm15 = vcmp.eq.s32.totalorder %v4554_v40, %v4356_v24 }
  0x8a   : > { %1238 = vmatprep.subr.mxu0 %v1181_v58  ;;  %v1180_v63 = vadd.f32 %v3645_v62, %v3580_v60  ;;  %v3582_v15 = vsel %vm780_vm14, 1.0, %v4154_v1  ;;  %v3647_v16 = vsel %vm990_vm15, 1.0, %v4154_v1  ;;  %vm775_vm0 = vcmp.eq.s32.totalorder %v4557_v41, %v4335_v17 }
  0x8b   : > { %1351 = vmatprep.subr.mxu1 %v1183_v61  ;;  %v1182_v25 = vadd.f32 %v3647_v16, %v3582_v15  ;;  %v3577_v26 = vsel %vm775_vm0, 1.0, %v4154_v1  ;;  %vm985_vm1 = vcmp.eq.s32.totalorder %v4557_v41, %v4338_v18  ;;  %vm777_vm2 = vcmp.eq.s32.totalorder %v4557_v41, %v4341_v19 }
  0x8c   : > { %1239 = vmatpush1.msra.mxu0 %v1180_v63  ;;  %v3642_v27 = vsel %vm985_vm1, 1.0, %v4154_v1  ;;  %v3579_v28 = vsel %vm777_vm2, 1.0, %v4154_v1  ;;  %vm987_vm3 = vcmp.eq.s32.totalorder %v4557_v41, %v4344_v20  ;;  %vm774_vm4 = vcmp.eq.s32.totalorder %v4557_v41, %v4347_v21 }
  0x8d   : > { %1352 = vmatpush1.msra.mxu1 %v1182_v25  ;;  %v1177_v29 = vadd.f32 %v3642_v27, %v3577_v26  ;;  %v3644_v30 = vsel %vm987_vm3, 1.0, %v4154_v1  ;;  %v3576_v31 = vsel %vm774_vm4, 1.0, %v4154_v1  ;;  %vm984_vm5 = vcmp.eq.s32.totalorder %v4557_v41, %v4350_v22 }
  0x8e   : > { %v1179_v32 = vadd.f32 %v3644_v30, %v3579_v28  ;;  %v3641_v33 = vsel %vm984_vm5, 1.0, %v4154_v1  ;;  %vm776_vm6 = vcmp.eq.s32.totalorder %v4557_v41, %v4353_v23  ;;  %vm986_vm7 = vcmp.eq.s32.totalorder %v4557_v41, %v4356_v24 }
  0x8f   : > { %1240 = vmatprep.subr.mxu0 %v1177_v29  ;;  %v1176_v34 = vadd.f32 %v3641_v33, %v3576_v31  ;;  %v3578_v35 = vsel %vm776_vm6, 1.0, %v4154_v1  ;;  %v3643_v36 = vsel %vm986_vm7, 1.0, %v4154_v1  ;;  %vm771_vm8 = vcmp.eq.s32.totalorder %v4560_v42, %v4335_v17 }
  0x90   : > { %1353 = vmatprep.subr.mxu1 %v1179_v32  ;;  %v1178_v37 = vadd.f32 %v3643_v36, %v3578_v35  ;;  %v3573_v39 = vsel %vm771_vm8, 1.0, %v4154_v1  ;;  %vm981_vm9 = vcmp.eq.s32.totalorder %v4560_v42, %v4338_v18  ;;  %vm773_vm10 = vcmp.eq.s32.totalorder %v4560_v42, %v4341_v19 }
  0x91   : > { %1241 = vmatpush1.msra.mxu0 %v1176_v34  ;;  %v3638_v43 = vsel %vm981_vm9, 1.0, %v4154_v1  ;;  %v3575_v44 = vsel %vm773_vm10, 1.0, %v4154_v1  ;;  %vm983_vm11 = vcmp.eq.s32.totalorder %v4560_v42, %v4344_v20  ;;  %vm770_vm12 = vcmp.eq.s32.totalorder %v4560_v42, %v4347_v21 }
  0x92   : > { %1354 = vmatpush1.msra.mxu1 %v1178_v37  ;;  %v1173_v45 = vadd.f32 %v3638_v43, %v3573_v39  ;;  %v3640_v46 = vsel %vm983_vm11, 1.0, %v4154_v1  ;;  %v3572_v47 = vsel %vm770_vm12, 1.0, %v4154_v1  ;;  %vm980_vm13 = vcmp.eq.s32.totalorder %v4560_v42, %v4350_v22 }
  0x93   : > { %v1175_v48 = vadd.f32 %v3640_v46, %v3575_v44  ;;  %v3637_v49 = vsel %vm980_vm13, 1.0, %v4154_v1  ;;  %vm772_vm14 = vcmp.eq.s32.totalorder %v4560_v42, %v4353_v23  ;;  %vm982_vm15 = vcmp.eq.s32.totalorder %v4560_v42, %v4356_v24 }
  0x94   : > { %1242 = vmatprep.subr.mxu0 %v1173_v45  ;;  %v1172_v50 = vadd.f32 %v3637_v49, %v3572_v47  ;;  %v3574_v51 = vsel %vm772_vm14, 1.0, %v4154_v1  ;;  %v3639_v52 = vsel %vm982_vm15, 1.0, %v4154_v1  ;;  %v4659_v53 = vadd.s32 24, %v4294_v2 }
  0x95   : > { %1355 = vmatprep.subr.mxu1 %v1175_v48  ;;  %v1174_v54 = vadd.f32 %v3639_v52, %v3574_v51  ;;  %v4662_v55 = vadd.s32 16, %v4294_v2  ;;  %v4665_v56 = vadd.s32 8, %v4294_v2  ;;  %vm755_vm8 = vcmp.eq.s32.totalorder %v4294_v2, %v4335_v17 }
  0x96   : > { %1243 = vmatpush1.msra.mxu0 %v1172_v50  ;;  %vm767_vm0 = vcmp.eq.s32.totalorder %v4659_v53, %v4335_v17  ;;  %vm977_vm1 = vcmp.eq.s32.totalorder %v4659_v53, %v4338_v18  ;;  %vm769_vm2 = vcmp.eq.s32.totalorder %v4659_v53, %v4341_v19  ;;  %vm979_vm3 = vcmp.eq.s32.totalorder %v4659_v53, %v4344_v20 }
  0x97   : > { %1356 = vmatpush1.msra.mxu1 %v1174_v54  ;;  %v3569_v57 = vsel %vm767_vm0, 1.0, %v4154_v1  ;;  %v3634_v58 = vsel %vm977_vm1, 1.0, %v4154_v1  ;;  %v3571_v59 = vsel %vm769_vm2, 1.0, %v4154_v1  ;;  %v3636_v60 = vsel %vm979_vm3, 1.0, %v4154_v1 }
  0x98   : > { %v1169_v61 = vadd.f32 %v3634_v58, %v3569_v57  ;;  %v1171_v62 = vadd.f32 %v3636_v60, %v3571_v59  ;;  %vm766_vm4 = vcmp.eq.s32.totalorder %v4659_v53, %v4347_v21  ;;  %vm976_vm5 = vcmp.eq.s32.totalorder %v4659_v53, %v4350_v22  ;;  %v253_v60 = vld [vmem:[%s4281_s23] ss:$8 sm:$0xf] }
  0x99   : > { %v3568_v63 = vsel %vm766_vm4, 1.0, %v4154_v1  ;;  %v3633_v15 = vsel %vm976_vm5, 1.0, %v4154_v1  ;;  %vm768_vm6 = vcmp.eq.s32.totalorder %v4659_v53, %v4353_v23  ;;  %vm978_vm7 = vcmp.eq.s32.totalorder %v4659_v53, %v4356_v24 }
  0x9a   : > { %1244 = vmatprep.subr.mxu0 %v1169_v61  ;;  %1357 = vmatprep.subr.mxu1 %v1171_v62  ;;  %v1168_v16 = vadd.f32 %v3633_v15, %v3568_v63  ;;  %v3570_v25 = vsel %vm768_vm6, 1.0, %v4154_v1  ;;  %v3635_v26 = vsel %vm978_vm7, 1.0, %v4154_v1  ;;  %vm763_vm9 = vcmp.eq.s32.totalorder %v4662_v55, %v4335_v17  ;;  %v3490_v63 = vld [vmem:[%s4281_s23 + $0x2] ss:$8 sm:$0xf] }
  0x9b   : > { %v1170_v27 = vadd.f32 %v3635_v26, %v3570_v25  ;;  %v3565_v28 = vsel %vm763_vm9, 1.0, %v4154_v1  ;;  %vm973_vm10 = vcmp.eq.s32.totalorder %v4662_v55, %v4338_v18  ;;  %vm765_vm11 = vcmp.eq.s32.totalorder %v4662_v55, %v4341_v19 }
  0x9c   : > { %1245 = vmatpush1.msra.mxu0 %v1168_v16  ;;  %v3630_v29 = vsel %vm973_vm10, 1.0, %v4154_v1  ;;  %v3567_v30 = vsel %vm765_vm11, 1.0, %v4154_v1  ;;  %vm975_vm12 = vcmp.eq.s32.totalorder %v4662_v55, %v4344_v20  ;;  %vm762_vm13 = vcmp.eq.s32.totalorder %v4662_v55, %v4347_v21 }
  0x9d   : > { %1358 = vmatpush1.msra.mxu1 %v1170_v27  ;;  %v1165_v31 = vadd.f32 %v3630_v29, %v3565_v28  ;;  %v3632_v32 = vsel %vm975_vm12, 1.0, %v4154_v1  ;;  %v3564_v33 = vsel %vm762_vm13, 1.0, %v4154_v1  ;;  %vm972_vm14 = vcmp.eq.s32.totalorder %v4662_v55, %v4350_v22  ;;  %v228_v27 = vld [vmem:[#allocation6] sm:$0xff] }
  0x9e   : > { %v1167_v34 = vadd.f32 %v3632_v32, %v3567_v30  ;;  %v3629_v35 = vsel %vm972_vm14, 1.0, %v4154_v1  ;;  %vm764_vm15 = vcmp.eq.s32.totalorder %v4662_v55, %v4353_v23  ;;  %vm974_vm0 = vcmp.eq.s32.totalorder %v4662_v55, %v4356_v24 }
  0x9f   : > { %1246 = vmatprep.subr.mxu0 %v1165_v31  ;;  %v1164_v36 = vadd.f32 %v3629_v35, %v3564_v33  ;;  %v3566_v37 = vsel %vm764_vm15, 1.0, %v4154_v1  ;;  %v3631_v39 = vsel %vm974_vm0, 1.0, %v4154_v1  ;;  %vm759_vm1 = vcmp.eq.s32.totalorder %v4665_v56, %v4335_v17 }
  0xa0   : > { %1359 = vmatprep.subr.mxu1 %v1167_v34  ;;  %v1166_v43 = vadd.f32 %v3631_v39, %v3566_v37  ;;  %v3561_v44 = vsel %vm759_vm1, 1.0, %v4154_v1  ;;  %vm969_vm2 = vcmp.eq.s32.totalorder %v4665_v56, %v4338_v18  ;;  %vm761_vm3 = vcmp.eq.s32.totalorder %v4665_v56, %v4341_v19  ;;  %v229_v37 = vld [vmem:[#allocation6 + $0x8] sm:$0xff] }
  0xa1   : > { %1247 = vmatpush1.msra.mxu0 %v1164_v36  ;;  %v3626_v45 = vsel %vm969_vm2, 1.0, %v4154_v1  ;;  %v3563_v46 = vsel %vm761_vm3, 1.0, %v4154_v1  ;;  %vm971_vm4 = vcmp.eq.s32.totalorder %v4665_v56, %v4344_v20  ;;  %vm758_vm5 = vcmp.eq.s32.totalorder %v4665_v56, %v4347_v21 }
  0xa2   : > { %1360 = vmatpush1.msra.mxu1 %v1166_v43  ;;  %v1161_v47 = vadd.f32 %v3626_v45, %v3561_v44  ;;  %v3628_v48 = vsel %vm971_vm4, 1.0, %v4154_v1  ;;  %v3560_v49 = vsel %vm758_vm5, 1.0, %v4154_v1  ;;  %vm968_vm6 = vcmp.eq.s32.totalorder %v4665_v56, %v4350_v22 }
  0xa3   : > { %v1163_v50 = vadd.f32 %v3628_v48, %v3563_v46  ;;  %v3625_v51 = vsel %vm968_vm6, 1.0, %v4154_v1  ;;  %vm760_vm7 = vcmp.eq.s32.totalorder %v4665_v56, %v4353_v23  ;;  %vm970_vm9 = vcmp.eq.s32.totalorder %v4665_v56, %v4356_v24 }
  0xa4   : > { %1248 = vmatprep.subr.mxu0 %v1161_v47  ;;  %v1160_v52 = vadd.f32 %v3625_v51, %v3560_v49  ;;  %v3562_v54 = vsel %vm760_vm7, 1.0, %v4154_v1  ;;  %v3627_v57 = vsel %vm970_vm9, 1.0, %v4154_v1  ;;  %v3557_v58 = vsel %vm755_vm8, 1.0, %v4154_v1  ;;  %v230_v51 = vld [vmem:[#allocation6 + $0x10] sm:$0xff] }
  0xa5   : > { %1361 = vmatprep.subr.mxu1 %v1163_v50  ;;  %v1162_v59 = vadd.f32 %v3627_v57, %v3562_v54  ;;  %vm965_vm10 = vcmp.eq.s32.totalorder %v4294_v2, %v4338_v18  ;;  %vm757_vm11 = vcmp.eq.s32.totalorder %v4294_v2, %v4341_v19  ;;  %vm967_vm12 = vcmp.eq.s32.totalorder %v4294_v2, %v4344_v20 }
  0xa6   : > { %1249 = vmatpush1.msra.mxu0 %v1160_v52  ;;  %v3622_v61 = vsel %vm965_vm10, 1.0, %v4154_v1  ;;  %v3559_v62 = vsel %vm757_vm11, 1.0, %v4154_v1  ;;  %v3624_v17 = vsel %vm967_vm12, 1.0, %v4154_v1  ;;  %vm754_vm8 = vcmp.eq.s32.totalorder %v4294_v2, %v4347_v21 }
  0xa7   : > { %1362 = vmatpush1.msra.mxu1 %v1162_v59  ;;  %v1157_v18 = vadd.f32 %v3622_v61, %v3557_v58  ;;  %v1159_v15 = vadd.f32 %v3624_v17, %v3559_v62  ;;  %v3556_v19 = vsel %vm754_vm8, 1.0, %v4154_v1  ;;  %vm964_vm13 = vcmp.eq.s32.totalorder %v4294_v2, %v4350_v22 }
  0xa8   : > { %v3621_v20 = vsel %vm964_vm13, 1.0, %v4154_v1  ;;  %vm756_vm14 = vcmp.eq.s32.totalorder %v4294_v2, %v4353_v23  ;;  %vm966_vm15 = vcmp.eq.s32.totalorder %v4294_v2, %v4356_v24  ;;  %v4767_v16 = vrot.slane %v253_v60, %v4300_v4 }
  0xa9   : > { %1250 = vmatprep.subr.mxu0 %v1157_v18  ;;  %1363 = vmatprep.subr.mxu1 %v1159_v15  ;;  %v1156_v21 = vadd.f32 %v3621_v20, %v3556_v19  ;;  %v3558_v25 = vsel %vm756_vm14, 1.0, %v4154_v1  ;;  %v3623_v26 = vsel %vm966_vm15, 1.0, %v4154_v1  ;;  %v4772_v22 = vrot.slane %v3490_v63, %v4300_v4  ;;  %v231_v19 = vld [vmem:[#allocation6 + $0x18] sm:$0xff] }
  0xaa   : > { %v1158_v28 = vadd.f32 %v3623_v26, %v3558_v25  ;;  %vm331_vm0 = vcmp.eq.s32.totalorder %v4297_v3, %v4767_v16  ;;  %v4777_v23 = vrot.slane %v253_v60, %v4303_v5  ;;  %v4780_v24 = vrot.slane %v3490_v63, %v4303_v5 }
  0xab   : > { %1251 = vmatpush1.msra.mxu0 %v1156_v21  ;;  %v3487_v29 = vsel %vm331_vm0, 1.0, %v4154_v1  ;;  %vm541_vm1 = vcmp.eq.s32.totalorder %v4297_v3, %v4772_v22  ;;  %v4786_v30 = vrot.slane %v253_v60, %v4306_v6  ;;  %v4789_v31 = vrot.slane %v3490_v63, %v4306_v6 }
  0xac   : > { %1364 = vmatpush1.msra.mxu1 %v1158_v28  ;;  %1285 = vmatmul.mubr.f32.vlgmr.msra.gmra.mxu0 %v228_v27  ;;  %v3552_v32 = vsel %vm541_vm1, 1.0, %v4154_v1  ;;  %vm333_vm2 = vcmp.eq.s32.totalorder %v4297_v3, %v4777_v23  ;;  %vm543_vm3 = vcmp.eq.s32.totalorder %v4297_v3, %v4780_v24  ;;  %v4797_v33 = vrot.slane %v253_v60, %v4309_v7 }
  0xad   : > { %1398 = vmatmul.mubr.f32.vlgmr.msra.gmra.mxu1 %v228_v27  ;;  %v733_v34 = vsub.f32 %v3487_v29, %v3552_v32  ;;  %v3489_v35 = vsel %vm333_vm2, 1.0, %v4154_v1  ;;  %v3554_v36 = vsel %vm543_vm3, 1.0, %v4154_v1  ;;  %vm330_vm4 = vcmp.eq.s32.totalorder %v4297_v3, %v4786_v30  ;;  %1290 = vmatprep.mubr.f32.mxu0 %v4154_v1 }
  0xae   : > { %v735_v39 = vsub.f32 %v3489_v35, %v3554_v36  ;;  %v3486_v43 = vsel %vm330_vm4, 1.0, %v4154_v1  ;;  %vm540_vm5 = vcmp.eq.s32.totalorder %v4297_v3, %v4789_v31  ;;  %vm332_vm6 = vcmp.eq.s32.totalorder %v4297_v3, %v4797_v33  ;;  %1403 = vmatprep.mubr.f32.mxu1 %v4154_v1 }
  0xaf   : > { %1446 = vmatprep.subr.mxu0 %v733_v34  ;;  %v3551_v44 = vsel %vm540_vm5, 1.0, %v4154_v1  ;;  %v3488_v45 = vsel %vm332_vm6, 1.0, %v4154_v1  ;;  %v4813_v46 = vrot.slane %v3490_v63, %v4309_v7  ;;  %vm327_vm7 = vcmp.eq.s32.totalorder %v4312_v8, %v4767_v16 }
  0xb0   : > { %1559 = vmatprep.subr.mxu1 %v735_v39  ;;  %v732_v47 = vsub.f32 %v3486_v43, %v3551_v44  ;;  %v3483_v48 = vsel %vm327_vm7, 1.0, %v4154_v1  ;;  %vm537_vm9 = vcmp.eq.s32.totalorder %v4312_v8, %v4772_v22  ;;  %vm329_vm10 = vcmp.eq.s32.totalorder %v4312_v8, %v4777_v23  ;;  %1291 = vmatmul.mubr.f32.gmra.mxu0 %v229_v37  ;;  %v232_v39 = vld [vmem:[#allocation6 + $0x20] sm:$0xff] }
  0xb1   : > { %vm542_vm11 = vcmp.eq.s32.totalorder %v4297_v3, %v4813_v46  ;;  %v3548_v49 = vsel %vm537_vm9, 1.0, %v4154_v1  ;;  %v3485_v50 = vsel %vm329_vm10, 1.0, %v4154_v1  ;;  %vm539_vm12 = vcmp.eq.s32.totalorder %v4312_v8, %v4780_v24  ;;  %1404 = vmatmul.mubr.f32.gmra.mxu1 %v229_v37  ;;  %1296 = vmatprep.mubr.f32.mxu0 %v4154_v1 }
  0xb2   : > { %1447 = vmatpush1.msra.mxu0 %v732_v47  ;;  %v3553_v52 = vsel %vm542_vm11, 1.0, %v4154_v1  ;;  %v729_v54 = vsub.f32 %v3483_v48, %v3548_v49  ;;  %v3550_v57 = vsel %vm539_vm12, 1.0, %v4154_v1  ;;  %vm326_vm8 = vcmp.eq.s32.totalorder %v4312_v8, %v4786_v30  ;;  %1409 = vmatprep.mubr.f32.mxu1 %v4154_v1 }
  0xb3   : > { %v734_v58 = vsub.f32 %v3488_v45, %v3553_v52  ;;  %v731_v59 = vsub.f32 %v3485_v50, %v3550_v57  ;;  %v3482_v60 = vsel %vm326_vm8, 1.0, %v4154_v1  ;;  %vm536_vm13 = vcmp.eq.s32.totalorder %v4312_v8, %v4789_v31 }
  0xb4   : > { %1448 = vmatprep.subr.mxu0 %v729_v54  ;;  %v3547_v61 = vsel %vm536_vm13, 1.0, %v4154_v1  ;;  %vm328_vm14 = vcmp.eq.s32.totalorder %v4312_v8, %v4797_v33  ;;  %vm538_vm15 = vcmp.eq.s32.totalorder %v4312_v8, %v4813_v46  ;;  %vm323_vm0 = vcmp.eq.s32.totalorder %v4315_v9, %v4767_v16  ;;  %1297 = vmatmul.mubr.f32.gmra.mxu0 %v230_v51 }
  0xb5   : > { %1560 = vmatpush1.msra.mxu1 %v734_v58  ;;  %v728_v62 = vsub.f32 %v3482_v60, %v3547_v61  ;;  %v3484_v17 = vsel %vm328_vm14, 1.0, %v4154_v1  ;;  %v3549_v63 = vsel %vm538_vm15, 1.0, %v4154_v1  ;;  %v3479_v18 = vsel %vm323_vm0, 1.0, %v4154_v1  ;;  %1302 = vmatprep.mubr.f32.mxu0 %v4154_v1 }
  0xb6   : > { %1561 = vmatprep.subr.mxu1 %v731_v59  ;;  %v730_v15 = vsub.f32 %v3484_v17, %v3549_v63  ;;  %vm533_vm1 = vcmp.eq.s32.totalorder %v4315_v9, %v4772_v22  ;;  %vm325_vm2 = vcmp.eq.s32.totalorder %v4315_v9, %v4777_v23  ;;  %vm535_vm3 = vcmp.eq.s32.totalorder %v4315_v9, %v4780_v24  ;;  %v233_v59 = vld [vmem:[#allocation6 + $0x28] sm:$0xff] }
  0xb7   : > { %1449 = vmatpush1.msra.mxu0 %v728_v62  ;;  %v3544_v20 = vsel %vm533_vm1, 1.0, %v4154_v1  ;;  %v3481_v21 = vsel %vm325_vm2, 1.0, %v4154_v1  ;;  %v3546_v25 = vsel %vm535_vm3, 1.0, %v4154_v1  ;;  %vm322_vm4 = vcmp.eq.s32.totalorder %v4315_v9, %v4786_v30  ;;  %1410 = vmatmul.mubr.f32.gmra.mxu1 %v230_v51 }
  0xb8   : > { %1562 = vmatpush1.msra.mxu1 %v730_v15  ;;  %v725_v26 = vsub.f32 %v3479_v18, %v3544_v20  ;;  %v727_v27 = vsub.f32 %v3481_v21, %v3546_v25  ;;  %v3478_v28 = vsel %vm322_vm4, 1.0, %v4154_v1  ;;  %vm532_vm5 = vcmp.eq.s32.totalorder %v4315_v9, %v4789_v31  ;;  %1415 = vmatprep.mubr.f32.mxu1 %v4154_v1 }
  0xb9   : > { %v3543_v29 = vsel %vm532_vm5, 1.0, %v4154_v1  ;;  %vm324_vm6 = vcmp.eq.s32.totalorder %v4315_v9, %v4797_v33  ;;  %vm534_vm7 = vcmp.eq.s32.totalorder %v4315_v9, %v4813_v46  ;;  %vm319_vm9 = vcmp.eq.s32.totalorder %v4318_v10, %v4767_v16  ;;  %1303 = vmatmul.mubr.f32.gmra.mxu0 %v231_v19 }
  0xba   : > { %1450 = vmatprep.subr.mxu0 %v725_v26  ;;  %1563 = vmatprep.subr.mxu1 %v727_v27  ;;  %v724_v32 = vsub.f32 %v3478_v28, %v3543_v29  ;;  %v3480_v34 = vsel %vm324_vm6, 1.0, %v4154_v1  ;;  %v3545_v35 = vsel %vm534_vm7, 1.0, %v4154_v1  ;;  %v3475_v36 = vsel %vm319_vm9, 1.0, %v4154_v1  ;;  %v234_v27 = vld [vmem:[#allocation6 + $0x30] sm:$0xff] }
  0xbb   : > { %v726_v37 = vsub.f32 %v3480_v34, %v3545_v35  ;;  %vm529_vm10 = vcmp.eq.s32.totalorder %v4318_v10, %v4772_v22  ;;  %vm321_vm11 = vcmp.eq.s32.totalorder %v4318_v10, %v4777_v23  ;;  %vm531_vm12 = vcmp.eq.s32.totalorder %v4318_v10, %v4780_v24  ;;  %1416 = vmatmul.mubr.f32.gmra.mxu1 %v231_v19 }
  0xbc   : > { %1451 = vmatpush1.msra.mxu0 %v724_v32  ;;  %v3540_v43 = vsel %vm529_vm10, 1.0, %v4154_v1  ;;  %v3477_v44 = vsel %vm321_vm11, 1.0, %v4154_v1  ;;  %v3542_v45 = vsel %vm531_vm12, 1.0, %v4154_v1  ;;  %vm318_vm8 = vcmp.eq.s32.totalorder %v4318_v10, %v4786_v30  ;;  %1308 = vmatprep.mubr.f32.mxu0 %v4154_v1 }
  0xbd   : > { %1564 = vmatpush1.msra.mxu1 %v726_v37  ;;  %v721_v47 = vsub.f32 %v3475_v36, %v3540_v43  ;;  %v723_v48 = vsub.f32 %v3477_v44, %v3542_v45  ;;  %v3474_v49 = vsel %vm318_vm8, 1.0, %v4154_v1  ;;  %vm528_vm13 = vcmp.eq.s32.totalorder %v4318_v10, %v4789_v31  ;;  %1421 = vmatprep.mubr.f32.mxu1 %v4154_v1 }
  0xbe   : > { %v3539_v50 = vsel %vm528_vm13, 1.0, %v4154_v1  ;;  %vm320_vm14 = vcmp.eq.s32.totalorder %v4318_v10, %v4797_v33  ;;  %vm530_vm15 = vcmp.eq.s32.totalorder %v4318_v10, %v4813_v46  ;;  %vm315_vm0 = vcmp.eq.s32.totalorder %v4321_v11, %v4767_v16  ;;  %1309 = vmatmul.mubr.f32.gmra.mxu0 %v232_v39 }
  0xbf   : > { %1452 = vmatprep.subr.mxu0 %v721_v47  ;;  %1565 = vmatprep.subr.mxu1 %v723_v48  ;;  %v720_v51 = vsub.f32 %v3474_v49, %v3539_v50  ;;  %v3476_v52 = vsel %vm320_vm14, 1.0, %v4154_v1  ;;  %v3541_v54 = vsel %vm530_vm15, 1.0, %v4154_v1  ;;  %v3471_v57 = vsel %vm315_vm0, 1.0, %v4154_v1  ;;  %v235_v48 = vld [vmem:[#allocation6 + $0x38] sm:$0xff] }
  0xc0   : > { %v722_v58 = vsub.f32 %v3476_v52, %v3541_v54  ;;  %vm525_vm1 = vcmp.eq.s32.totalorder %v4321_v11, %v4772_v22  ;;  %vm317_vm2 = vcmp.eq.s32.totalorder %v4321_v11, %v4777_v23  ;;  %vm527_vm3 = vcmp.eq.s32.totalorder %v4321_v11, %v4780_v24  ;;  %1422 = vmatmul.mubr.f32.gmra.mxu1 %v232_v39 }
  0xc1   : > { %1453 = vmatpush1.msra.mxu0 %v720_v51  ;;  %v3536_v60 = vsel %vm525_vm1, 1.0, %v4154_v1  ;;  %v3473_v61 = vsel %vm317_vm2, 1.0, %v4154_v1  ;;  %v3538_v62 = vsel %vm527_vm3, 1.0, %v4154_v1  ;;  %vm314_vm4 = vcmp.eq.s32.totalorder %v4321_v11, %v4786_v30  ;;  %1314 = vmatprep.mubr.f32.mxu0 %v4154_v1 }
  0xc2   : > { %1566 = vmatpush1.msra.mxu1 %v722_v58  ;;  %v717_v17 = vsub.f32 %v3471_v57, %v3536_v60  ;;  %v719_v63 = vsub.f32 %v3473_v61, %v3538_v62  ;;  %v3470_v18 = vsel %vm314_vm4, 1.0, %v4154_v1  ;;  %vm524_vm5 = vcmp.eq.s32.totalorder %v4321_v11, %v4789_v31  ;;  %1427 = vmatprep.mubr.f32.mxu1 %v4154_v1 }
  0xc3   : > { %v3535_v15 = vsel %vm524_vm5, 1.0, %v4154_v1  ;;  %vm316_vm6 = vcmp.eq.s32.totalorder %v4321_v11, %v4797_v33  ;;  %vm526_vm7 = vcmp.eq.s32.totalorder %v4321_v11, %v4813_v46  ;;  %vm311_vm9 = vcmp.eq.s32.totalorder %v4324_v12, %v4767_v16  ;;  %1315 = vmatmul.mubr.f32.gmra.mxu0 %v233_v59 }
  0xc4   : > { %1454 = vmatprep.subr.mxu0 %v717_v17  ;;  %1567 = vmatprep.subr.mxu1 %v719_v63  ;;  %v716_v19 = vsub.f32 %v3470_v18, %v3535_v15  ;;  %v3472_v20 = vsel %vm316_vm6, 1.0, %v4154_v1  ;;  %v3537_v21 = vsel %vm526_vm7, 1.0, %v4154_v1  ;;  %v3467_v25 = vsel %vm311_vm9, 1.0, %v4154_v1 }
  0xc5   : > { %v718_v26 = vsub.f32 %v3472_v20, %v3537_v21  ;;  %vm521_vm10 = vcmp.eq.s32.totalorder %v4324_v12, %v4772_v22  ;;  %vm313_vm11 = vcmp.eq.s32.totalorder %v4324_v12, %v4777_v23  ;;  %vm523_vm12 = vcmp.eq.s32.totalorder %v4324_v12, %v4780_v24  ;;  %1428 = vmatmul.mubr.f32.gmra.mxu1 %v233_v59 }
  0xc6   : > { %1455 = vmatpush1.msra.mxu0 %v716_v19  ;;  %v3532_v28 = vsel %vm521_vm10, 1.0, %v4154_v1  ;;  %v3469_v29 = vsel %vm313_vm11, 1.0, %v4154_v1  ;;  %v3534_v32 = vsel %vm523_vm12, 1.0, %v4154_v1  ;;  %vm310_vm8 = vcmp.eq.s32.totalorder %v4324_v12, %v4786_v30  ;;  %1320 = vmatprep.mubr.f32.mxu0 %v4154_v1 }
  0xc7   : > { %1568 = vmatpush1.msra.mxu1 %v718_v26  ;;  %v713_v34 = vsub.f32 %v3467_v25, %v3532_v28  ;;  %v715_v35 = vsub.f32 %v3469_v29, %v3534_v32  ;;  %v3466_v36 = vsel %vm310_vm8, 1.0, %v4154_v1  ;;  %vm520_vm13 = vcmp.eq.s32.totalorder %v4324_v12, %v4789_v31  ;;  %1433 = vmatprep.mubr.f32.mxu1 %v4154_v1 }
  0xc8   : > { %v3531_v37 = vsel %vm520_vm13, 1.0, %v4154_v1  ;;  %vm312_vm14 = vcmp.eq.s32.totalorder %v4324_v12, %v4797_v33  ;;  %vm522_vm15 = vcmp.eq.s32.totalorder %v4324_v12, %v4813_v46  ;;  %vm307_vm0 = vcmp.eq.s32.totalorder %v4327_v13, %v4767_v16  ;;  %1321 = vmatmul.mubr.f32.gmra.mxu0 %v234_v27 }
  0xc9   : > { %1456 = vmatprep.subr.mxu0 %v713_v34  ;;  %1569 = vmatprep.subr.mxu1 %v715_v35  ;;  %v712_v39 = vsub.f32 %v3466_v36, %v3531_v37  ;;  %v3468_v43 = vsel %vm312_vm14, 1.0, %v4154_v1  ;;  %v3533_v44 = vsel %vm522_vm15, 1.0, %v4154_v1  ;;  %v3463_v45 = vsel %vm307_vm0, 1.0, %v4154_v1 }
  0xca   : > { %v714_v47 = vsub.f32 %v3468_v43, %v3533_v44  ;;  %vm517_vm1 = vcmp.eq.s32.totalorder %v4327_v13, %v4772_v22  ;;  %vm309_vm2 = vcmp.eq.s32.totalorder %v4327_v13, %v4777_v23  ;;  %vm519_vm3 = vcmp.eq.s32.totalorder %v4327_v13, %v4780_v24  ;;  %1434 = vmatmul.mubr.f32.gmra.mxu1 %v234_v27 }
  0xcb   : > { %1457 = vmatpush1.msra.mxu0 %v712_v39  ;;  %v3528_v49 = vsel %vm517_vm1, 1.0, %v4154_v1  ;;  %v3465_v50 = vsel %vm309_vm2, 1.0, %v4154_v1  ;;  %v3530_v51 = vsel %vm519_vm3, 1.0, %v4154_v1  ;;  %vm306_vm4 = vcmp.eq.s32.totalorder %v4327_v13, %v4786_v30  ;;  %1326 = vmatprep.mubr.f32.mxu0 %v4154_v1 }
  0xcc   : > { %1570 = vmatpush1.msra.mxu1 %v714_v47  ;;  %v709_v52 = vsub.f32 %v3463_v45, %v3528_v49  ;;  %v711_v54 = vsub.f32 %v3465_v50, %v3530_v51  ;;  %v3462_v57 = vsel %vm306_vm4, 1.0, %v4154_v1  ;;  %vm516_vm5 = vcmp.eq.s32.totalorder %v4327_v13, %v4789_v31  ;;  %1439 = vmatprep.mubr.f32.mxu1 %v4154_v1 }
  0xcd   : > { %v3527_v58 = vsel %vm516_vm5, 1.0, %v4154_v1  ;;  %vm308_vm6 = vcmp.eq.s32.totalorder %v4327_v13, %v4797_v33  ;;  %vm518_vm7 = vcmp.eq.s32.totalorder %v4327_v13, %v4813_v46  ;;  %vm303_vm9 = vcmp.eq.s32.totalorder %v4330_v14, %v4767_v16  ;;  %1327 = vmatmul.mubr.f32.gmra.mxu0 %v235_v48 }
  0xce   : > { %1458 = vmatprep.subr.mxu0 %v709_v52  ;;  %1571 = vmatprep.subr.mxu1 %v711_v54  ;;  %v708_v59 = vsub.f32 %v3462_v57, %v3527_v58  ;;  %v3464_v60 = vsel %vm308_vm6, 1.0, %v4154_v1  ;;  %v3529_v61 = vsel %vm518_vm7, 1.0, %v4154_v1  ;;  %v3459_v62 = vsel %vm303_vm9, 1.0, %v4154_v1 }
  0xcf   : > { %v710_v17 = vsub.f32 %v3464_v60, %v3529_v61  ;;  %vm513_vm10 = vcmp.eq.s32.totalorder %v4330_v14, %v4772_v22  ;;  %vm305_vm11 = vcmp.eq.s32.totalorder %v4330_v14, %v4777_v23  ;;  %vm515_vm12 = vcmp.eq.s32.totalorder %v4330_v14, %v4780_v24  ;;  %1440 = vmatmul.mubr.f32.gmra.mxu1 %v235_v48 }
  0xd0   : > { %1459 = vmatpush1.msra.mxu0 %v708_v59  ;;  %v3524_v63 = vsel %vm513_vm10, 1.0, %v4154_v1  ;;  %v3461_v18 = vsel %vm305_vm11, 1.0, %v4154_v1  ;;  %v3526_v15 = vsel %vm515_vm12, 1.0, %v4154_v1  ;;  %vm302_vm8 = vcmp.eq.s32.totalorder %v4330_v14, %v4786_v30  ;;  %1510 = vmatprep.mubr.f32.mxu0 %v4154_v1 }
  0xd1   : > { %1572 = vmatpush1.msra.mxu1 %v710_v17  ;;  %v705_v19 = vsub.f32 %v3459_v62, %v3524_v63  ;;  %v707_v20 = vsub.f32 %v3461_v18, %v3526_v15  ;;  %v3458_v21 = vsel %vm302_vm8, 1.0, %v4154_v1  ;;  %vm512_vm13 = vcmp.eq.s32.totalorder %v4330_v14, %v4789_v31  ;;  %1623 = vmatprep.mubr.f32.mxu1 %v4154_v1 }
  0xd2   : > { %v3523_v25 = vsel %vm512_vm13, 1.0, %v4154_v1  ;;  %vm304_vm14 = vcmp.eq.s32.totalorder %v4330_v14, %v4797_v33  ;;  %vm514_vm15 = vcmp.eq.s32.totalorder %v4330_v14, %v4813_v46  ;;  %vm299_vm0 = vcmp.eq.s32.totalorder %v4551_v38, %v4767_v16 }
  0xd3   : > { %1460 = vmatprep.subr.mxu0 %v705_v19  ;;  %1573 = vmatprep.subr.mxu1 %v707_v20  ;;  %v704_v26 = vsub.f32 %v3458_v21, %v3523_v25  ;;  %v3460_v27 = vsel %vm304_vm14, 1.0, %v4154_v1  ;;  %v3525_v28 = vsel %vm514_vm15, 1.0, %v4154_v1  ;;  %v3455_v29 = vsel %vm299_vm0, 1.0, %v4154_v1 }
  0xd4   : > { %v706_v32 = vsub.f32 %v3460_v27, %v3525_v28  ;;  %vm509_vm1 = vcmp.eq.s32.totalorder %v4551_v38, %v4772_v22  ;;  %vm301_vm2 = vcmp.eq.s32.totalorder %v4551_v38, %v4777_v23  ;;  %vm511_vm3 = vcmp.eq.s32.totalorder %v4551_v38, %v4780_v24 }
  0xd5   : > { %1461 = vmatpush1.msra.mxu0 %v704_v26  ;;  %v3520_v34 = vsel %vm509_vm1, 1.0, %v4154_v1  ;;  %v3457_v35 = vsel %vm301_vm2, 1.0, %v4154_v1  ;;  %v3522_v36 = vsel %vm511_vm3, 1.0, %v4154_v1  ;;  %vm298_vm4 = vcmp.eq.s32.totalorder %v4551_v38, %v4786_v30 }
  0xd6   : > { %1574 = vmatpush1.msra.mxu1 %v706_v32  ;;  %v701_v37 = vsub.f32 %v3455_v29, %v3520_v34  ;;  %v703_v39 = vsub.f32 %v3457_v35, %v3522_v36  ;;  %v3454_v43 = vsel %vm298_vm4, 1.0, %v4154_v1  ;;  %vm508_vm5 = vcmp.eq.s32.totalorder %v4551_v38, %v4789_v31 }
  0xd7   : > { %v3519_v44 = vsel %vm508_vm5, 1.0, %v4154_v1  ;;  %vm300_vm6 = vcmp.eq.s32.totalorder %v4551_v38, %v4797_v33  ;;  %vm510_vm7 = vcmp.eq.s32.totalorder %v4551_v38, %v4813_v46  ;;  %vm295_vm9 = vcmp.eq.s32.totalorder %v4554_v40, %v4767_v16 }
  0xd8   : > { %1462 = vmatprep.subr.mxu0 %v701_v37  ;;  %1575 = vmatprep.subr.mxu1 %v703_v39  ;;  %v700_v45 = vsub.f32 %v3454_v43, %v3519_v44  ;;  %v3456_v47 = vsel %vm300_vm6, 1.0, %v4154_v1  ;;  %v3521_v48 = vsel %vm510_vm7, 1.0, %v4154_v1  ;;  %v3451_v49 = vsel %vm295_vm9, 1.0, %v4154_v1 }
  0xd9   : > { %v702_v50 = vsub.f32 %v3456_v47, %v3521_v48  ;;  %vm505_vm10 = vcmp.eq.s32.totalorder %v4554_v40, %v4772_v22  ;;  %vm297_vm11 = vcmp.eq.s32.totalorder %v4554_v40, %v4777_v23  ;;  %vm507_vm12 = vcmp.eq.s32.totalorder %v4554_v40, %v4780_v24 }
  0xda   : > { %1463 = vmatpush1.msra.mxu0 %v700_v45  ;;  %v3516_v51 = vsel %vm505_vm10, 1.0, %v4154_v1  ;;  %v3453_v52 = vsel %vm297_vm11, 1.0, %v4154_v1  ;;  %v3518_v54 = vsel %vm507_vm12, 1.0, %v4154_v1  ;;  %vm294_vm8 = vcmp.eq.s32.totalorder %v4554_v40, %v4786_v30 }
  0xdb   : > { %1576 = vmatpush1.msra.mxu1 %v702_v50  ;;  %v697_v57 = vsub.f32 %v3451_v49, %v3516_v51  ;;  %v699_v58 = vsub.f32 %v3453_v52, %v3518_v54  ;;  %v3450_v59 = vsel %vm294_vm8, 1.0, %v4154_v1  ;;  %vm504_vm13 = vcmp.eq.s32.totalorder %v4554_v40, %v4789_v31 }
  0xdc   : > { %v3515_v60 = vsel %vm504_vm13, 1.0, %v4154_v1  ;;  %vm296_vm14 = vcmp.eq.s32.totalorder %v4554_v40, %v4797_v33  ;;  %vm506_vm15 = vcmp.eq.s32.totalorder %v4554_v40, %v4813_v46  ;;  %vm291_vm0 = vcmp.eq.s32.totalorder %v4557_v41, %v4767_v16 }
  0xdd   : > { %1464 = vmatprep.subr.mxu0 %v697_v57  ;;  %1577 = vmatprep.subr.mxu1 %v699_v58  ;;  %v696_v61 = vsub.f32 %v3450_v59, %v3515_v60  ;;  %v3452_v62 = vsel %vm296_vm14, 1.0, %v4154_v1  ;;  %v3517_v17 = vsel %vm506_vm15, 1.0, %v4154_v1  ;;  %v3447_v63 = vsel %vm291_vm0, 1.0, %v4154_v1 }
  0xde   : > { %v698_v18 = vsub.f32 %v3452_v62, %v3517_v17  ;;  %vm501_vm1 = vcmp.eq.s32.totalorder %v4557_v41, %v4772_v22  ;;  %vm293_vm2 = vcmp.eq.s32.totalorder %v4557_v41, %v4777_v23  ;;  %vm503_vm3 = vcmp.eq.s32.totalorder %v4557_v41, %v4780_v24 }
  0xdf   : > { %1465 = vmatpush1.msra.mxu0 %v696_v61  ;;  %v3512_v15 = vsel %vm501_vm1, 1.0, %v4154_v1  ;;  %v3449_v19 = vsel %vm293_vm2, 1.0, %v4154_v1  ;;  %v3514_v20 = vsel %vm503_vm3, 1.0, %v4154_v1  ;;  %vm290_vm4 = vcmp.eq.s32.totalorder %v4557_v41, %v4786_v30 }
  0xe0   : > { %1578 = vmatpush1.msra.mxu1 %v698_v18  ;;  %v693_v21 = vsub.f32 %v3447_v63, %v3512_v15  ;;  %v695_v25 = vsub.f32 %v3449_v19, %v3514_v20  ;;  %v3446_v26 = vsel %vm290_vm4, 1.0, %v4154_v1  ;;  %vm500_vm5 = vcmp.eq.s32.totalorder %v4557_v41, %v4789_v31 }
  0xe1   : > { %v3511_v27 = vsel %vm500_vm5, 1.0, %v4154_v1  ;;  %vm292_vm6 = vcmp.eq.s32.totalorder %v4557_v41, %v4797_v33  ;;  %vm502_vm7 = vcmp.eq.s32.totalorder %v4557_v41, %v4813_v46  ;;  %vm287_vm9 = vcmp.eq.s32.totalorder %v4560_v42, %v4767_v16 }
  0xe2   : > { %1466 = vmatprep.subr.mxu0 %v693_v21  ;;  %1579 = vmatprep.subr.mxu1 %v695_v25  ;;  %v692_v28 = vsub.f32 %v3446_v26, %v3511_v27  ;;  %v3448_v29 = vsel %vm292_vm6, 1.0, %v4154_v1  ;;  %v3513_v32 = vsel %vm502_vm7, 1.0, %v4154_v1  ;;  %v3443_v34 = vsel %vm287_vm9, 1.0, %v4154_v1 }
  0xe3   : > { %v694_v35 = vsub.f32 %v3448_v29, %v3513_v32  ;;  %vm497_vm10 = vcmp.eq.s32.totalorder %v4560_v42, %v4772_v22  ;;  %vm289_vm11 = vcmp.eq.s32.totalorder %v4560_v42, %v4777_v23  ;;  %vm499_vm12 = vcmp.eq.s32.totalorder %v4560_v42, %v4780_v24 }
  0xe4   : > { %1467 = vmatpush1.msra.mxu0 %v692_v28  ;;  %v3508_v36 = vsel %vm497_vm10, 1.0, %v4154_v1  ;;  %v3445_v37 = vsel %vm289_vm11, 1.0, %v4154_v1  ;;  %v3510_v39 = vsel %vm499_vm12, 1.0, %v4154_v1  ;;  %vm286_vm8 = vcmp.eq.s32.totalorder %v4560_v42, %v4786_v30 }
  0xe5   : > { %1580 = vmatpush1.msra.mxu1 %v694_v35  ;;  %v689_v43 = vsub.f32 %v3443_v34, %v3508_v36  ;;  %v691_v44 = vsub.f32 %v3445_v37, %v3510_v39  ;;  %v3442_v45 = vsel %vm286_vm8, 1.0, %v4154_v1  ;;  %vm496_vm13 = vcmp.eq.s32.totalorder %v4560_v42, %v4789_v31 }
  0xe6   : > { %v3507_v47 = vsel %vm496_vm13, 1.0, %v4154_v1  ;;  %vm288_vm14 = vcmp.eq.s32.totalorder %v4560_v42, %v4797_v33  ;;  %vm498_vm15 = vcmp.eq.s32.totalorder %v4560_v42, %v4813_v46  ;;  %vm283_vm0 = vcmp.eq.s32.totalorder %v4659_v53, %v4767_v16 }
  0xe7   : > { %1468 = vmatprep.subr.mxu0 %v689_v43  ;;  %1581 = vmatprep.subr.mxu1 %v691_v44  ;;  %v688_v48 = vsub.f32 %v3442_v45, %v3507_v47  ;;  %v3444_v49 = vsel %vm288_vm14, 1.0, %v4154_v1  ;;  %v3509_v50 = vsel %vm498_vm15, 1.0, %v4154_v1  ;;  %v3439_v51 = vsel %vm283_vm0, 1.0, %v4154_v1 }
  0xe8   : > { %v690_v52 = vsub.f32 %v3444_v49, %v3509_v50  ;;  %vm493_vm1 = vcmp.eq.s32.totalorder %v4659_v53, %v4772_v22  ;;  %vm285_vm2 = vcmp.eq.s32.totalorder %v4659_v53, %v4777_v23  ;;  %vm495_vm3 = vcmp.eq.s32.totalorder %v4659_v53, %v4780_v24 }
  0xe9   : > { %1469 = vmatpush1.msra.mxu0 %v688_v48  ;;  %v3504_v54 = vsel %vm493_vm1, 1.0, %v4154_v1  ;;  %v3441_v57 = vsel %vm285_vm2, 1.0, %v4154_v1  ;;  %v3506_v58 = vsel %vm495_vm3, 1.0, %v4154_v1  ;;  %vm282_vm4 = vcmp.eq.s32.totalorder %v4659_v53, %v4786_v30 }
  0xea   : > { %1582 = vmatpush1.msra.mxu1 %v690_v52  ;;  %v685_v59 = vsub.f32 %v3439_v51, %v3504_v54  ;;  %v687_v60 = vsub.f32 %v3441_v57, %v3506_v58  ;;  %v3438_v61 = vsel %vm282_vm4, 1.0, %v4154_v1  ;;  %vm492_vm5 = vcmp.eq.s32.totalorder %v4659_v53, %v4789_v31 }
  0xeb   : > { %v3503_v62 = vsel %vm492_vm5, 1.0, %v4154_v1  ;;  %vm284_vm6 = vcmp.eq.s32.totalorder %v4659_v53, %v4797_v33  ;;  %vm494_vm7 = vcmp.eq.s32.totalorder %v4659_v53, %v4813_v46  ;;  %vm279_vm9 = vcmp.eq.s32.totalorder %v4662_v55, %v4767_v16 }
  0xec   : > { %1470 = vmatprep.subr.mxu0 %v685_v59  ;;  %1583 = vmatprep.subr.mxu1 %v687_v60  ;;  %v684_v17 = vsub.f32 %v3438_v61, %v3503_v62  ;;  %v3440_v63 = vsel %vm284_vm6, 1.0, %v4154_v1  ;;  %v3505_v18 = vsel %vm494_vm7, 1.0, %v4154_v1  ;;  %v3435_v15 = vsel %vm279_vm9, 1.0, %v4154_v1  ;;  %v3880_v61 = vld [vmem:[%s4281_s23 + $0x7] ss:$8 sm:$0xf] }
  0xed   : > { %v686_v19 = vsub.f32 %v3440_v63, %v3505_v18  ;;  %vm489_vm10 = vcmp.eq.s32.totalorder %v4662_v55, %v4772_v22  ;;  %vm281_vm11 = vcmp.eq.s32.totalorder %v4662_v55, %v4777_v23  ;;  %vm491_vm12 = vcmp.eq.s32.totalorder %v4662_v55, %v4780_v24 }
  0xee   : > { %1471 = vmatpush1.msra.mxu0 %v684_v17  ;;  %v3500_v20 = vsel %vm489_vm10, 1.0, %v4154_v1  ;;  %v3437_v21 = vsel %vm281_vm11, 1.0, %v4154_v1  ;;  %v3502_v25 = vsel %vm491_vm12, 1.0, %v4154_v1  ;;  %vm278_vm8 = vcmp.eq.s32.totalorder %v4662_v55, %v4786_v30 }
  0xef   : > { %1584 = vmatpush1.msra.mxu1 %v686_v19  ;;  %v681_v26 = vsub.f32 %v3435_v15, %v3500_v20  ;;  %v683_v27 = vsub.f32 %v3437_v21, %v3502_v25  ;;  %v3434_v28 = vsel %vm278_vm8, 1.0, %v4154_v1  ;;  %vm488_vm13 = vcmp.eq.s32.totalorder %v4662_v55, %v4789_v31  ;;  %v220_v15 = vld [vmem:[#allocation4] sm:$0xff] }
  0xf0   : > { %v3499_v29 = vsel %vm488_vm13, 1.0, %v4154_v1  ;;  %vm280_vm14 = vcmp.eq.s32.totalorder %v4662_v55, %v4797_v33  ;;  %vm490_vm15 = vcmp.eq.s32.totalorder %v4662_v55, %v4813_v46  ;;  %vm275_vm0 = vcmp.eq.s32.totalorder %v4665_v56, %v4767_v16 }
  0xf1   : > { %1472 = vmatprep.subr.mxu0 %v681_v26  ;;  %1585 = vmatprep.subr.mxu1 %v683_v27  ;;  %v680_v32 = vsub.f32 %v3434_v28, %v3499_v29  ;;  %v3436_v34 = vsel %vm280_vm14, 1.0, %v4154_v1  ;;  %v3501_v35 = vsel %vm490_vm15, 1.0, %v4154_v1  ;;  %v3431_v36 = vsel %vm275_vm0, 1.0, %v4154_v1 }
  0xf2   : > { %v682_v37 = vsub.f32 %v3436_v34, %v3501_v35  ;;  %vm485_vm1 = vcmp.eq.s32.totalorder %v4665_v56, %v4772_v22  ;;  %vm277_vm2 = vcmp.eq.s32.totalorder %v4665_v56, %v4777_v23  ;;  %vm487_vm3 = vcmp.eq.s32.totalorder %v4665_v56, %v4780_v24  ;;  %v221_v34 = vld [vmem:[#allocation4 + $0x8] sm:$0xff] }
  0xf3   : > { %1473 = vmatpush1.msra.mxu0 %v680_v32  ;;  %v3496_v39 = vsel %vm485_vm1, 1.0, %v4154_v1  ;;  %v3433_v43 = vsel %vm277_vm2, 1.0, %v4154_v1  ;;  %v3498_v44 = vsel %vm487_vm3, 1.0, %v4154_v1  ;;  %vm274_vm4 = vcmp.eq.s32.totalorder %v4665_v56, %v4786_v30 }
  0xf4   : > { %1586 = vmatpush1.msra.mxu1 %v682_v37  ;;  %v677_v45 = vsub.f32 %v3431_v36, %v3496_v39  ;;  %v679_v47 = vsub.f32 %v3433_v43, %v3498_v44  ;;  %v3430_v48 = vsel %vm274_vm4, 1.0, %v4154_v1  ;;  %vm484_vm5 = vcmp.eq.s32.totalorder %v4665_v56, %v4789_v31 }
  0xf5   : > { %v3495_v49 = vsel %vm484_vm5, 1.0, %v4154_v1  ;;  %vm276_vm6 = vcmp.eq.s32.totalorder %v4665_v56, %v4797_v33  ;;  %vm486_vm7 = vcmp.eq.s32.totalorder %v4665_v56, %v4813_v46  ;;  %vm271_vm9 = vcmp.eq.s32.totalorder %v4294_v2, %v4767_v16  ;;  %v3815_v16 = vld [vmem:[%s4281_s23 + $0x5] ss:$8 sm:$0xf] }
  0xf6   : > { %1474 = vmatprep.subr.mxu0 %v677_v45  ;;  %1587 = vmatprep.subr.mxu1 %v679_v47  ;;  %v676_v50 = vsub.f32 %v3430_v48, %v3495_v49  ;;  %v3432_v51 = vsel %vm276_vm6, 1.0, %v4154_v1  ;;  %v3497_v52 = vsel %vm486_vm7, 1.0, %v4154_v1  ;;  %v3427_v54 = vsel %vm271_vm9, 1.0, %v4154_v1  ;;  %v222_v49 = vld [vmem:[#allocation4 + $0x10] sm:$0xff] }
  0xf7   : > { %v678_v57 = vsub.f32 %v3432_v51, %v3497_v52  ;;  %vm481_vm10 = vcmp.eq.s32.totalorder %v4294_v2, %v4772_v22  ;;  %vm273_vm11 = vcmp.eq.s32.totalorder %v4294_v2, %v4777_v23  ;;  %vm483_vm12 = vcmp.eq.s32.totalorder %v4294_v2, %v4780_v24 }
  0xf8   : > { %1475 = vmatpush1.msra.mxu0 %v676_v50  ;;  %v3492_v58 = vsel %vm481_vm10, 1.0, %v4154_v1  ;;  %v3429_v59 = vsel %vm273_vm11, 1.0, %v4154_v1  ;;  %v3494_v60 = vsel %vm483_vm12, 1.0, %v4154_v1  ;;  %vm270_vm8 = vcmp.eq.s32.totalorder %v4294_v2, %v4786_v30 }
  0xf9   : > { %1588 = vmatpush1.msra.mxu1 %v678_v57  ;;  %v673_v22 = vsub.f32 %v3427_v54, %v3492_v58  ;;  %v675_v62 = vsub.f32 %v3429_v59, %v3494_v60  ;;  %v3426_v23 = vsel %vm270_vm8, 1.0, %v4154_v1  ;;  %vm480_vm13 = vcmp.eq.s32.totalorder %v4294_v2, %v4789_v31 }
  0xfa   : > { %v3491_v24 = vsel %vm480_vm13, 1.0, %v4154_v1  ;;  %vm272_vm14 = vcmp.eq.s32.totalorder %v4294_v2, %v4797_v33  ;;  %vm482_vm15 = vcmp.eq.s32.totalorder %v4294_v2, %v4813_v46  ;;  %v5193_v17 = vrot.slane %v3815_v16, %v4300_v4 }
  0xfb   : > { %1476 = vmatprep.subr.mxu0 %v673_v22  ;;  %1589 = vmatprep.subr.mxu1 %v675_v62  ;;  %v672_v30 = vsub.f32 %v3426_v23, %v3491_v24  ;;  %v3428_v63 = vsel %vm272_vm14, 1.0, %v4154_v1  ;;  %v3493_v18 = vsel %vm482_vm15, 1.0, %v4154_v1  ;;  %v5198_v31 = vrot.slane %v3880_v61, %v4300_v4  ;;  %v223_v23 = vld [vmem:[#allocation4 + $0x18] sm:$0xff] }
  0xfc   : > { %v674_v19 = vsub.f32 %v3428_v63, %v3493_v18  ;;  %vm2353_vm0 = vcmp.eq.s32.totalorder %v4297_v3, %v5193_v17  ;;  %v5203_v33 = vrot.slane %v3815_v16, %v4303_v5  ;;  %v5206_v46 = vrot.slane %v3880_v61, %v4303_v5 }
  0xfd   : > { %1477 = vmatpush1.msra.mxu0 %v672_v30  ;;  %v3877_v20 = vsel %vm2353_vm0, 1.0, %v4154_v1  ;;  %vm2563_vm1 = vcmp.eq.s32.totalorder %v4297_v3, %v5198_v31  ;;  %v5212_v21 = vrot.slane %v3815_v16, %v4306_v6  ;;  %v5215_v25 = vrot.slane %v3880_v61, %v4306_v6 }
  0xfe   : > { %1590 = vmatpush1.msra.mxu1 %v674_v19  ;;  %1511 = vmatmul.mubr.f32.vlgmr.msra.gmra.mxu0 %v220_v15  ;;  %v3942_v26 = vsel %vm2563_vm1, 1.0, %v4154_v1  ;;  %vm2355_vm2 = vcmp.eq.s32.totalorder %v4297_v3, %v5203_v33  ;;  %vm2565_vm3 = vcmp.eq.s32.totalorder %v4297_v3, %v5206_v46  ;;  %v5223_v27 = vrot.slane %v3815_v16, %v4309_v7 }
  0xff   : > { %1624 = vmatmul.mubr.f32.vlgmr.msra.gmra.mxu1 %v220_v15  ;;  %v2755_v28 = vadd.f32 %v3942_v26, %v3877_v20  ;;  %v3879_v29 = vsel %vm2355_vm2, 1.0, %v4154_v1  ;;  %v3944_v32 = vsel %vm2565_vm3, 1.0, %v4154_v1  ;;  %vm2352_vm4 = vcmp.eq.s32.totalorder %v4297_v3, %v5212_v21  ;;  %1516 = vmatprep.mubr.f32.mxu0 %v4154_v1 }
 0x100   : > { %v2757_v35 = vadd.f32 %v3944_v32, %v3879_v29  ;;  %v3876_v36 = vsel %vm2352_vm4, 1.0, %v4154_v1  ;;  %vm2562_vm5 = vcmp.eq.s32.totalorder %v4297_v3, %v5215_v25  ;;  %vm2354_vm6 = vcmp.eq.s32.totalorder %v4297_v3, %v5223_v27  ;;  %1629 = vmatprep.mubr.f32.mxu1 %v4154_v1 }
 0x101   : > { %2758 = vmatprep.subr.mxu0 %v2755_v28  ;;  %v3941_v37 = vsel %vm2562_vm5, 1.0, %v4154_v1  ;;  %v3878_v39 = vsel %vm2354_vm6, 1.0, %v4154_v1  ;;  %v5239_v43 = vrot.slane %v3880_v61, %v4309_v7  ;;  %vm2349_vm7 = vcmp.eq.s32.totalorder %v4312_v8, %v5193_v17 }
 0x102   : > { %2871 = vmatprep.subr.mxu1 %v2757_v35  ;;  %v2754_v44 = vadd.f32 %v3941_v37, %v3876_v36  ;;  %v3873_v45 = vsel %vm2349_vm7, 1.0, %v4154_v1  ;;  %vm2559_vm9 = vcmp.eq.s32.totalorder %v4312_v8, %v5198_v31  ;;  %vm2351_vm10 = vcmp.eq.s32.totalorder %v4312_v8, %v5203_v33  ;;  %1517 = vmatmul.mubr.f32.gmra.mxu0 %v221_v34  ;;  %v224_v35 = vld [vmem:[#allocation4 + $0x20] sm:$0xff] }
 0x103   : > { %vm2564_vm11 = vcmp.eq.s32.totalorder %v4297_v3, %v5239_v43  ;;  %v3938_v47 = vsel %vm2559_vm9, 1.0, %v4154_v1  ;;  %v3875_v48 = vsel %vm2351_vm10, 1.0, %v4154_v1  ;;  %vm2561_vm12 = vcmp.eq.s32.totalorder %v4312_v8, %v5206_v46  ;;  %1630 = vmatmul.mubr.f32.gmra.mxu1 %v221_v34  ;;  %1522 = vmatprep.mubr.f32.mxu0 %v4154_v1 }
 0x104   : > { %2759 = vmatpush1.msra.mxu0 %v2754_v44  ;;  %v3943_v50 = vsel %vm2564_vm11, 1.0, %v4154_v1  ;;  %v2751_v51 = vadd.f32 %v3938_v47, %v3873_v45  ;;  %v3940_v52 = vsel %vm2561_vm12, 1.0, %v4154_v1  ;;  %vm2348_vm8 = vcmp.eq.s32.totalorder %v4312_v8, %v5212_v21  ;;  %1635 = vmatprep.mubr.f32.mxu1 %v4154_v1 }
 0x105   : > { %v2756_v54 = vadd.f32 %v3943_v50, %v3878_v39  ;;  %v2753_v57 = vadd.f32 %v3940_v52, %v3875_v48  ;;  %v3872_v16 = vsel %vm2348_vm8, 1.0, %v4154_v1  ;;  %vm2558_vm13 = vcmp.eq.s32.totalorder %v4312_v8, %v5215_v25 }
 0x106   : > { %2760 = vmatprep.subr.mxu0 %v2751_v51  ;;  %v3937_v58 = vsel %vm2558_vm13, 1.0, %v4154_v1  ;;  %vm2350_vm14 = vcmp.eq.s32.totalorder %v4312_v8, %v5223_v27  ;;  %vm2560_vm15 = vcmp.eq.s32.totalorder %v4312_v8, %v5239_v43  ;;  %vm2345_vm0 = vcmp.eq.s32.totalorder %v4315_v9, %v5193_v17  ;;  %1523 = vmatmul.mubr.f32.gmra.mxu0 %v222_v49 }
 0x107   : > { %2872 = vmatpush1.msra.mxu1 %v2756_v54  ;;  %v2750_v59 = vadd.f32 %v3937_v58, %v3872_v16  ;;  %v3874_v60 = vsel %vm2350_vm14, 1.0, %v4154_v1  ;;  %v3939_v61 = vsel %vm2560_vm15, 1.0, %v4154_v1  ;;  %v3869_v22 = vsel %vm2345_vm0, 1.0, %v4154_v1  ;;  %1528 = vmatprep.mubr.f32.mxu0 %v4154_v1 }
 0x108   : > { %2873 = vmatprep.subr.mxu1 %v2753_v57  ;;  %v2752_v62 = vadd.f32 %v3939_v61, %v3874_v60  ;;  %vm2555_vm1 = vcmp.eq.s32.totalorder %v4315_v9, %v5198_v31  ;;  %vm2347_vm2 = vcmp.eq.s32.totalorder %v4315_v9, %v5203_v33  ;;  %vm2557_vm3 = vcmp.eq.s32.totalorder %v4315_v9, %v5206_v46  ;;  %v225_v57 = vld [vmem:[#allocation4 + $0x28] sm:$0xff] }
 0x109   : > { %2761 = vmatpush1.msra.mxu0 %v2750_v59  ;;  %v3934_v24 = vsel %vm2555_vm1, 1.0, %v4154_v1  ;;  %v3871_v30 = vsel %vm2347_vm2, 1.0, %v4154_v1  ;;  %v3936_v63 = vsel %vm2557_vm3, 1.0, %v4154_v1  ;;  %vm2344_vm4 = vcmp.eq.s32.totalorder %v4315_v9, %v5212_v21  ;;  %1636 = vmatmul.mubr.f32.gmra.mxu1 %v222_v49 }
 0x10a   : > { %2874 = vmatpush1.msra.mxu1 %v2752_v62  ;;  %v2747_v18 = vadd.f32 %v3934_v24, %v3869_v22  ;;  %v2749_v15 = vadd.f32 %v3936_v63, %v3871_v30  ;;  %v3868_v19 = vsel %vm2344_vm4, 1.0, %v4154_v1  ;;  %vm2554_vm5 = vcmp.eq.s32.totalorder %v4315_v9, %v5215_v25  ;;  %1641 = vmatprep.mubr.f32.mxu1 %v4154_v1 }
 0x10b   : > { %v3933_v20 = vsel %vm2554_vm5, 1.0, %v4154_v1  ;;  %vm2346_vm6 = vcmp.eq.s32.totalorder %v4315_v9, %v5223_v27  ;;  %vm2556_vm7 = vcmp.eq.s32.totalorder %v4315_v9, %v5239_v43  ;;  %vm2341_vm9 = vcmp.eq.s32.totalorder %v4318_v10, %v5193_v17  ;;  %1529 = vmatmul.mubr.f32.gmra.mxu0 %v223_v23 }
 0x10c   : > { %2762 = vmatprep.subr.mxu0 %v2747_v18  ;;  %2875 = vmatprep.subr.mxu1 %v2749_v15  ;;  %v2746_v26 = vadd.f32 %v3933_v20, %v3868_v19  ;;  %v3870_v28 = vsel %vm2346_vm6, 1.0, %v4154_v1  ;;  %v3935_v29 = vsel %vm2556_vm7, 1.0, %v4154_v1  ;;  %v3865_v32 = vsel %vm2341_vm9, 1.0, %v4154_v1  ;;  %v226_v15 = vld [vmem:[#allocation4 + $0x30] sm:$0xff] }
 0x10d   : > { %v2748_v34 = vadd.f32 %v3935_v29, %v3870_v28  ;;  %vm2551_vm10 = vcmp.eq.s32.totalorder %v4318_v10, %v5198_v31  ;;  %vm2343_vm11 = vcmp.eq.s32.totalorder %v4318_v10, %v5203_v33  ;;  %vm2553_vm12 = vcmp.eq.s32.totalorder %v4318_v10, %v5206_v46  ;;  %1642 = vmatmul.mubr.f32.gmra.mxu1 %v223_v23 }
 0x10e   : > { %2763 = vmatpush1.msra.mxu0 %v2746_v26  ;;  %v3930_v36 = vsel %vm2551_vm10, 1.0, %v4154_v1  ;;  %v3867_v37 = vsel %vm2343_vm11, 1.0, %v4154_v1  ;;  %v3932_v39 = vsel %vm2553_vm12, 1.0, %v4154_v1  ;;  %vm2340_vm8 = vcmp.eq.s32.totalorder %v4318_v10, %v5212_v21  ;;  %1534 = vmatprep.mubr.f32.mxu0 %v4154_v1 }
 0x10f   : > { %2876 = vmatpush1.msra.mxu1 %v2748_v34  ;;  %v2743_v44 = vadd.f32 %v3930_v36, %v3865_v32  ;;  %v2745_v45 = vadd.f32 %v3932_v39, %v3867_v37  ;;  %v3864_v47 = vsel %vm2340_vm8, 1.0, %v4154_v1  ;;  %vm2550_vm13 = vcmp.eq.s32.totalorder %v4318_v10, %v5215_v25  ;;  %1647 = vmatprep.mubr.f32.mxu1 %v4154_v1 }
 0x110   : > { %v3929_v48 = vsel %vm2550_vm13, 1.0, %v4154_v1  ;;  %vm2342_vm14 = vcmp.eq.s32.totalorder %v4318_v10, %v5223_v27  ;;  %vm2552_vm15 = vcmp.eq.s32.totalorder %v4318_v10, %v5239_v43  ;;  %vm2337_vm0 = vcmp.eq.s32.totalorder %v4321_v11, %v5193_v17  ;;  %1535 = vmatmul.mubr.f32.gmra.mxu0 %v224_v35 }
 0x111   : > { %2764 = vmatprep.subr.mxu0 %v2743_v44  ;;  %2877 = vmatprep.subr.mxu1 %v2745_v45  ;;  %v2742_v49 = vadd.f32 %v3929_v48, %v3864_v47  ;;  %v3866_v50 = vsel %vm2342_vm14, 1.0, %v4154_v1  ;;  %v3931_v51 = vsel %vm2552_vm15, 1.0, %v4154_v1  ;;  %v3861_v52 = vsel %vm2337_vm0, 1.0, %v4154_v1  ;;  %v227_v45 = vld [vmem:[#allocation4 + $0x38] sm:$0xff] }
 0x112   : > { %v2744_v54 = vadd.f32 %v3931_v51, %v3866_v50  ;;  %vm2547_vm1 = vcmp.eq.s32.totalorder %v4321_v11, %v5198_v31  ;;  %vm2339_vm2 = vcmp.eq.s32.totalorder %v4321_v11, %v5203_v33  ;;  %vm2549_vm3 = vcmp.eq.s32.totalorder %v4321_v11, %v5206_v46  ;;  %1648 = vmatmul.mubr.f32.gmra.mxu1 %v224_v35 }
 0x113   : > { %2765 = vmatpush1.msra.mxu0 %v2742_v49  ;;  %v3926_v16 = vsel %vm2547_vm1, 1.0, %v4154_v1  ;;  %v3863_v58 = vsel %vm2339_vm2, 1.0, %v4154_v1  ;;  %v3928_v59 = vsel %vm2549_vm3, 1.0, %v4154_v1  ;;  %vm2336_vm4 = vcmp.eq.s32.totalorder %v4321_v11, %v5212_v21  ;;  %1540 = vmatprep.mubr.f32.mxu0 %v4154_v1 }
 0x114   : > { %2878 = vmatpush1.msra.mxu1 %v2744_v54  ;;  %v2739_v60 = vadd.f32 %v3926_v16, %v3861_v52  ;;  %v2741_v61 = vadd.f32 %v3928_v59, %v3863_v58  ;;  %v3860_v22 = vsel %vm2336_vm4, 1.0, %v4154_v1  ;;  %vm2546_vm5 = vcmp.eq.s32.totalorder %v4321_v11, %v5215_v25  ;;  %1653 = vmatprep.mubr.f32.mxu1 %v4154_v1 }
 0x115   : > { %v3925_v62 = vsel %vm2546_vm5, 1.0, %v4154_v1  ;;  %vm2338_vm6 = vcmp.eq.s32.totalorder %v4321_v11, %v5223_v27  ;;  %vm2548_vm7 = vcmp.eq.s32.totalorder %v4321_v11, %v5239_v43  ;;  %vm2333_vm9 = vcmp.eq.s32.totalorder %v4324_v12, %v5193_v17  ;;  %1541 = vmatmul.mubr.f32.gmra.mxu0 %v225_v57 }
 0x116   : > { %2766 = vmatprep.subr.mxu0 %v2739_v60  ;;  %2879 = vmatprep.subr.mxu1 %v2741_v61  ;;  %v2738_v23 = vadd.f32 %v3925_v62, %v3860_v22  ;;  %v3862_v24 = vsel %vm2338_vm6, 1.0, %v4154_v1  ;;  %v3927_v30 = vsel %vm2548_vm7, 1.0, %v4154_v1  ;;  %v3857_v63 = vsel %vm2333_vm9, 1.0, %v4154_v1 }
 0x117   : > { %v2740_v18 = vadd.f32 %v3927_v30, %v3862_v24  ;;  %vm2543_vm10 = vcmp.eq.s32.totalorder %v4324_v12, %v5198_v31  ;;  %vm2335_vm11 = vcmp.eq.s32.totalorder %v4324_v12, %v5203_v33  ;;  %vm2545_vm12 = vcmp.eq.s32.totalorder %v4324_v12, %v5206_v46  ;;  %1654 = vmatmul.mubr.f32.gmra.mxu1 %v225_v57 }
 0x118   : > { %2767 = vmatpush1.msra.mxu0 %v2738_v23  ;;  %v3922_v19 = vsel %vm2543_vm10, 1.0, %v4154_v1  ;;  %v3859_v20 = vsel %vm2335_vm11, 1.0, %v4154_v1  ;;  %v3924_v26 = vsel %vm2545_vm12, 1.0, %v4154_v1  ;;  %vm2332_vm8 = vcmp.eq.s32.totalorder %v4324_v12, %v5212_v21  ;;  %1546 = vmatprep.mubr.f32.mxu0 %v4154_v1 }
 0x119   : > { %2880 = vmatpush1.msra.mxu1 %v2740_v18  ;;  %v2735_v28 = vadd.f32 %v3922_v19, %v3857_v63  ;;  %v2737_v29 = vadd.f32 %v3924_v26, %v3859_v20  ;;  %v3856_v32 = vsel %vm2332_vm8, 1.0, %v4154_v1  ;;  %vm2542_vm13 = vcmp.eq.s32.totalorder %v4324_v12, %v5215_v25  ;;  %1659 = vmatprep.mubr.f32.mxu1 %v4154_v1 }
 0x11a   : > { %v3921_v34 = vsel %vm2542_vm13, 1.0, %v4154_v1  ;;  %vm2334_vm14 = vcmp.eq.s32.totalorder %v4324_v12, %v5223_v27  ;;  %vm2544_vm15 = vcmp.eq.s32.totalorder %v4324_v12, %v5239_v43  ;;  %vm2329_vm0 = vcmp.eq.s32.totalorder %v4327_v13, %v5193_v17  ;;  %1547 = vmatmul.mubr.f32.gmra.mxu0 %v226_v15 }
 0x11b   : > { %2768 = vmatprep.subr.mxu0 %v2735_v28  ;;  %2881 = vmatprep.subr.mxu1 %v2737_v29  ;;  %v2734_v35 = vadd.f32 %v3921_v34, %v3856_v32  ;;  %v3858_v36 = vsel %vm2334_vm14, 1.0, %v4154_v1  ;;  %v3923_v37 = vsel %vm2544_vm15, 1.0, %v4154_v1  ;;  %v3853_v39 = vsel %vm2329_vm0, 1.0, %v4154_v1 }
 0x11c   : > { %v2736_v44 = vadd.f32 %v3923_v37, %v3858_v36  ;;  %vm2539_vm1 = vcmp.eq.s32.totalorder %v4327_v13, %v5198_v31  ;;  %vm2331_vm2 = vcmp.eq.s32.totalorder %v4327_v13, %v5203_v33  ;;  %vm2541_vm3 = vcmp.eq.s32.totalorder %v4327_v13, %v5206_v46  ;;  %1660 = vmatmul.mubr.f32.gmra.mxu1 %v226_v15 }
 0x11d   : > { %2769 = vmatpush1.msra.mxu0 %v2734_v35  ;;  %v3918_v47 = vsel %vm2539_vm1, 1.0, %v4154_v1  ;;  %v3855_v48 = vsel %vm2331_vm2, 1.0, %v4154_v1  ;;  %v3920_v49 = vsel %vm2541_vm3, 1.0, %v4154_v1  ;;  %vm2328_vm4 = vcmp.eq.s32.totalorder %v4327_v13, %v5212_v21  ;;  %1552 = vmatprep.mubr.f32.mxu0 %v4154_v1 }
 0x11e   : > { %2882 = vmatpush1.msra.mxu1 %v2736_v44  ;;  %v2731_v50 = vadd.f32 %v3918_v47, %v3853_v39  ;;  %v2733_v51 = vadd.f32 %v3920_v49, %v3855_v48  ;;  %v3852_v52 = vsel %vm2328_vm4, 1.0, %v4154_v1  ;;  %vm2538_vm5 = vcmp.eq.s32.totalorder %v4327_v13, %v5215_v25  ;;  %1665 = vmatprep.mubr.f32.mxu1 %v4154_v1 }
 0x11f   : > { %v3917_v54 = vsel %vm2538_vm5, 1.0, %v4154_v1  ;;  %vm2330_vm6 = vcmp.eq.s32.totalorder %v4327_v13, %v5223_v27  ;;  %vm2540_vm7 = vcmp.eq.s32.totalorder %v4327_v13, %v5239_v43  ;;  %vm2325_vm9 = vcmp.eq.s32.totalorder %v4330_v14, %v5193_v17  ;;  %1553 = vmatmul.mubr.f32.gmra.mxu0 %v227_v45 }
 0x120   : > { %2770 = vmatprep.subr.mxu0 %v2731_v50  ;;  %2883 = vmatprep.subr.mxu1 %v2733_v51  ;;  %v2730_v57 = vadd.f32 %v3917_v54, %v3852_v52  ;;  %v3854_v16 = vsel %vm2330_vm6, 1.0, %v4154_v1  ;;  %v3919_v58 = vsel %vm2540_vm7, 1.0, %v4154_v1  ;;  %v3849_v59 = vsel %vm2325_vm9, 1.0, %v4154_v1 }
 0x121   : > { %v2732_v60 = vadd.f32 %v3919_v58, %v3854_v16  ;;  %vm2535_vm10 = vcmp.eq.s32.totalorder %v4330_v14, %v5198_v31  ;;  %vm2327_vm11 = vcmp.eq.s32.totalorder %v4330_v14, %v5203_v33  ;;  %vm2537_vm12 = vcmp.eq.s32.totalorder %v4330_v14, %v5206_v46  ;;  %1666 = vmatmul.mubr.f32.gmra.mxu1 %v227_v45 }
 0x122   : > { %2771 = vmatpush1.msra.mxu0 %v2730_v57  ;;  %v3914_v61 = vsel %vm2535_vm10, 1.0, %v4154_v1  ;;  %v3851_v22 = vsel %vm2327_vm11, 1.0, %v4154_v1  ;;  %v3916_v62 = vsel %vm2537_vm12, 1.0, %v4154_v1  ;;  %vm2324_vm8 = vcmp.eq.s32.totalorder %v4330_v14, %v5212_v21  ;;  %2822 = vmatprep.mubr.f32.mxu0 %v4154_v1 }
 0x123   : > { %2884 = vmatpush1.msra.mxu1 %v2732_v60  ;;  %v2727_v23 = vadd.f32 %v3914_v61, %v3849_v59  ;;  %v2729_v24 = vadd.f32 %v3916_v62, %v3851_v22  ;;  %v3848_v30 = vsel %vm2324_vm8, 1.0, %v4154_v1  ;;  %vm2534_vm13 = vcmp.eq.s32.totalorder %v4330_v14, %v5215_v25  ;;  %2935 = vmatprep.mubr.f32.mxu1 %v4154_v1 }
 0x124   : > { %v3913_v63 = vsel %vm2534_vm13, 1.0, %v4154_v1  ;;  %vm2326_vm14 = vcmp.eq.s32.totalorder %v4330_v14, %v5223_v27  ;;  %vm2536_vm15 = vcmp.eq.s32.totalorder %v4330_v14, %v5239_v43  ;;  %vm2321_vm0 = vcmp.eq.s32.totalorder %v4551_v38, %v5193_v17 }
 0x125   : > { %2772 = vmatprep.subr.mxu0 %v2727_v23  ;;  %2885 = vmatprep.subr.mxu1 %v2729_v24  ;;  %v2726_v18 = vadd.f32 %v3913_v63, %v3848_v30  ;;  %v3850_v15 = vsel %vm2326_vm14, 1.0, %v4154_v1  ;;  %v3915_v19 = vsel %vm2536_vm15, 1.0, %v4154_v1  ;;  %v3845_v20 = vsel %vm2321_vm0, 1.0, %v4154_v1 }
 0x126   : > { %v2728_v26 = vadd.f32 %v3915_v19, %v3850_v15  ;;  %vm2531_vm1 = vcmp.eq.s32.totalorder %v4551_v38, %v5198_v31  ;;  %vm2323_vm2 = vcmp.eq.s32.totalorder %v4551_v38, %v5203_v33  ;;  %vm2533_vm3 = vcmp.eq.s32.totalorder %v4551_v38, %v5206_v46 }
 0x127   : > { %2773 = vmatpush1.msra.mxu0 %v2726_v18  ;;  %v3910_v28 = vsel %vm2531_vm1, 1.0, %v4154_v1  ;;  %v3847_v29 = vsel %vm2323_vm2, 1.0, %v4154_v1  ;;  %v3912_v32 = vsel %vm2533_vm3, 1.0, %v4154_v1  ;;  %vm2320_vm4 = vcmp.eq.s32.totalorder %v4551_v38, %v5212_v21 }
 0x128   : > { %2886 = vmatpush1.msra.mxu1 %v2728_v26  ;;  %v2723_v34 = vadd.f32 %v3910_v28, %v3845_v20  ;;  %v2725_v35 = vadd.f32 %v3912_v32, %v3847_v29  ;;  %v3844_v36 = vsel %vm2320_vm4, 1.0, %v4154_v1  ;;  %vm2530_vm5 = vcmp.eq.s32.totalorder %v4551_v38, %v5215_v25 }
 0x129   : > { %v3909_v37 = vsel %vm2530_vm5, 1.0, %v4154_v1  ;;  %vm2322_vm6 = vcmp.eq.s32.totalorder %v4551_v38, %v5223_v27  ;;  %vm2532_vm7 = vcmp.eq.s32.totalorder %v4551_v38, %v5239_v43  ;;  %vm2317_vm9 = vcmp.eq.s32.totalorder %v4554_v40, %v5193_v17 }
 0x12a   : > { %2774 = vmatprep.subr.mxu0 %v2723_v34  ;;  %2887 = vmatprep.subr.mxu1 %v2725_v35  ;;  %v2722_v39 = vadd.f32 %v3909_v37, %v3844_v36  ;;  %v3846_v44 = vsel %vm2322_vm6, 1.0, %v4154_v1  ;;  %v3911_v45 = vsel %vm2532_vm7, 1.0, %v4154_v1  ;;  %v3841_v47 = vsel %vm2317_vm9, 1.0, %v4154_v1 }
 0x12b   : > { %v2724_v48 = vadd.f32 %v3911_v45, %v3846_v44  ;;  %vm2527_vm10 = vcmp.eq.s32.totalorder %v4554_v40, %v5198_v31  ;;  %vm2319_vm11 = vcmp.eq.s32.totalorder %v4554_v40, %v5203_v33  ;;  %vm2529_vm12 = vcmp.eq.s32.totalorder %v4554_v40, %v5206_v46 }
 0x12c   : > { %2775 = vmatpush1.msra.mxu0 %v2722_v39  ;;  %v3906_v49 = vsel %vm2527_vm10, 1.0, %v4154_v1  ;;  %v3843_v50 = vsel %vm2319_vm11, 1.0, %v4154_v1  ;;  %v3908_v51 = vsel %vm2529_vm12, 1.0, %v4154_v1  ;;  %vm2316_vm8 = vcmp.eq.s32.totalorder %v4554_v40, %v5212_v21 }
 0x12d   : > { %2888 = vmatpush1.msra.mxu1 %v2724_v48  ;;  %v2719_v52 = vadd.f32 %v3906_v49, %v3841_v47  ;;  %v2721_v54 = vadd.f32 %v3908_v51, %v3843_v50  ;;  %v3840_v57 = vsel %vm2316_vm8, 1.0, %v4154_v1  ;;  %vm2526_vm13 = vcmp.eq.s32.totalorder %v4554_v40, %v5215_v25 }
 0x12e   : > { %v3905_v16 = vsel %vm2526_vm13, 1.0, %v4154_v1  ;;  %vm2318_vm14 = vcmp.eq.s32.totalorder %v4554_v40, %v5223_v27  ;;  %vm2528_vm15 = vcmp.eq.s32.totalorder %v4554_v40, %v5239_v43  ;;  %vm2313_vm0 = vcmp.eq.s32.totalorder %v4557_v41, %v5193_v17 }
 0x12f   : > { %2776 = vmatprep.subr.mxu0 %v2719_v52  ;;  %2889 = vmatprep.subr.mxu1 %v2721_v54  ;;  %v2718_v58 = vadd.f32 %v3905_v16, %v3840_v57  ;;  %v3842_v59 = vsel %vm2318_vm14, 1.0, %v4154_v1  ;;  %v3907_v60 = vsel %vm2528_vm15, 1.0, %v4154_v1  ;;  %v3837_v61 = vsel %vm2313_vm0, 1.0, %v4154_v1 }
 0x130   : > { %v2720_v22 = vadd.f32 %v3907_v60, %v3842_v59  ;;  %vm2523_vm1 = vcmp.eq.s32.totalorder %v4557_v41, %v5198_v31  ;;  %vm2315_vm2 = vcmp.eq.s32.totalorder %v4557_v41, %v5203_v33  ;;  %vm2525_vm3 = vcmp.eq.s32.totalorder %v4557_v41, %v5206_v46 }
 0x131   : > { %2777 = vmatpush1.msra.mxu0 %v2718_v58  ;;  %v3902_v62 = vsel %vm2523_vm1, 1.0, %v4154_v1  ;;  %v3839_v23 = vsel %vm2315_vm2, 1.0, %v4154_v1  ;;  %v3904_v24 = vsel %vm2525_vm3, 1.0, %v4154_v1  ;;  %vm2312_vm4 = vcmp.eq.s32.totalorder %v4557_v41, %v5212_v21 }
 0x132   : > { %2890 = vmatpush1.msra.mxu1 %v2720_v22  ;;  %v2715_v30 = vadd.f32 %v3902_v62, %v3837_v61  ;;  %v2717_v63 = vadd.f32 %v3904_v24, %v3839_v23  ;;  %v3836_v18 = vsel %vm2312_vm4, 1.0, %v4154_v1  ;;  %vm2522_vm5 = vcmp.eq.s32.totalorder %v4557_v41, %v5215_v25 }
 0x133   : > { %v3901_v15 = vsel %vm2522_vm5, 1.0, %v4154_v1  ;;  %vm2314_vm6 = vcmp.eq.s32.totalorder %v4557_v41, %v5223_v27  ;;  %vm2524_vm7 = vcmp.eq.s32.totalorder %v4557_v41, %v5239_v43  ;;  %vm2309_vm9 = vcmp.eq.s32.totalorder %v4560_v42, %v5193_v17 }
 0x134   : > { %2778 = vmatprep.subr.mxu0 %v2715_v30  ;;  %2891 = vmatprep.subr.mxu1 %v2717_v63  ;;  %v2714_v19 = vadd.f32 %v3901_v15, %v3836_v18  ;;  %v3838_v20 = vsel %vm2314_vm6, 1.0, %v4154_v1  ;;  %v3903_v26 = vsel %vm2524_vm7, 1.0, %v4154_v1  ;;  %v3833_v28 = vsel %vm2309_vm9, 1.0, %v4154_v1 }
 0x135   : > { %v2716_v29 = vadd.f32 %v3903_v26, %v3838_v20  ;;  %vm2519_vm10 = vcmp.eq.s32.totalorder %v4560_v42, %v5198_v31  ;;  %vm2311_vm11 = vcmp.eq.s32.totalorder %v4560_v42, %v5203_v33  ;;  %vm2521_vm12 = vcmp.eq.s32.totalorder %v4560_v42, %v5206_v46 }
 0x136   : > { %2779 = vmatpush1.msra.mxu0 %v2714_v19  ;;  %v3898_v32 = vsel %vm2519_vm10, 1.0, %v4154_v1  ;;  %v3835_v34 = vsel %vm2311_vm11, 1.0, %v4154_v1  ;;  %v3900_v35 = vsel %vm2521_vm12, 1.0, %v4154_v1  ;;  %vm2308_vm8 = vcmp.eq.s32.totalorder %v4560_v42, %v5212_v21 }
 0x137   : > { %2892 = vmatpush1.msra.mxu1 %v2716_v29  ;;  %v2711_v36 = vadd.f32 %v3898_v32, %v3833_v28  ;;  %v2713_v37 = vadd.f32 %v3900_v35, %v3835_v34  ;;  %v3832_v39 = vsel %vm2308_vm8, 1.0, %v4154_v1  ;;  %vm2518_vm13 = vcmp.eq.s32.totalorder %v4560_v42, %v5215_v25 }
 0x138   : > { %v3897_v44 = vsel %vm2518_vm13, 1.0, %v4154_v1  ;;  %vm2310_vm14 = vcmp.eq.s32.totalorder %v4560_v42, %v5223_v27  ;;  %vm2520_vm15 = vcmp.eq.s32.totalorder %v4560_v42, %v5239_v43  ;;  %vm2305_vm0 = vcmp.eq.s32.totalorder %v4659_v53, %v5193_v17 }
 0x139   : > { %2780 = vmatprep.subr.mxu0 %v2711_v36  ;;  %2893 = vmatprep.subr.mxu1 %v2713_v37  ;;  %v2710_v45 = vadd.f32 %v3897_v44, %v3832_v39  ;;  %v3834_v47 = vsel %vm2310_vm14, 1.0, %v4154_v1  ;;  %v3899_v48 = vsel %vm2520_vm15, 1.0, %v4154_v1  ;;  %v3829_v49 = vsel %vm2305_vm0, 1.0, %v4154_v1 }
 0x13a   : > { %v2712_v50 = vadd.f32 %v3899_v48, %v3834_v47  ;;  %vm2515_vm1 = vcmp.eq.s32.totalorder %v4659_v53, %v5198_v31  ;;  %vm2307_vm2 = vcmp.eq.s32.totalorder %v4659_v53, %v5203_v33  ;;  %vm2517_vm3 = vcmp.eq.s32.totalorder %v4659_v53, %v5206_v46 }
 0x13b   : > { %2781 = vmatpush1.msra.mxu0 %v2710_v45  ;;  %v3894_v51 = vsel %vm2515_vm1, 1.0, %v4154_v1  ;;  %v3831_v52 = vsel %vm2307_vm2, 1.0, %v4154_v1  ;;  %v3896_v54 = vsel %vm2517_vm3, 1.0, %v4154_v1  ;;  %vm2304_vm4 = vcmp.eq.s32.totalorder %v4659_v53, %v5212_v21 }
 0x13c   : > { %2894 = vmatpush1.msra.mxu1 %v2712_v50  ;;  %v2707_v57 = vadd.f32 %v3894_v51, %v3829_v49  ;;  %v2709_v16 = vadd.f32 %v3896_v54, %v3831_v52  ;;  %v3828_v58 = vsel %vm2304_vm4, 1.0, %v4154_v1  ;;  %vm2514_vm5 = vcmp.eq.s32.totalorder %v4659_v53, %v5215_v25 }
 0x13d   : > { %v3893_v59 = vsel %vm2514_vm5, 1.0, %v4154_v1  ;;  %vm2306_vm6 = vcmp.eq.s32.totalorder %v4659_v53, %v5223_v27  ;;  %vm2516_vm7 = vcmp.eq.s32.totalorder %v4659_v53, %v5239_v43  ;;  %vm2301_vm9 = vcmp.eq.s32.totalorder %v4662_v55, %v5193_v17 }
 0x13e   : > { %2782 = vmatprep.subr.mxu0 %v2707_v57  ;;  %2895 = vmatprep.subr.mxu1 %v2709_v16  ;;  %v2706_v60 = vadd.f32 %v3893_v59, %v3828_v58  ;;  %v3830_v61 = vsel %vm2306_vm6, 1.0, %v4154_v1  ;;  %v3895_v22 = vsel %vm2516_vm7, 1.0, %v4154_v1  ;;  %v3825_v62 = vsel %vm2301_vm9, 1.0, %v4154_v1  ;;  %v3750_v58 = vld [vmem:[%s4281_s23 + $0x6] ss:$8 sm:$0xf] }
 0x13f   : > { %v2708_v23 = vadd.f32 %v3895_v22, %v3830_v61  ;;  %vm2511_vm10 = vcmp.eq.s32.totalorder %v4662_v55, %v5198_v31  ;;  %vm2303_vm11 = vcmp.eq.s32.totalorder %v4662_v55, %v5203_v33  ;;  %vm2513_vm12 = vcmp.eq.s32.totalorder %v4662_v55, %v5206_v46 }
 0x140   : > { %2783 = vmatpush1.msra.mxu0 %v2706_v60  ;;  %v3890_v24 = vsel %vm2511_vm10, 1.0, %v4154_v1  ;;  %v3827_v30 = vsel %vm2303_vm11, 1.0, %v4154_v1  ;;  %v3892_v63 = vsel %vm2513_vm12, 1.0, %v4154_v1  ;;  %vm2300_vm8 = vcmp.eq.s32.totalorder %v4662_v55, %v5212_v21 }
 0x141   : > { %2896 = vmatpush1.msra.mxu1 %v2708_v23  ;;  %v2703_v18 = vadd.f32 %v3890_v24, %v3825_v62  ;;  %v2705_v15 = vadd.f32 %v3892_v63, %v3827_v30  ;;  %v3824_v19 = vsel %vm2300_vm8, 1.0, %v4154_v1  ;;  %vm2510_vm13 = vcmp.eq.s32.totalorder %v4662_v55, %v5215_v25  ;;  %v4013_v30 = vld [vmem:[#allocation6] sm:$0xff] }
 0x142   : > { %v3889_v20 = vsel %vm2510_vm13, 1.0, %v4154_v1  ;;  %vm2302_vm14 = vcmp.eq.s32.totalorder %v4662_v55, %v5223_v27  ;;  %vm2512_vm15 = vcmp.eq.s32.totalorder %v4662_v55, %v5239_v43  ;;  %vm2297_vm0 = vcmp.eq.s32.totalorder %v4665_v56, %v5193_v17 }
 0x143   : > { %2784 = vmatprep.subr.mxu0 %v2703_v18  ;;  %2897 = vmatprep.subr.mxu1 %v2705_v15  ;;  %v2702_v26 = vadd.f32 %v3889_v20, %v3824_v19  ;;  %v3826_v28 = vsel %vm2302_vm14, 1.0, %v4154_v1  ;;  %v3891_v29 = vsel %vm2512_vm15, 1.0, %v4154_v1  ;;  %v3821_v32 = vsel %vm2297_vm0, 1.0, %v4154_v1 }
 0x144   : > { %v2704_v34 = vadd.f32 %v3891_v29, %v3826_v28  ;;  %vm2507_vm1 = vcmp.eq.s32.totalorder %v4665_v56, %v5198_v31  ;;  %vm2299_vm2 = vcmp.eq.s32.totalorder %v4665_v56, %v5203_v33  ;;  %vm2509_vm3 = vcmp.eq.s32.totalorder %v4665_v56, %v5206_v46 }
 0x145   : > { %2785 = vmatpush1.msra.mxu0 %v2702_v26  ;;  %v3886_v35 = vsel %vm2507_vm1, 1.0, %v4154_v1  ;;  %v3823_v36 = vsel %vm2299_vm2, 1.0, %v4154_v1  ;;  %v3888_v37 = vsel %vm2509_vm3, 1.0, %v4154_v1  ;;  %vm2296_vm4 = vcmp.eq.s32.totalorder %v4665_v56, %v5212_v21 }
 0x146   : > { %2898 = vmatpush1.msra.mxu1 %v2704_v34  ;;  %v2699_v39 = vadd.f32 %v3886_v35, %v3821_v32  ;;  %v2701_v44 = vadd.f32 %v3888_v37, %v3823_v36  ;;  %v3820_v45 = vsel %vm2296_vm4, 1.0, %v4154_v1  ;;  %vm2506_vm5 = vcmp.eq.s32.totalorder %v4665_v56, %v5215_v25  ;;  %v4014_v35 = vld [vmem:[#allocation6 + $0x8] sm:$0xff] }
 0x147   : > { %v3885_v47 = vsel %vm2506_vm5, 1.0, %v4154_v1  ;;  %vm2298_vm6 = vcmp.eq.s32.totalorder %v4665_v56, %v5223_v27  ;;  %vm2508_vm7 = vcmp.eq.s32.totalorder %v4665_v56, %v5239_v43  ;;  %vm2293_vm9 = vcmp.eq.s32.totalorder %v4294_v2, %v5193_v17  ;;  %v3685_v17 = vld [vmem:[%s4281_s23 + $0x4] ss:$8 sm:$0xf] }
 0x148   : > { %2786 = vmatprep.subr.mxu0 %v2699_v39  ;;  %2899 = vmatprep.subr.mxu1 %v2701_v44  ;;  %v2698_v48 = vadd.f32 %v3885_v47, %v3820_v45  ;;  %v3822_v49 = vsel %vm2298_vm6, 1.0, %v4154_v1  ;;  %v3887_v50 = vsel %vm2508_vm7, 1.0, %v4154_v1  ;;  %v3817_v51 = vsel %vm2293_vm9, 1.0, %v4154_v1 }
 0x149   : > { %v2700_v52 = vadd.f32 %v3887_v50, %v3822_v49  ;;  %vm2503_vm10 = vcmp.eq.s32.totalorder %v4294_v2, %v5198_v31  ;;  %vm2295_vm11 = vcmp.eq.s32.totalorder %v4294_v2, %v5203_v33  ;;  %vm2505_vm12 = vcmp.eq.s32.totalorder %v4294_v2, %v5206_v46  ;;  %v4015_v49 = vld [vmem:[#allocation6 + $0x10] sm:$0xff] }
 0x14a   : > { %2787 = vmatpush1.msra.mxu0 %v2698_v48  ;;  %v3882_v54 = vsel %vm2503_vm10, 1.0, %v4154_v1  ;;  %v3819_v57 = vsel %vm2295_vm11, 1.0, %v4154_v1  ;;  %v3884_v16 = vsel %vm2505_vm12, 1.0, %v4154_v1  ;;  %vm2292_vm8 = vcmp.eq.s32.totalorder %v4294_v2, %v5212_v21 }
 0x14b   : > { %2900 = vmatpush1.msra.mxu1 %v2700_v52  ;;  %v2695_v31 = vadd.f32 %v3882_v54, %v3817_v51  ;;  %v2697_v59 = vadd.f32 %v3884_v16, %v3819_v57  ;;  %v3816_v33 = vsel %vm2292_vm8, 1.0, %v4154_v1  ;;  %vm2502_vm13 = vcmp.eq.s32.totalorder %v4294_v2, %v5215_v25 }
 0x14c   : > { %v3881_v46 = vsel %vm2502_vm13, 1.0, %v4154_v1  ;;  %vm2294_vm14 = vcmp.eq.s32.totalorder %v4294_v2, %v5223_v27  ;;  %vm2504_vm15 = vcmp.eq.s32.totalorder %v4294_v2, %v5239_v43  ;;  %v5619_v60 = vrot.slane %v3685_v17, %v4300_v4 }
 0x14d   : > { %2788 = vmatprep.subr.mxu0 %v2695_v31  ;;  %2901 = vmatprep.subr.mxu1 %v2697_v59  ;;  %v2694_v21 = vadd.f32 %v3881_v46, %v3816_v33  ;;  %v3818_v61 = vsel %vm2294_vm14, 1.0, %v4154_v1  ;;  %v3883_v22 = vsel %vm2504_vm15, 1.0, %v4154_v1  ;;  %v5624_v25 = vrot.slane %v3750_v58, %v4300_v4  ;;  %v4016_v46 = vld [vmem:[#allocation6 + $0x18] sm:$0xff] }
 0x14e   : > { %v2696_v62 = vadd.f32 %v3883_v22, %v3818_v61  ;;  %vm1869_vm0 = vcmp.eq.s32.totalorder %v4297_v3, %v5619_v60  ;;  %v5629_v27 = vrot.slane %v3685_v17, %v4303_v5  ;;  %v5632_v43 = vrot.slane %v3750_v58, %v4303_v5 }
 0x14f   : > { %2789 = vmatpush1.msra.mxu0 %v2694_v21  ;;  %v3747_v23 = vsel %vm1869_vm0, 1.0, %v4154_v1  ;;  %vm2079_vm1 = vcmp.eq.s32.totalorder %v4297_v3, %v5624_v25  ;;  %v5638_v24 = vrot.slane %v3685_v17, %v4306_v6  ;;  %v5641_v4 = vrot.slane %v3750_v58, %v4306_v6 }
 0x150   : > { %2902 = vmatpush1.msra.mxu1 %v2696_v62  ;;  %2823 = vmatmul.mubr.f32.vlgmr.msra.gmra.mxu0 %v4013_v30  ;;  %v3812_v63 = vsel %vm2079_vm1, 1.0, %v4154_v1  ;;  %vm1871_vm2 = vcmp.eq.s32.totalorder %v4297_v3, %v5629_v27  ;;  %vm2081_vm3 = vcmp.eq.s32.totalorder %v4297_v3, %v5632_v43  ;;  %v5649_v5 = vrot.slane %v3685_v17, %v4309_v7 }
 0x151   : > { %2936 = vmatmul.mubr.f32.vlgmr.msra.gmra.mxu1 %v4013_v30  ;;  %v2271_v18 = vsub.f32 %v3747_v23, %v3812_v63  ;;  %v3749_v15 = vsel %vm1871_vm2, 1.0, %v4154_v1  ;;  %v3814_v6 = vsel %vm2081_vm3, 1.0, %v4154_v1  ;;  %vm1868_vm4 = vcmp.eq.s32.totalorder %v4297_v3, %v5638_v24  ;;  %2828 = vmatprep.mubr.f32.mxu0 %v4154_v1 }
 0x152   : > { %v2273_v19 = vsub.f32 %v3749_v15, %v3814_v6  ;;  %v3746_v20 = vsel %vm1868_vm4, 1.0, %v4154_v1  ;;  %vm2078_vm5 = vcmp.eq.s32.totalorder %v4297_v3, %v5641_v4  ;;  %vm1870_vm6 = vcmp.eq.s32.totalorder %v4297_v3, %v5649_v5  ;;  %2941 = vmatprep.mubr.f32.mxu1 %v4154_v1 }
 0x153   : > { %2984 = vmatprep.subr.mxu0 %v2271_v18  ;;  %v3811_v26 = vsel %vm2078_vm5, 1.0, %v4154_v1  ;;  %v3748_v28 = vsel %vm1870_vm6, 1.0, %v4154_v1  ;;  %v5665_v29 = vrot.slane %v3750_v58, %v4309_v7  ;;  %vm1865_vm7 = vcmp.eq.s32.totalorder %v4312_v8, %v5619_v60 }
 0x154   : > { %3097 = vmatprep.subr.mxu1 %v2273_v19  ;;  %v2270_v32 = vsub.f32 %v3746_v20, %v3811_v26  ;;  %v3743_v34 = vsel %vm1865_vm7, 1.0, %v4154_v1  ;;  %vm2075_vm9 = vcmp.eq.s32.totalorder %v4312_v8, %v5624_v25  ;;  %vm1867_vm10 = vcmp.eq.s32.totalorder %v4312_v8, %v5629_v27  ;;  %2829 = vmatmul.mubr.f32.gmra.mxu0 %v4014_v35  ;;  %v4017_v20 = vld [vmem:[#allocation6 + $0x20] sm:$0xff] }
 0x155   : > { %vm2080_vm11 = vcmp.eq.s32.totalorder %v4297_v3, %v5665_v29  ;;  %v3808_v7 = vsel %vm2075_vm9, 1.0, %v4154_v1  ;;  %v3745_v36 = vsel %vm1867_vm10, 1.0, %v4154_v1  ;;  %vm2077_vm12 = vcmp.eq.s32.totalorder %v4312_v8, %v5632_v43  ;;  %2942 = vmatmul.mubr.f32.gmra.mxu1 %v4014_v35  ;;  %2834 = vmatprep.mubr.f32.mxu0 %v4154_v1 }
 0x156   : > { %2985 = vmatpush1.msra.mxu0 %v2270_v32  ;;  %v3813_v37 = vsel %vm2080_vm11, 1.0, %v4154_v1  ;;  %v2267_v39 = vsub.f32 %v3743_v34, %v3808_v7  ;;  %v3810_v44 = vsel %vm2077_vm12, 1.0, %v4154_v1  ;;  %vm1864_vm8 = vcmp.eq.s32.totalorder %v4312_v8, %v5638_v24  ;;  %2947 = vmatprep.mubr.f32.mxu1 %v4154_v1 }
 0x157   : > { %v2272_v3 = vsub.f32 %v3748_v28, %v3813_v37  ;;  %v2269_v45 = vsub.f32 %v3745_v36, %v3810_v44  ;;  %v3742_v47 = vsel %vm1864_vm8, 1.0, %v4154_v1  ;;  %vm2074_vm13 = vcmp.eq.s32.totalorder %v4312_v8, %v5641_v4 }
 0x158   : > { %2986 = vmatprep.subr.mxu0 %v2267_v39  ;;  %v3807_v48 = vsel %vm2074_vm13, 1.0, %v4154_v1  ;;  %vm1866_vm14 = vcmp.eq.s32.totalorder %v4312_v8, %v5649_v5  ;;  %vm2076_vm15 = vcmp.eq.s32.totalorder %v4312_v8, %v5665_v29  ;;  %vm1861_vm0 = vcmp.eq.s32.totalorder %v4315_v9, %v5619_v60  ;;  %2835 = vmatmul.mubr.f32.gmra.mxu0 %v4015_v49 }
 0x159   : > { %3098 = vmatpush1.msra.mxu1 %v2272_v3  ;;  %v2266_v50 = vsub.f32 %v3742_v47, %v3807_v48  ;;  %v3744_v51 = vsel %vm1866_vm14, 1.0, %v4154_v1  ;;  %v3809_v52 = vsel %vm2076_vm15, 1.0, %v4154_v1  ;;  %v3739_v17 = vsel %vm1861_vm0, 1.0, %v4154_v1  ;;  %2840 = vmatprep.mubr.f32.mxu0 %v4154_v1 }
 0x15a   : > { %3099 = vmatprep.subr.mxu1 %v2269_v45  ;;  %v2268_v54 = vsub.f32 %v3744_v51, %v3809_v52  ;;  %vm2071_vm1 = vcmp.eq.s32.totalorder %v4315_v9, %v5624_v25  ;;  %vm1863_vm2 = vcmp.eq.s32.totalorder %v4315_v9, %v5629_v27  ;;  %vm2073_vm3 = vcmp.eq.s32.totalorder %v4315_v9, %v5632_v43  ;;  %v4018_v45 = vld [vmem:[#allocation6 + $0x28] sm:$0xff] }
 0x15b   : > { %2987 = vmatpush1.msra.mxu0 %v2266_v50  ;;  %v3804_v8 = vsel %vm2071_vm1, 1.0, %v4154_v1  ;;  %v3741_v57 = vsel %vm1863_vm2, 1.0, %v4154_v1  ;;  %v3806_v16 = vsel %vm2073_vm3, 1.0, %v4154_v1  ;;  %vm1860_vm4 = vcmp.eq.s32.totalorder %v4315_v9, %v5638_v24  ;;  %2948 = vmatmul.mubr.f32.gmra.mxu1 %v4015_v49 }
 0x15c   : > { %3100 = vmatpush1.msra.mxu1 %v2268_v54  ;;  %v2263_v58 = vsub.f32 %v3739_v17, %v3804_v8  ;;  %v2265_v31 = vsub.f32 %v3741_v57, %v3806_v16  ;;  %v3738_v59 = vsel %vm1860_vm4, 1.0, %v4154_v1  ;;  %vm2070_vm5 = vcmp.eq.s32.totalorder %v4315_v9, %v5641_v4  ;;  %2953 = vmatprep.mubr.f32.mxu1 %v4154_v1 }
 0x15d   : > { %v3803_v33 = vsel %vm2070_vm5, 1.0, %v4154_v1  ;;  %vm1862_vm6 = vcmp.eq.s32.totalorder %v4315_v9, %v5649_v5  ;;  %vm2072_vm7 = vcmp.eq.s32.totalorder %v4315_v9, %v5665_v29  ;;  %vm1857_vm9 = vcmp.eq.s32.totalorder %v4318_v10, %v5619_v60  ;;  %2841 = vmatmul.mubr.f32.gmra.mxu0 %v4016_v46 }
 0x15e   : > { %2988 = vmatprep.subr.mxu0 %v2263_v58  ;;  %3101 = vmatprep.subr.mxu1 %v2265_v31  ;;  %v2262_v21 = vsub.f32 %v3738_v59, %v3803_v33  ;;  %v3740_v61 = vsel %vm1862_vm6, 1.0, %v4154_v1  ;;  %v3805_v22 = vsel %vm2072_vm7, 1.0, %v4154_v1  ;;  %v3735_v62 = vsel %vm1857_vm9, 1.0, %v4154_v1  ;;  %v4019_v58 = vld [vmem:[#allocation6 + $0x30] sm:$0xff] }
 0x15f   : > { %v2264_v23 = vsub.f32 %v3740_v61, %v3805_v22  ;;  %vm2067_vm10 = vcmp.eq.s32.totalorder %v4318_v10, %v5624_v25  ;;  %vm1859_vm11 = vcmp.eq.s32.totalorder %v4318_v10, %v5629_v27  ;;  %vm2069_vm12 = vcmp.eq.s32.totalorder %v4318_v10, %v5632_v43  ;;  %2954 = vmatmul.mubr.f32.gmra.mxu1 %v4016_v46 }
 0x160   : > { %2989 = vmatpush1.msra.mxu0 %v2262_v21  ;;  %v3800_v9 = vsel %vm2067_vm10, 1.0, %v4154_v1  ;;  %v3737_v30 = vsel %vm1859_vm11, 1.0, %v4154_v1  ;;  %v3802_v63 = vsel %vm2069_vm12, 1.0, %v4154_v1  ;;  %vm1856_vm8 = vcmp.eq.s32.totalorder %v4318_v10, %v5638_v24  ;;  %2846 = vmatprep.mubr.f32.mxu0 %v4154_v1 }
 0x161   : > { %3102 = vmatpush1.msra.mxu1 %v2264_v23  ;;  %v2259_v18 = vsub.f32 %v3735_v62, %v3800_v9  ;;  %v2261_v15 = vsub.f32 %v3737_v30, %v3802_v63  ;;  %v3734_v6 = vsel %vm1856_vm8, 1.0, %v4154_v1  ;;  %vm2066_vm13 = vcmp.eq.s32.totalorder %v4318_v10, %v5641_v4  ;;  %2959 = vmatprep.mubr.f32.mxu1 %v4154_v1  ;;  %v4020_v63 = vld [vmem:[#allocation6 + $0x38] sm:$0xff] }
 0x162   : > { %v3799_v19 = vsel %vm2066_vm13, 1.0, %v4154_v1  ;;  %vm1858_vm14 = vcmp.eq.s32.totalorder %v4318_v10, %v5649_v5  ;;  %vm2068_vm15 = vcmp.eq.s32.totalorder %v4318_v10, %v5665_v29  ;;  %vm1853_vm0 = vcmp.eq.s32.totalorder %v4321_v11, %v5619_v60  ;;  %2847 = vmatmul.mubr.f32.gmra.mxu0 %v4017_v20 }
 0x163   : > { %2990 = vmatprep.subr.mxu0 %v2259_v18  ;;  %3103 = vmatprep.subr.mxu1 %v2261_v15  ;;  %v2258_v26 = vsub.f32 %v3734_v6, %v3799_v19  ;;  %v3736_v28 = vsel %vm1858_vm14, 1.0, %v4154_v1  ;;  %v3801_v32 = vsel %vm2068_vm15, 1.0, %v4154_v1  ;;  %v3731_v34 = vsel %vm1853_vm0, 1.0, %v4154_v1 }
 0x164   : > { %v2260_v35 = vsub.f32 %v3736_v28, %v3801_v32  ;;  %vm2063_vm1 = vcmp.eq.s32.totalorder %v4321_v11, %v5624_v25  ;;  %vm1855_vm2 = vcmp.eq.s32.totalorder %v4321_v11, %v5629_v27  ;;  %vm2065_vm3 = vcmp.eq.s32.totalorder %v4321_v11, %v5632_v43  ;;  %2960 = vmatmul.mubr.f32.gmra.mxu1 %v4017_v20 }
 0x165   : > { %2991 = vmatpush1.msra.mxu0 %v2258_v26  ;;  %v3796_v10 = vsel %vm2063_vm1, 1.0, %v4154_v1  ;;  %v3733_v7 = vsel %vm1855_vm2, 1.0, %v4154_v1  ;;  %v3798_v36 = vsel %vm2065_vm3, 1.0, %v4154_v1  ;;  %vm1852_vm4 = vcmp.eq.s32.totalorder %v4321_v11, %v5638_v24  ;;  %2852 = vmatprep.mubr.f32.mxu0 %v4154_v1 }
 0x166   : > { %3104 = vmatpush1.msra.mxu1 %v2260_v35  ;;  %v2255_v37 = vsub.f32 %v3731_v34, %v3796_v10  ;;  %v2257_v39 = vsub.f32 %v3733_v7, %v3798_v36  ;;  %v3730_v44 = vsel %vm1852_vm4, 1.0, %v4154_v1  ;;  %vm2062_vm5 = vcmp.eq.s32.totalorder %v4321_v11, %v5641_v4  ;;  %2965 = vmatprep.mubr.f32.mxu1 %v4154_v1 }
 0x167   : > { %v3795_v3 = vsel %vm2062_vm5, 1.0, %v4154_v1  ;;  %vm1854_vm6 = vcmp.eq.s32.totalorder %v4321_v11, %v5649_v5  ;;  %vm2064_vm7 = vcmp.eq.s32.totalorder %v4321_v11, %v5665_v29  ;;  %vm1849_vm9 = vcmp.eq.s32.totalorder %v4324_v12, %v5619_v60  ;;  %2853 = vmatmul.mubr.f32.gmra.mxu0 %v4018_v45 }
 0x168   : > { %2992 = vmatprep.subr.mxu0 %v2255_v37  ;;  %3105 = vmatprep.subr.mxu1 %v2257_v39  ;;  %v2254_v47 = vsub.f32 %v3730_v44, %v3795_v3  ;;  %v3732_v48 = vsel %vm1854_vm6, 1.0, %v4154_v1  ;;  %v3797_v49 = vsel %vm2064_vm7, 1.0, %v4154_v1  ;;  %v3727_v50 = vsel %vm1849_vm9, 1.0, %v4154_v1 }
 0x169   : > { %v2256_v51 = vsub.f32 %v3732_v48, %v3797_v49  ;;  %vm2059_vm10 = vcmp.eq.s32.totalorder %v4324_v12, %v5624_v25  ;;  %vm1851_vm11 = vcmp.eq.s32.totalorder %v4324_v12, %v5629_v27  ;;  %vm2061_vm12 = vcmp.eq.s32.totalorder %v4324_v12, %v5632_v43  ;;  %2966 = vmatmul.mubr.f32.gmra.mxu1 %v4018_v45 }
 0x16a   : > { %2993 = vmatpush1.msra.mxu0 %v2254_v47  ;;  %v3792_v11 = vsel %vm2059_vm10, 1.0, %v4154_v1  ;;  %v3729_v52 = vsel %vm1851_vm11, 1.0, %v4154_v1  ;;  %v3794_v17 = vsel %vm2061_vm12, 1.0, %v4154_v1  ;;  %vm1848_vm8 = vcmp.eq.s32.totalorder %v4324_v12, %v5638_v24  ;;  %2858 = vmatprep.mubr.f32.mxu0 %v4154_v1 }
 0x16b   : > { %3106 = vmatpush1.msra.mxu1 %v2256_v51  ;;  %v2251_v54 = vsub.f32 %v3727_v50, %v3792_v11  ;;  %v2253_v8 = vsub.f32 %v3729_v52, %v3794_v17  ;;  %v3726_v57 = vsel %vm1848_vm8, 1.0, %v4154_v1  ;;  %vm2058_vm13 = vcmp.eq.s32.totalorder %v4324_v12, %v5641_v4  ;;  %2971 = vmatprep.mubr.f32.mxu1 %v4154_v1 }
 0x16c   : > { %v3791_v16 = vsel %vm2058_vm13, 1.0, %v4154_v1  ;;  %vm1850_vm14 = vcmp.eq.s32.totalorder %v4324_v12, %v5649_v5  ;;  %vm2060_vm15 = vcmp.eq.s32.totalorder %v4324_v12, %v5665_v29  ;;  %vm1845_vm0 = vcmp.eq.s32.totalorder %v4327_v13, %v5619_v60  ;;  %2859 = vmatmul.mubr.f32.gmra.mxu0 %v4019_v58 }
 0x16d   : > { %2994 = vmatprep.subr.mxu0 %v2251_v54  ;;  %3107 = vmatprep.subr.mxu1 %v2253_v8  ;;  %v2250_v31 = vsub.f32 %v3726_v57, %v3791_v16  ;;  %v3728_v59 = vsel %vm1850_vm14, 1.0, %v4154_v1  ;;  %v3793_v33 = vsel %vm2060_vm15, 1.0, %v4154_v1  ;;  %v3723_v46 = vsel %vm1845_vm0, 1.0, %v4154_v1  ;;  %v5890_v16 = vpop.f32.mrf.mxu0 }
 0x16e   : > { %v2252_v21 = vsub.f32 %v3728_v59, %v3793_v33  ;;  %vm2055_vm1 = vcmp.eq.s32.totalorder %v4327_v13, %v5624_v25  ;;  %vm1847_vm2 = vcmp.eq.s32.totalorder %v4327_v13, %v5629_v27  ;;  %vm2057_vm3 = vcmp.eq.s32.totalorder %v4327_v13, %v5632_v43  ;;  %2972 = vmatmul.mubr.f32.gmra.mxu1 %v4019_v58  ;;  %v5895_v33 = vpop.f32.mrf.mxu1 }
 0x16f   : > { %2995 = vmatpush1.msra.mxu0 %v2250_v31  ;;  %v3788_v12 = vsel %vm2055_vm1, 1.0, %v4154_v1  ;;  %v3725_v61 = vsel %vm1847_vm2, 1.0, %v4154_v1  ;;  %v3790_v22 = vsel %vm2057_vm3, 1.0, %v4154_v1  ;;  %vm1844_vm4 = vcmp.eq.s32.totalorder %v4327_v13, %v5638_v24  ;;  %2864 = vmatprep.mubr.f32.mxu0 %v4154_v1 }
 0x170   : > { %3108 = vmatpush1.msra.mxu1 %v2252_v21  ;;  %v2247_v62 = vsub.f32 %v3723_v46, %v3788_v12  ;;  %v2249_v23 = vsub.f32 %v3725_v61, %v3790_v22  ;;  %v3722_v9 = vsel %vm1844_vm4, 1.0, %v4154_v1  ;;  %vm2054_vm5 = vcmp.eq.s32.totalorder %v4327_v13, %v5641_v4  ;;  %2977 = vmatprep.mubr.f32.mxu1 %v4154_v1 }
 0x171   : > { %v3787_v30 = vsel %vm2054_vm5, 1.0, %v4154_v1  ;;  %vm1846_vm6 = vcmp.eq.s32.totalorder %v4327_v13, %v5649_v5  ;;  %vm2056_vm7 = vcmp.eq.s32.totalorder %v4327_v13, %v5665_v29  ;;  %vm1841_vm9 = vcmp.eq.s32.totalorder %v4330_v14, %v5619_v60  ;;  %2865 = vmatmul.mubr.f32.gmra.mxu0 %v4020_v63 }
 0x172   : > { %2996 = vmatprep.subr.mxu0 %v2247_v62  ;;  %3109 = vmatprep.subr.mxu1 %v2249_v23  ;;  %v2246_v18 = vsub.f32 %v3722_v9, %v3787_v30  ;;  %v3724_v15 = vsel %vm1846_vm6, 1.0, %v4154_v1  ;;  %v3789_v6 = vsel %vm2056_vm7, 1.0, %v4154_v1  ;;  %v3719_v19 = vsel %vm1841_vm9, 1.0, %v4154_v1 }
 0x173   : > { %v2248_v20 = vsub.f32 %v3724_v15, %v3789_v6  ;;  %vm2051_vm10 = vcmp.eq.s32.totalorder %v4330_v14, %v5624_v25  ;;  %vm1843_vm11 = vcmp.eq.s32.totalorder %v4330_v14, %v5629_v27  ;;  %vm2053_vm12 = vcmp.eq.s32.totalorder %v4330_v14, %v5632_v43  ;;  %2978 = vmatmul.mubr.f32.gmra.mxu1 %v4020_v63  ;;  %v5920_v63 = vpop.f32.mrf.mxu1 }
 0x174   : > { %2997 = vmatpush1.msra.mxu0 %v2246_v18  ;;  %v3784_v13 = vsel %vm2051_vm10, 1.0, %v4154_v1  ;;  %v3721_v26 = vsel %vm1843_vm11, 1.0, %v4154_v1  ;;  %v3786_v28 = vsel %vm2053_vm12, 1.0, %v4154_v1  ;;  %vm1840_vm8 = vcmp.eq.s32.totalorder %v4330_v14, %v5638_v24  ;;  %3048 = vmatprep.mubr.f32.mxu0 %v4154_v1 }
 0x175   : > { %3110 = vmatpush1.msra.mxu1 %v2248_v20  ;;  %v2243_v32 = vsub.f32 %v3719_v19, %v3784_v13  ;;  %v2245_v34 = vsub.f32 %v3721_v26, %v3786_v28  ;;  %v3718_v35 = vsel %vm1840_vm8, 1.0, %v4154_v1  ;;  %vm2050_vm13 = vcmp.eq.s32.totalorder %v4330_v14, %v5641_v4  ;;  %3161 = vmatprep.mubr.f32.mxu1 %v4154_v1 }
 0x176   : > { %v3783_v10 = vsel %vm2050_vm13, 1.0, %v4154_v1  ;;  %vm1842_vm14 = vcmp.eq.s32.totalorder %v4330_v14, %v5649_v5  ;;  %vm2052_vm15 = vcmp.eq.s32.totalorder %v4330_v14, %v5665_v29  ;;  %vm1837_vm0 = vcmp.eq.s32.totalorder %v4551_v38, %v5619_v60 }
 0x177   : > { %2998 = vmatprep.subr.mxu0 %v2243_v32  ;;  %3111 = vmatprep.subr.mxu1 %v2245_v34  ;;  %v2242_v7 = vsub.f32 %v3718_v35, %v3783_v10  ;;  %v3720_v36 = vsel %vm1842_vm14, 1.0, %v4154_v1  ;;  %v3785_v37 = vsel %vm2052_vm15, 1.0, %v4154_v1  ;;  %v3715_v39 = vsel %vm1837_vm0, 1.0, %v4154_v1 }
 0x178   : > { %v2244_v44 = vsub.f32 %v3720_v36, %v3785_v37  ;;  %vm2047_vm1 = vcmp.eq.s32.totalorder %v4551_v38, %v5624_v25  ;;  %vm1839_vm2 = vcmp.eq.s32.totalorder %v4551_v38, %v5629_v27  ;;  %vm2049_vm3 = vcmp.eq.s32.totalorder %v4551_v38, %v5632_v43 }
 0x179   : > { %2999 = vmatpush1.msra.mxu0 %v2242_v7  ;;  %v3780_v14 = vsel %vm2047_vm1, 1.0, %v4154_v1  ;;  %v3717_v3 = vsel %vm1839_vm2, 1.0, %v4154_v1  ;;  %v3782_v45 = vsel %vm2049_vm3, 1.0, %v4154_v1  ;;  %vm1836_vm4 = vcmp.eq.s32.totalorder %v4551_v38, %v5638_v24 }
 0x17a   : > { %3112 = vmatpush1.msra.mxu1 %v2244_v44  ;;  %v2239_v47 = vsub.f32 %v3715_v39, %v3780_v14  ;;  %v2241_v48 = vsub.f32 %v3717_v3, %v3782_v45  ;;  %v3714_v49 = vsel %vm1836_vm4, 1.0, %v4154_v1  ;;  %vm2046_vm5 = vcmp.eq.s32.totalorder %v4551_v38, %v5641_v4 }
 0x17b   : > { %v3779_v50 = vsel %vm2046_vm5, 1.0, %v4154_v1  ;;  %vm1838_vm6 = vcmp.eq.s32.totalorder %v4551_v38, %v5649_v5  ;;  %vm2048_vm7 = vcmp.eq.s32.totalorder %v4551_v38, %v5665_v29  ;;  %vm1833_vm9 = vcmp.eq.s32.totalorder %v4554_v40, %v5619_v60 }
 0x17c   : > { %3000 = vmatprep.subr.mxu0 %v2239_v47  ;;  %3113 = vmatprep.subr.mxu1 %v2241_v48  ;;  %v2238_v51 = vsub.f32 %v3714_v49, %v3779_v50  ;;  %v3716_v11 = vsel %vm1838_vm6, 1.0, %v4154_v1  ;;  %v3781_v52 = vsel %vm2048_vm7, 1.0, %v4154_v1  ;;  %v3711_v17 = vsel %vm1833_vm9, 1.0, %v4154_v1 }
 0x17d   : > { %v2240_v54 = vsub.f32 %v3716_v11, %v3781_v52  ;;  %vm2043_vm10 = vcmp.eq.s32.totalorder %v4554_v40, %v5624_v25  ;;  %vm1835_vm11 = vcmp.eq.s32.totalorder %v4554_v40, %v5629_v27  ;;  %vm2045_vm12 = vcmp.eq.s32.totalorder %v4554_v40, %v5632_v43 }
 0x17e   : > { %3001 = vmatpush1.msra.mxu0 %v2238_v51  ;;  %v3776_v38 = vsel %vm2043_vm10, 1.0, %v4154_v1  ;;  %v3713_v8 = vsel %vm1835_vm11, 1.0, %v4154_v1  ;;  %v3778_v57 = vsel %vm2045_vm12, 1.0, %v4154_v1  ;;  %vm1832_vm8 = vcmp.eq.s32.totalorder %v4554_v40, %v5638_v24 }
 0x17f   : > { %3114 = vmatpush1.msra.mxu1 %v2240_v54  ;;  %v2235_v58 = vsub.f32 %v3711_v17, %v3776_v38  ;;  %v2237_v31 = vsub.f32 %v3713_v8, %v3778_v57  ;;  %v3710_v59 = vsel %vm1832_vm8, 1.0, %v4154_v1  ;;  %vm2042_vm13 = vcmp.eq.s32.totalorder %v4554_v40, %v5641_v4 }
 0x180   : > { %v3775_v46 = vsel %vm2042_vm13, 1.0, %v4154_v1  ;;  %vm1834_vm14 = vcmp.eq.s32.totalorder %v4554_v40, %v5649_v5  ;;  %vm2044_vm15 = vcmp.eq.s32.totalorder %v4554_v40, %v5665_v29  ;;  %vm1829_vm0 = vcmp.eq.s32.totalorder %v4557_v41, %v5619_v60  ;;  %v5913_v40 = vpop.f32.mrf.mxu0 }
 0x181   : > { %3002 = vmatprep.subr.mxu0 %v2235_v58  ;;  %3115 = vmatprep.subr.mxu1 %v2237_v31  ;;  %v2234_v21 = vsub.f32 %v3710_v59, %v3775_v46  ;;  %v3712_v12 = vsel %vm1834_vm14, 1.0, %v4154_v1  ;;  %v3777_v61 = vsel %vm2044_vm15, 1.0, %v4154_v1  ;;  %v3707_v22 = vsel %vm1829_vm0, 1.0, %v4154_v1 }
 0x182   : > { %v2236_v62 = vsub.f32 %v3712_v12, %v3777_v61  ;;  %vm2039_vm1 = vcmp.eq.s32.totalorder %v4557_v41, %v5624_v25  ;;  %vm1831_vm2 = vcmp.eq.s32.totalorder %v4557_v41, %v5629_v27  ;;  %vm2041_vm3 = vcmp.eq.s32.totalorder %v4557_v41, %v5632_v43  ;;  %v5935_v32 = vpop.f32.mrf.mxu0 }
 0x183   : > { %3003 = vmatpush1.msra.mxu0 %v2234_v21  ;;  %v3772_v23 = vsel %vm2039_vm1, 1.0, %v4154_v1  ;;  %v3709_v9 = vsel %vm1831_vm2, 1.0, %v4154_v1  ;;  %v3774_v30 = vsel %vm2041_vm3, 1.0, %v4154_v1  ;;  %vm1828_vm4 = vcmp.eq.s32.totalorder %v4557_v41, %v5638_v24 }
 0x184   : > { %3116 = vmatpush1.msra.mxu1 %v2236_v62  ;;  %v2231_v18 = vsub.f32 %v3707_v22, %v3772_v23  ;;  %v2233_v15 = vsub.f32 %v3709_v9, %v3774_v30  ;;  %v3706_v6 = vsel %vm1828_vm4, 1.0, %v4154_v1  ;;  %vm2038_vm5 = vcmp.eq.s32.totalorder %v4557_v41, %v5641_v4  ;;  %v5960_v14 = vpop.f32.mrf.mxu0 }
 0x185   : > { %v3771_v19 = vsel %vm2038_vm5, 1.0, %v4154_v1  ;;  %vm1830_vm6 = vcmp.eq.s32.totalorder %v4557_v41, %v5649_v5  ;;  %vm2040_vm7 = vcmp.eq.s32.totalorder %v4557_v41, %v5665_v29  ;;  %vm1825_vm9 = vcmp.eq.s32.totalorder %v4560_v42, %v5619_v60  ;;  %v5943_v41 = vpop.f32.mrf.mxu1 }
 0x186   : > { %3004 = vmatprep.subr.mxu0 %v2231_v18  ;;  %3117 = vmatprep.subr.mxu1 %v2233_v15  ;;  %v2230_v20 = vsub.f32 %v3706_v6, %v3771_v19  ;;  %v3708_v13 = vsel %vm1830_vm6, 1.0, %v4154_v1  ;;  %v3773_v26 = vsel %vm2040_vm7, 1.0, %v4154_v1  ;;  %v3703_v28 = vsel %vm1825_vm9, 1.0, %v4154_v1  ;;  %v5981_v38 = vpop.f32.mrf.mxu0 }
 0x187   : > { %v2232_v34 = vsub.f32 %v3708_v13, %v3773_v26  ;;  %vm2035_vm10 = vcmp.eq.s32.totalorder %v4560_v42, %v5624_v25  ;;  %vm1827_vm11 = vcmp.eq.s32.totalorder %v4560_v42, %v5629_v27  ;;  %vm2037_vm12 = vcmp.eq.s32.totalorder %v4560_v42, %v5632_v43  ;;  %v5965_v49 = vpop.f32.mrf.mxu1 }
 0x188   : > { %3005 = vmatpush1.msra.mxu0 %v2230_v20  ;;  %v3768_v35 = vsel %vm2035_vm10, 1.0, %v4154_v1  ;;  %v3705_v10 = vsel %vm1827_vm11, 1.0, %v4154_v1  ;;  %v3770_v7 = vsel %vm2037_vm12, 1.0, %v4154_v1  ;;  %vm1824_vm8 = vcmp.eq.s32.totalorder %v4560_v42, %v5638_v24  ;;  %v6006_v22 = vpop.f32.mrf.mxu0 }
 0x189   : > { %3118 = vmatpush1.msra.mxu1 %v2232_v34  ;;  %v2227_v36 = vsub.f32 %v3703_v28, %v3768_v35  ;;  %v2229_v37 = vsub.f32 %v3705_v10, %v3770_v7  ;;  %v3702_v39 = vsel %vm1824_vm8, 1.0, %v4154_v1  ;;  %vm2034_vm13 = vcmp.eq.s32.totalorder %v4560_v42, %v5641_v4  ;;  %v5990_v57 = vpop.f32.mrf.mxu1 }
 0x18a   : > { %v3767_v44 = vsel %vm2034_vm13, 1.0, %v4154_v1  ;;  %vm1826_vm14 = vcmp.eq.s32.totalorder %v4560_v42, %v5649_v5  ;;  %vm2036_vm15 = vcmp.eq.s32.totalorder %v4560_v42, %v5665_v29  ;;  %vm1821_vm0 = vcmp.eq.s32.totalorder %v4659_v53, %v5619_v60 }
 0x18b   : > { %3006 = vmatprep.subr.mxu0 %v2227_v36  ;;  %3119 = vmatprep.subr.mxu1 %v2229_v37  ;;  %v2226_v3 = vsub.f32 %v3702_v39, %v3767_v44  ;;  %v3704_v45 = vsel %vm1826_vm14, 1.0, %v4154_v1  ;;  %v3769_v47 = vsel %vm2036_vm15, 1.0, %v4154_v1  ;;  %v3699_v48 = vsel %vm1821_vm0, 1.0, %v4154_v1  ;;  %v6011_v30 = vpop.f32.mrf.mxu1 }
 0x18c   : > { %v2228_v50 = vsub.f32 %v3704_v45, %v3769_v47  ;;  %vm2031_vm1 = vcmp.eq.s32.totalorder %v4659_v53, %v5624_v25  ;;  %vm1823_vm2 = vcmp.eq.s32.totalorder %v4659_v53, %v5629_v27  ;;  %vm2033_vm3 = vcmp.eq.s32.totalorder %v4659_v53, %v5632_v43 }
 0x18d   : > { %3007 = vmatpush1.msra.mxu0 %v2226_v3  ;;  %v3764_v42 = vsel %vm2031_vm1, 1.0, %v4154_v1  ;;  %v3701_v51 = vsel %vm1823_vm2, 1.0, %v4154_v1  ;;  %v3766_v11 = vsel %vm2033_vm3, 1.0, %v4154_v1  ;;  %vm1820_vm4 = vcmp.eq.s32.totalorder %v4659_v53, %v5638_v24  ;;  %v6036_v35 = vpop.f32.mrf.mxu1 }
 0x18e   : > { %3120 = vmatpush1.msra.mxu1 %v2228_v50  ;;  %v2223_v52 = vsub.f32 %v3699_v48, %v3764_v42  ;;  %v2225_v17 = vsub.f32 %v3701_v51, %v3766_v11  ;;  %v3698_v54 = vsel %vm1820_vm4, 1.0, %v4154_v1  ;;  %vm2030_vm5 = vcmp.eq.s32.totalorder %v4659_v53, %v5641_v4 }
 0x18f   : > { %v3763_v8 = vsel %vm2030_vm5, 1.0, %v4154_v1  ;;  %vm1822_vm6 = vcmp.eq.s32.totalorder %v4659_v53, %v5649_v5  ;;  %vm2032_vm7 = vcmp.eq.s32.totalorder %v4659_v53, %v5665_v29  ;;  %vm1817_vm9 = vcmp.eq.s32.totalorder %v4662_v55, %v5619_v60 }
 0x190   : > { %3008 = vmatprep.subr.mxu0 %v2223_v52  ;;  %3121 = vmatprep.subr.mxu1 %v2225_v17  ;;  %v2222_v58 = vsub.f32 %v3698_v54, %v3763_v8  ;;  %v3700_v31 = vsel %vm1822_vm6, 1.0, %v4154_v1  ;;  %v3765_v59 = vsel %vm2032_vm7, 1.0, %v4154_v1  ;;  %v3695_v46 = vsel %vm1817_vm9, 1.0, %v4154_v1  ;;  %v4021_v8 = vld [vmem:[#allocation4] sm:$0xff] }
 0x191   : > { %v2224_v21 = vsub.f32 %v3700_v31, %v3765_v59  ;;  %vm2027_vm10 = vcmp.eq.s32.totalorder %v4662_v55, %v5624_v25  ;;  %vm1819_vm11 = vcmp.eq.s32.totalorder %v4662_v55, %v5629_v27  ;;  %vm2029_vm12 = vcmp.eq.s32.totalorder %v4662_v55, %v5632_v43 }
 0x192   : > { %3009 = vmatpush1.msra.mxu0 %v2222_v58  ;;  %v3760_v53 = vsel %vm2027_vm10, 1.0, %v4154_v1  ;;  %v3697_v12 = vsel %vm1819_vm11, 1.0, %v4154_v1  ;;  %v3762_v61 = vsel %vm2029_vm12, 1.0, %v4154_v1  ;;  %vm1816_vm8 = vcmp.eq.s32.totalorder %v4662_v55, %v5638_v24  ;;  %v4022_v58 = vld [vmem:[#allocation4 + $0x8] sm:$0xff] }
 0x193   : > { %3122 = vmatpush1.msra.mxu1 %v2224_v21  ;;  %v2219_v62 = vsub.f32 %v3695_v46, %v3760_v53  ;;  %v2221_v23 = vsub.f32 %v3697_v12, %v3762_v61  ;;  %v3694_v9 = vsel %vm1816_vm8, 1.0, %v4154_v1  ;;  %vm2026_vm13 = vcmp.eq.s32.totalorder %v4662_v55, %v5641_v4  ;;  %v4023_v46 = vld [vmem:[#allocation4 + $0x10] sm:$0xff]  ;;  %v4024_v12 = vld [vmem:[#allocation4 + $0x18] sm:$0xff] }
 0x194   : > { %v3759_v18 = vsel %vm2026_vm13, 1.0, %v4154_v1  ;;  %vm1818_vm14 = vcmp.eq.s32.totalorder %v4662_v55, %v5649_v5  ;;  %vm2028_vm15 = vcmp.eq.s32.totalorder %v4662_v55, %v5665_v29  ;;  %vm1813_vm0 = vcmp.eq.s32.totalorder %v4665_v56, %v5619_v60  ;;  %v6029_v55 = vpop.f32.mrf.mxu0 }
 0x195   : > { %3010 = vmatprep.subr.mxu0 %v2219_v62  ;;  %3123 = vmatprep.subr.mxu1 %v2221_v23  ;;  %v2218_v15 = vsub.f32 %v3694_v9, %v3759_v18  ;;  %v3696_v6 = vsel %vm1818_vm14, 1.0, %v4154_v1  ;;  %v3761_v19 = vsel %vm2028_vm15, 1.0, %v4154_v1  ;;  %v3691_v20 = vsel %vm1813_vm0, 1.0, %v4154_v1  ;;  %v4025_v23 = vld [vmem:[#allocation4 + $0x20] sm:$0xff] }
 0x196   : > { %v2220_v13 = vsub.f32 %v3696_v6, %v3761_v19  ;;  %vm2023_vm1 = vcmp.eq.s32.totalorder %v4665_v56, %v5624_v25  ;;  %vm1815_vm2 = vcmp.eq.s32.totalorder %v4665_v56, %v5629_v27  ;;  %vm2025_vm3 = vcmp.eq.s32.totalorder %v4665_v56, %v5632_v43  ;;  %v6051_v47 = vpop.f32.mrf.mxu0 }
 0x197   : > { %3011 = vmatpush1.msra.mxu0 %v2218_v15  ;;  %v3756_v26 = vsel %vm2023_vm1, 1.0, %v4154_v1  ;;  %v3693_v28 = vsel %vm1815_vm2, 1.0, %v4154_v1  ;;  %v3758_v34 = vsel %vm2025_vm3, 1.0, %v4154_v1  ;;  %vm1812_vm4 = vcmp.eq.s32.totalorder %v4665_v56, %v5638_v24  ;;  %v4026_v15 = vld [vmem:[#allocation4 + $0x28] sm:$0xff] }
 0x198   : > { %3124 = vmatpush1.msra.mxu1 %v2220_v13  ;;  %v2215_v10 = vsub.f32 %v3691_v20, %v3756_v26  ;;  %v2217_v7 = vsub.f32 %v3693_v28, %v3758_v34  ;;  %v3690_v36 = vsel %vm1812_vm4, 1.0, %v4154_v1  ;;  %vm2022_vm5 = vcmp.eq.s32.totalorder %v4665_v56, %v5641_v4  ;;  %v6074_v11 = vpop.f32.mrf.mxu0  ;;  %v4027_v20 = vld [vmem:[#allocation4 + $0x30] sm:$0xff]  ;;  %v4028_v28 = vld [vmem:[#allocation4 + $0x38] sm:$0xff] }
 0x199   : > { %v3755_v37 = vsel %vm2022_vm5, 1.0, %v4154_v1  ;;  %vm1814_vm6 = vcmp.eq.s32.totalorder %v4665_v56, %v5649_v5  ;;  %vm2024_vm7 = vcmp.eq.s32.totalorder %v4665_v56, %v5665_v29  ;;  %vm1809_vm9 = vcmp.eq.s32.totalorder %v4294_v2, %v5619_v60  ;;  %v6059_v56 = vpop.f32.mrf.mxu1 }
 0x19a   : > { %3012 = vmatprep.subr.mxu0 %v2215_v10  ;;  %3125 = vmatprep.subr.mxu1 %v2217_v7  ;;  %v2214_v39 = vsub.f32 %v3690_v36, %v3755_v37  ;;  %v3692_v44 = vsel %vm1814_vm6, 1.0, %v4154_v1  ;;  %v3757_v3 = vsel %vm2024_vm7, 1.0, %v4154_v1  ;;  %v3687_v45 = vsel %vm1809_vm9, 1.0, %v4154_v1 }
 0x19b   : > { %v2216_v48 = vsub.f32 %v3692_v44, %v3757_v3  ;;  %vm2019_vm10 = vcmp.eq.s32.totalorder %v4294_v2, %v5624_v25  ;;  %vm1811_vm11 = vcmp.eq.s32.totalorder %v4294_v2, %v5629_v27  ;;  %vm2021_vm12 = vcmp.eq.s32.totalorder %v4294_v2, %v5632_v43  ;;  %v6078_v54 = vpop.f32.mrf.mxu1 }
 0x19c   : > { %3013 = vmatpush1.msra.mxu0 %v2214_v39  ;;  %v3752_v60 = vsel %vm2019_vm10, 1.0, %v4154_v1  ;;  %v3689_v50 = vsel %vm1811_vm11, 1.0, %v4154_v1  ;;  %v3754_v42 = vsel %vm2021_vm12, 1.0, %v4154_v1  ;;  %vm1808_vm8 = vcmp.eq.s32.totalorder %v4294_v2, %v5638_v24 }
 0x19d   : > { %3126 = vmatpush1.msra.mxu1 %v2216_v48  ;;  %v2211_v25 = vsub.f32 %v3687_v45, %v3752_v60  ;;  %v2213_v51 = vsub.f32 %v3689_v50, %v3754_v42  ;;  %v3686_v27 = vsel %vm1808_vm8, 1.0, %v4154_v1  ;;  %vm2018_vm13 = vcmp.eq.s32.totalorder %v4294_v2, %v5641_v4 }
 0x19e   : > { %v3751_v43 = vsel %vm2018_vm13, 1.0, %v4154_v1  ;;  %vm1810_vm14 = vcmp.eq.s32.totalorder %v4294_v2, %v5649_v5  ;;  %vm2020_vm15 = vcmp.eq.s32.totalorder %v4294_v2, %v5665_v29  ;;  %v6080_v5 = vpop.f32.mrf.mxu0  ;;  %v6083_v29 = vpop.f32.mrf.mxu1  ;;  %vm6167_vm0 = vcmp.lt.s32.totalorder %v236_v0, 512 }
 0x19f   : > { %3014 = vmatprep.subr.mxu0 %v2211_v25  ;;  %3127 = vmatprep.subr.mxu1 %v2213_v51  ;;  %v2210_v24 = vsub.f32 %v3686_v27, %v3751_v43  ;;  %v3688_v52 = vsel %vm1810_vm14, 1.0, %v4154_v1  ;;  %v3753_v17 = vsel %vm2020_vm15, 1.0, %v4154_v1 }
 0x1a0   : > { %v2212_v4 = vsub.f32 %v3688_v52, %v3753_v17  ;;  %v6086_v31 = vpop.f32.mrf.mxu0  ;;  %v6089_v59 = vpop.f32.mrf.mxu1 }
 0x1a1   : > { %3015 = vmatpush1.msra.mxu0 %v2210_v24 }
 0x1a2   : > { %3128 = vmatpush1.msra.mxu1 %v2212_v4  ;;  %3049 = vmatmul.mubr.f32.vlgmr.msra.gmra.mxu0 %v4021_v8  ;;  %v6092_v21 = vpop.f32.mrf.mxu0  ;;  %v6095_v53 = vpop.f32.mrf.mxu1 }
 0x1a3   : > { %3162 = vmatmul.mubr.f32.vlgmr.msra.gmra.mxu1 %v4021_v8  ;;  %3054 = vmatprep.mubr.f32.mxu0 %v4154_v1 }
 0x1a4   : > { %3167 = vmatprep.mubr.f32.mxu1 %v4154_v1  ;;  %v6098_v61 = vpop.f32.mrf.mxu0  ;;  %v6101_v62 = vpop.f32.mrf.mxu1 }
 0x1a6   : > { %3055 = vmatmul.mubr.f32.gmra.mxu0 %v4022_v58  ;;  %v6104_v9 = vpop.f32.mrf.mxu0  ;;  %v6107_v18 = vpop.f32.mrf.mxu1 }
 0x1a7   : > { %3168 = vmatmul.mubr.f32.gmra.mxu1 %v4022_v58  ;;  %3060 = vmatprep.mubr.f32.mxu0 %v4154_v1 }
 0x1a8   : > { %3173 = vmatprep.mubr.f32.mxu1 %v4154_v1  ;;  %v6110_v6 = vpop.f32.mrf.mxu0  ;;  %v6113_v19 = vpop.f32.mrf.mxu1 }
 0x1aa   : > { %3061 = vmatmul.mubr.f32.gmra.mxu0 %v4023_v46  ;;  %v6116_v13 = vpop.f32.mrf.mxu0  ;;  %v6119_v26 = vpop.f32.mrf.mxu1 }
 0x1ab   : > { %3174 = vmatmul.mubr.f32.gmra.mxu1 %v4023_v46  ;;  %3066 = vmatprep.mubr.f32.mxu0 %v4154_v1 }
 0x1ac   : > { %3179 = vmatprep.mubr.f32.mxu1 %v4154_v1 }
 0x1ae   : > { %3067 = vmatmul.mubr.f32.gmra.mxu0 %v4024_v12 }
 0x1af   : > { %3180 = vmatmul.mubr.f32.gmra.mxu1 %v4024_v12  ;;  %3072 = vmatprep.mubr.f32.mxu0 %v4154_v1 }
 0x1b0   : > { %3185 = vmatprep.mubr.f32.mxu1 %v4154_v1 }
 0x1b2   : > { %3073 = vmatmul.mubr.f32.gmra.mxu0 %v4025_v23 }
 0x1b3   : > { %3186 = vmatmul.mubr.f32.gmra.mxu1 %v4025_v23  ;;  %3078 = vmatprep.mubr.f32.mxu0 %v4154_v1 }
 0x1b4   : > { %3191 = vmatprep.mubr.f32.mxu1 %v4154_v1 }
 0x1b6   : > { %3079 = vmatmul.mubr.f32.gmra.mxu0 %v4026_v15 }
 0x1b7   : > { %3192 = vmatmul.mubr.f32.gmra.mxu1 %v4026_v15  ;;  %3084 = vmatprep.mubr.f32.mxu0 %v4154_v1 }
 0x1b8   : > { %3197 = vmatprep.mubr.f32.mxu1 %v4154_v1 }
 0x1ba   : > { %3085 = vmatmul.mubr.f32.gmra.mxu0 %v4027_v20 }
 0x1bb   : > { %3198 = vmatmul.mubr.f32.gmra.mxu1 %v4027_v20  ;;  %3090 = vmatprep.mubr.f32.mxu0 %v4154_v1 }
 0x1bc   : > { %3203 = vmatprep.mubr.f32.mxu1 %v4154_v1 }
 0x1be   : > { %3091 = vmatmul.mubr.f32.gmra.mxu0 %v4028_v28  ;;  %v1512_v34 = vpop.f32.mrf.mxu0 }
 0x1bf   : > { %3204 = vmatmul.mubr.f32.gmra.mxu1 %v4028_v28  ;;  %v1625_v10 = vpop.f32.mrf.mxu1  ;;  %v1513_v24 = vadd.f32 %v1512_v34, %v5890_v16 }
 0x1c0   : > { %v1514_v7 = vpop.f32.mrf.mxu0  ;;  %v1626_v52 = vadd.f32 %v1625_v10, %v5895_v33 }
 0x1c1   : > { %v1627_v36 = vpop.f32.mrf.mxu1  ;;  %v1515_v17 = vadd.f32 %v1514_v7, %v5913_v40  ;;  %v1672_v16 = vmul.f32 %v1513_v24, %v1513_v24 }
 0x1c2   : > { %v1518_v37 = vpop.f32.mrf.mxu0  ;;  %v1628_v46 = vadd.f32 %v1627_v36, %v5920_v63  ;;  %v1674_v20 = vmul.f32 %v1626_v52, %v1626_v52 }
 0x1c3   : > { %v1631_v39 = vpop.f32.mrf.mxu1  ;;  %v1519_v25 = vadd.f32 %v1518_v37, %v5935_v32  ;;  %v1673_v33 = vmul.f32 %v1515_v17, %v1515_v17 }
 0x1c4   : > { %v1520_v44 = vpop.f32.mrf.mxu0  ;;  %v1632_v1 = vadd.f32 %v1631_v39, %v5943_v41  ;;  %v1675_v7 = vmul.f32 %v1628_v46, %v1628_v46 }
 0x1c5   : > { %v1633_v3 = vpop.f32.mrf.mxu1  ;;  %v1521_v51 = vadd.f32 %v1520_v44, %v5960_v14  ;;  %v1676_v32 = vmul.f32 %v1519_v25, %v1519_v25 }
 0x1c6   : > { %v1524_v45 = vpop.f32.mrf.mxu0  ;;  %v1634_v4 = vadd.f32 %v1633_v3, %v5965_v49  ;;  %v1678_v41 = vmul.f32 %v1632_v1, %v1632_v1 }
 0x1c7   : > { %v1525_v8 = vadd.f32 %v1524_v45, %v5981_v38  ;;  %v1677_v23 = vmul.f32 %v1521_v51, %v1521_v51  ;;  %v1704_v36 = vadd.f32 %v1676_v32, %v1672_v16 }
 0x1c8   : > { %v1526_v48 = vpop.f32.mrf.mxu0  ;;  %v1679_v34 = vmul.f32 %v1634_v4, %v1634_v4  ;;  %v1730_v39 = vadd.f32 %v1678_v41, %v1674_v20 }
 0x1c9   : > { %v1637_v60 = vpop.f32.mrf.mxu1  ;;  %v1527_v15 = vadd.f32 %v1526_v48, %v6006_v22  ;;  %v1680_v38 = vmul.f32 %v1525_v8, %v1525_v8  ;;  %v1717_v44 = vadd.f32 %v1677_v23, %v1673_v33 }
 0x1ca   : > { %v1638_v14 = vadd.f32 %v1637_v60, %v5990_v57 }
 0x1cb   : > { %v1639_v50 = vpop.f32.mrf.mxu1  ;;  %v1530_v42 = vpop.f32.mrf.mxu0  ;;  %v1681_v45 = vmul.f32 %v1527_v15, %v1527_v15 }
 0x1cc   : > { %v1640_v40 = vadd.f32 %v1639_v50, %v6011_v30  ;;  %v1531_v10 = vadd.f32 %v1530_v42, %v6029_v55  ;;  %v1682_v3 = vmul.f32 %v1638_v14, %v1638_v14  ;;  %v1705_v42 = vadd.f32 %v1704_v36, %v1680_v38 }
 0x1cd   : > { %v1643_v27 = vpop.f32.mrf.mxu1  ;;  %v1532_v43 = vpop.f32.mrf.mxu0  ;;  %v1718_v17 = vadd.f32 %v1717_v44, %v1681_v45 }
 0x1ce   : > { %v1644_v63 = vadd.f32 %v1643_v27, %v6036_v35  ;;  %v1533_v37 = vadd.f32 %v1532_v43, %v6051_v47  ;;  %v1683_v48 = vmul.f32 %v1640_v40, %v1640_v40  ;;  %v1743_v35 = vadd.f32 %v1679_v34, %v1675_v7 }
 0x1cf   : > { %v1645_v58 = vpop.f32.mrf.mxu1  ;;  %v1684_v25 = vmul.f32 %v1531_v10, %v1531_v10  ;;  %v1731_v52 = vadd.f32 %v1730_v39, %v1682_v3 }
 0x1d0   : > { %v1536_v12 = vpop.f32.mrf.mxu0  ;;  %v1646_v57 = vadd.f32 %v1645_v58, %v6059_v56  ;;  %v1686_v1 = vmul.f32 %v1644_v63, %v1644_v63  ;;  %v1685_v56 = vmul.f32 %v1533_v37, %v1533_v37 }
 0x1d1   : > { %v1537_v60 = vadd.f32 %v1536_v12, %v6074_v11  ;;  %v1706_v12 = vadd.f32 %v1705_v42, %v1684_v25 }
 0x1d2   : > { %v1649_v28 = vpop.f32.mrf.mxu1  ;;  %v1538_v49 = vpop.f32.mrf.mxu0  ;;  %v1687_v27 = vmul.f32 %v1646_v57, %v1646_v57  ;;  %v1732_v41 = vadd.f32 %v1731_v52, %v1686_v1  ;;  %v1719_v14 = vadd.f32 %v1718_v17, %v1685_v56 }
 0x1d3   : > { %v1650_v50 = vadd.f32 %v1649_v28, %v6078_v54  ;;  %v1539_v55 = vadd.f32 %v1538_v49, %v6080_v5  ;;  %v1744_v5 = vadd.f32 %v1743_v35, %v1683_v48  ;;  %v1688_v8 = vmul.f32 %v1537_v60, %v1537_v60 }
 0x1d4   : > { %v1651_v22 = vpop.f32.mrf.mxu1 }
 0x1d5   : > { %v1542_v30 = vpop.f32.mrf.mxu0  ;;  %v1652_v43 = vadd.f32 %v1651_v22, %v6083_v29  ;;  %v1690_v58 = vmul.f32 %v1650_v50, %v1650_v50  ;;  %v1689_v46 = vmul.f32 %v1539_v55, %v1539_v55  ;;  %v1707_v49 = vadd.f32 %v1706_v12, %v1688_v8 }
 0x1d6   : > { %v1543_v24 = vadd.f32 %v1542_v30, %v6086_v31  ;;  %v1745_v31 = vadd.f32 %v1744_v5, %v1687_v27 }
 0x1d7   : > { %v1655_v47 = vpop.f32.mrf.mxu1  ;;  %v1544_v51 = vpop.f32.mrf.mxu0  ;;  %v1691_v15 = vmul.f32 %v1652_v43, %v1652_v43  ;;  %v1733_v34 = vadd.f32 %v1732_v41, %v1690_v58  ;;  %v1720_v38 = vadd.f32 %v1719_v14, %v1689_v46 }
 0x1d8   : > { %v1656_v11 = vadd.f32 %v1655_v47, %v6089_v59  ;;  %v1545_v54 = vadd.f32 %v1544_v51, %v6092_v21  ;;  %v1692_v16 = vmul.f32 %v1543_v24, %v1543_v24 }
 0x1d9   : > { %v1657_v4 = vpop.f32.mrf.mxu1  ;;  %v1746_v39 = vadd.f32 %v1745_v31, %v1691_v15 }
 0x1da   : > { %v1548_v32 = vpop.f32.mrf.mxu0  ;;  %v1658_v23 = vadd.f32 %v1657_v4, %v6095_v53  ;;  %v1694_v33 = vmul.f32 %v1656_v11, %v1656_v11  ;;  %v1693_v21 = vmul.f32 %v1545_v54, %v1545_v54  ;;  %v1708_v57 = vadd.f32 %v1707_v49, %v1692_v16 }
 0x1db   : > { %v1549_v29 = vadd.f32 %v1548_v32, %v6098_v61 }
 0x1dc   : > { %v1661_v20 = vpop.f32.mrf.mxu1  ;;  %v1550_v59 = vpop.f32.mrf.mxu0  ;;  %v1695_v53 = vmul.f32 %v1658_v23, %v1658_v23  ;;  %v1734_v44 = vadd.f32 %v1733_v34, %v1694_v33  ;;  %v1721_v3 = vadd.f32 %v1720_v38, %v1693_v21 }
 0x1dd   : > { %v1662_v40 = vadd.f32 %v1661_v20, %v6101_v62  ;;  %v1551_v28 = vadd.f32 %v1550_v59, %v6104_v9  ;;  %v1696_v10 = vmul.f32 %v1549_v29, %v1549_v29 }
 0x1de   : > { %v1663_v63 = vpop.f32.mrf.mxu1  ;;  %v1747_v55 = vadd.f32 %v1746_v39, %v1695_v53 }
 0x1df   : > { %v1698_v7 = vmul.f32 %v1662_v40, %v1662_v40  ;;  %v1697_v61 = vmul.f32 %v1551_v28, %v1551_v28  ;;  %v1664_v36 = vadd.f32 %v1663_v63, %v6107_v18  ;;  %v1554_v37 = vpop.f32.mrf.mxu0  ;;  %v1709_v30 = vadd.f32 %v1708_v57, %v1696_v10 }
 0x1e0   : > { %v1555_v22 = vadd.f32 %v1554_v37, %v6110_v6 }
 0x1e1   : > { %v1699_v62 = vmul.f32 %v1664_v36, %v1664_v36  ;;  %v1667_v45 = vpop.f32.mrf.mxu1  ;;  %v1556_v9 = vpop.f32.mrf.mxu0  ;;  %v1735_v35 = vadd.f32 %v1734_v44, %v1698_v7  ;;  %v1722_v42 = vadd.f32 %v1721_v3, %v1697_v61 }
 0x1e2   : > { %v1700_v48 = vmul.f32 %v1555_v22, %v1555_v22  ;;  %v1668_v60 = vadd.f32 %v1667_v45, %v6113_v19  ;;  %v1557_v50 = vadd.f32 %v1556_v9, %v6116_v13  ;;  %v4155_v13 = vmov 1966171168  }
 0x1e3   : > { %v1669_v18 = vpop.f32.mrf.mxu1  ;;  %v1748_v51 = vadd.f32 %v1747_v55, %v1699_v62  ;;  %v1763_v54 = vunpack.c.l.s4 %v4155_v13 }
 0x1e4   : > { %v1710_v25 = vadd.f32 %v1709_v30, %v1700_v48  ;;  %v1702_v1 = vmul.f32 %v1668_v60, %v1668_v60  ;;  %v1701_v47 = vmul.f32 %v1557_v50, %v1557_v50  ;;  %v1670_v6 = vadd.f32 %v1669_v18, %v6119_v26 }
 0x1e5   : > { %v1764_v41 = vunpack.c.0.s8 %v1763_v54 }
 0x1e6   : > { %v1711_v56 = vrot.slane %v1710_v25, 4  ;;  %v1736_v27 = vadd.f32 %v1735_v35, %v1702_v1  ;;  %v1723_v43 = vadd.f32 %v1722_v42, %v1701_v47  ;;  %v1703_v24 = vmul.f32 %v1670_v6, %v1670_v6 }
 0x1e7   : > { %v6157_v21 = vsub.s32 %v1764_v41, %v4294_v2 }
 0x1e8   : > { %v1712_v52 = vadd.f32 %v1711_v56, %v1710_v25  ;;  %v1737_v17 = vrot.slane %v1736_v27, 4  ;;  %v1724_v19 = vrot.slane %v1723_v43, 4  ;;  %v1749_v11 = vadd.f32 %v1748_v51, %v1703_v24 }
 0x1ea   : > { %v1713_v4 = vrot.slane %v1712_v52, 2  ;;  %v1738_v5 = vadd.f32 %v1737_v17, %v1736_v27  ;;  %v1725_v8 = vadd.f32 %v1724_v19, %v1723_v43  ;;  %v1750_v58 = vrot.slane %v1749_v11, 4 }
 0x1ec   : > { %v1714_v46 = vadd.f32 %v1713_v4, %v1712_v52  ;;  %v1739_v32 = vrot.slane %v1738_v5, 2  ;;  %v1726_v12 = vrot.slane %v1725_v8, 2  ;;  %v1751_v26 = vadd.f32 %v1750_v58, %v1749_v11 }
 0x1ee   : > { %v1715_v23 = vrot.slane %v1714_v46, 1  ;;  %v1740_v29 = vadd.f32 %v1739_v32, %v1738_v5  ;;  %v1727_v14 = vadd.f32 %v1726_v12, %v1725_v8  ;;  %v1752_v31 = vrot.slane %v1751_v26, 2 }
 0x1f0   : > { %v1741_v15 = vrot.slane %v1740_v29, 1  ;;  %v1728_v16 = vrot.slane %v1727_v14, 1  ;;  %v1753_v20 = vadd.f32 %v1752_v31, %v1751_v26  ;;  %v1716_v59 = vadd.f32 %v1715_v23, %v1714_v46 }
 0x1f2   : > { %v1729_v33 = vadd.f32 %v1728_v16, %v1727_v14  ;;  %v1754_v40 = vrot.slane %v1753_v20, 1  ;;  %v1742_v28 = vadd.f32 %v1741_v15, %v1740_v29 }
 0x1f4   : > { %v1760_v49 = vcombine.low %v1716_v59, %v1729_v33  ;;  %v1755_v34 = vadd.f32 %v1754_v40, %v1753_v20 }
 0x1f6   : > { %v1768_v38 = vrot.slane %v1760_v49, %v6157_v21  ;;  %v1761_v10 = vcombine.low %v1742_v28, %v1755_v34 }
 0x1f8   : > { %v1775_v63 = vrot.slane %v1761_v10, %v6157_v21 }
 0x1fa   : > { %v1776_v53 = vcombine.low %v1768_v38, %v1775_v63 }
 0x1fc   : > { %v1783_v7 = vrot.slane %v1776_v53, %v6157_v21 }
 0x1fe   : > { %1789 = vst.msk [vmem:[%s6164_s19] ss:$2 sm:$0xf] %vm6167_vm0, %v1783_v7 }
 0x210   : > { %v2824_v61 = vpop.f32.mrf.mxu0 }
 0x211   : > { %v2937_v36 = vpop.f32.mrf.mxu1 }
 0x212   : > { %v2826_v37 = vpop.f32.mrf.mxu0 }
 0x213   : > { %v2939_v57 = vpop.f32.mrf.mxu1 }
 0x214   : > { %v2830_v22 = vpop.f32.mrf.mxu0 }
 0x215   : > { %v2943_v39 = vpop.f32.mrf.mxu1 }
 0x216   : > { %v2832_v44 = vpop.f32.mrf.mxu0 }
 0x217   : > { %v2945_v3 = vpop.f32.mrf.mxu1 }
 0x218   : > { %v2836_v62 = vpop.f32.mrf.mxu0 }
 0x21a   : > { %v2838_v9 = vpop.f32.mrf.mxu0 }
 0x21b   : > { %v2949_v45 = vpop.f32.mrf.mxu1 }
 0x21d   : > { %v2951_v0 = vpop.f32.mrf.mxu1  ;;  %v2842_v30 = vpop.f32.mrf.mxu0 }
 0x21f   : > { %v2955_v48 = vpop.f32.mrf.mxu1  ;;  %v2844_v60 = vpop.f32.mrf.mxu0 }
 0x221   : > { %v2957_v50 = vpop.f32.mrf.mxu1 }
 0x222   : > { %v6175_v55 = vpop.f32.mrf.mxu0 }
 0x224   : > { %v6177_v35 = vpop.f32.mrf.mxu1  ;;  %v6179_v42 = vpop.f32.mrf.mxu0 }
 0x226   : > { %v6181_v18 = vpop.f32.mrf.mxu1 }
 0x227   : > { %v6183_v25 = vpop.f32.mrf.mxu0 }
 0x229   : > { %v6185_v1 = vpop.f32.mrf.mxu1  ;;  %v6187_v47 = vpop.f32.mrf.mxu0 }
 0x22b   : > { %v6189_v6 = vpop.f32.mrf.mxu1 }
 0x22c   : > { %v6191_v51 = vpop.f32.mrf.mxu0 }
 0x22e   : > { %v6193_v56 = vpop.f32.mrf.mxu1  ;;  %v6195_v27 = vpop.f32.mrf.mxu0 }
 0x230   : > { %v6197_v43 = vpop.f32.mrf.mxu1 }
 0x231   : > { %v6199_v24 = vpop.f32.mrf.mxu0 }
 0x233   : > { %v6201_v52 = vpop.f32.mrf.mxu1  ;;  %v6203_v17 = vpop.f32.mrf.mxu0 }
 0x235   : > { %v6205_v19 = vpop.f32.mrf.mxu1 }
 0x262   : > { %v3050_v11 = vpop.f32.mrf.mxu0 }
 0x263   : > { %v3163_v13 = vpop.f32.mrf.mxu1  ;;  %v3051_v29 = vadd.f32 %v3050_v11, %v2824_v61 }
 0x264   : > { %v3052_v54 = vpop.f32.mrf.mxu0  ;;  %v3164_v15 = vadd.f32 %v3163_v13, %v2937_v36 }
 0x265   : > { %v3165_v4 = vpop.f32.mrf.mxu1  ;;  %v3053_v59 = vadd.f32 %v3052_v54, %v2826_v37  ;;  %v3210_v63 = vmul.f32 %v3051_v29, %v3051_v29 }
 0x266   : > { %v3056_v5 = vpop.f32.mrf.mxu0  ;;  %v3166_v33 = vadd.f32 %v3165_v4, %v2939_v57 }
 0x267   : > { %v3169_v8 = vpop.f32.mrf.mxu1  ;;  %v3057_v26 = vadd.f32 %v3056_v5, %v2830_v22  ;;  %v3212_v5 = vmul.f32 %v3164_v15, %v3164_v15 }
 0x268   : > { %v3058_v58 = vpop.f32.mrf.mxu0  ;;  %v3170_v41 = vadd.f32 %v3169_v8, %v2943_v39  ;;  %v3213_v13 = vmul.f32 %v3166_v33, %v3166_v33 }
 0x269   : > { %v3171_v46 = vpop.f32.mrf.mxu1  ;;  %v3059_v14 = vadd.f32 %v3058_v58, %v2832_v44  ;;  %v3214_v49 = vmul.f32 %v3057_v26, %v3057_v26 }
 0x26a   : > { %v3062_v32 = vpop.f32.mrf.mxu0  ;;  %v3172_v16 = vadd.f32 %v3171_v46, %v2945_v3  ;;  %v3216_v34 = vmul.f32 %v3170_v41, %v3170_v41  ;;  %v3211_v3 = vmul.f32 %v3053_v59, %v3053_v59 }
 0x26b   : > { %v3175_v12 = vpop.f32.mrf.mxu1  ;;  %v3063_v40 = vadd.f32 %v3062_v32, %v2836_v62  ;;  %v3215_v53 = vmul.f32 %v3059_v14, %v3059_v14  ;;  %v3242_v54 = vadd.f32 %v3214_v49, %v3210_v63 }
 0x26c   : > { %v3064_v23 = vpop.f32.mrf.mxu0  ;;  %v3176_v38 = vadd.f32 %v3175_v12, %v2949_v45  ;;  %v3217_v61 = vmul.f32 %v3172_v16, %v3172_v16  ;;  %v3268_v4 = vadd.f32 %v3216_v34, %v3212_v5 }
 0x26d   : > { %v3177_v31 = vpop.f32.mrf.mxu1  ;;  %v3065_v7 = vadd.f32 %v3064_v23, %v2838_v9  ;;  %v3218_v37 = vmul.f32 %v3063_v40, %v3063_v40  ;;  %v3255_v46 = vadd.f32 %v3215_v53, %v3211_v3 }
 0x26e   : > { %v3068_v20 = vpop.f32.mrf.mxu0  ;;  %v3178_v22 = vadd.f32 %v3177_v31, %v2951_v0  ;;  %v3220_v8 = vmul.f32 %v3176_v38, %v3176_v38  ;;  %v3281_v26 = vadd.f32 %v3217_v61, %v3213_v13 }
 0x26f   : > { %v3181_v28 = vpop.f32.mrf.mxu1  ;;  %v3069_v44 = vadd.f32 %v3068_v20, %v2842_v30  ;;  %v3219_v32 = vmul.f32 %v3065_v7, %v3065_v7  ;;  %v3243_v29 = vadd.f32 %v3242_v54, %v3218_v37 }
 0x270   : > { %v3070_v10 = vpop.f32.mrf.mxu0  ;;  %v3182_v11 = vadd.f32 %v3181_v28, %v2955_v48  ;;  %v3221_v9 = vmul.f32 %v3178_v22, %v3178_v22  ;;  %v3269_v15 = vadd.f32 %v3268_v4, %v3220_v8 }
 0x271   : > { %v3183_v39 = vpop.f32.mrf.mxu1  ;;  %v3071_v57 = vadd.f32 %v3070_v10, %v2844_v60  ;;  %v3222_v30 = vmul.f32 %v3069_v44, %v3069_v44  ;;  %v3256_v33 = vadd.f32 %v3255_v46, %v3219_v32 }
 0x272   : > { %v3074_v36 = vpop.f32.mrf.mxu0  ;;  %v3184_v45 = vadd.f32 %v3183_v39, %v2957_v50  ;;  %v3224_v48 = vmul.f32 %v3182_v11, %v3182_v11  ;;  %v3282_v40 = vadd.f32 %v3281_v26, %v3221_v9 }
 0x273   : > { %v3187_v62 = vpop.f32.mrf.mxu1  ;;  %v3075_v0 = vadd.f32 %v3074_v36, %v6175_v55  ;;  %v3223_v60 = vmul.f32 %v3071_v57, %v3071_v57  ;;  %v3244_v34 = vadd.f32 %v3243_v29, %v3222_v30 }
 0x274   : > { %v3076_v58 = vpop.f32.mrf.mxu0  ;;  %v3188_v41 = vadd.f32 %v3187_v62, %v6177_v35  ;;  %v3225_v16 = vmul.f32 %v3184_v45, %v3184_v45  ;;  %v3270_v38 = vadd.f32 %v3269_v15, %v3224_v48 }
 0x275   : > { %v3189_v12 = vpop.f32.mrf.mxu1  ;;  %v3077_v14 = vadd.f32 %v3076_v58, %v6179_v42  ;;  %v3226_v28 = vmul.f32 %v3075_v0, %v3075_v0  ;;  %v3257_v63 = vadd.f32 %v3256_v33, %v3223_v60 }
 0x276   : > { %v3080_v23 = vpop.f32.mrf.mxu0  ;;  %v3190_v20 = vadd.f32 %v3189_v12, %v6181_v18  ;;  %v3228_v10 = vmul.f32 %v3188_v41, %v3188_v41 }
 0x277   : > { %v3081_v31 = vadd.f32 %v3080_v23, %v6183_v25  ;;  %v3193_v50 = vpop.f32.mrf.mxu1  ;;  %v3227_v53 = vmul.f32 %v3077_v14, %v3077_v14 }
 0x278   : > { %v3194_v55 = vadd.f32 %v3193_v50, %v6185_v1  ;;  %v3082_v59 = vpop.f32.mrf.mxu0  ;;  %v3283_v1 = vadd.f32 %v3282_v40, %v3225_v16  ;;  %v3229_v39 = vmul.f32 %v3190_v20, %v3190_v20 }
 0x279   : > { %v3083_v35 = vadd.f32 %v3082_v59, %v6187_v47  ;;  %v3195_v49 = vpop.f32.mrf.mxu1  ;;  %v3230_v7 = vmul.f32 %v3081_v31, %v3081_v31  ;;  %v3245_v47 = vadd.f32 %v3244_v34, %v3226_v28 }
 0x27a   : > { %v3196_v42 = vadd.f32 %v3195_v49, %v6189_v6  ;;  %v3086_v25 = vpop.f32.mrf.mxu0  ;;  %v3232_v5 = vmul.f32 %v3194_v55, %v3194_v55  ;;  %v3271_v6 = vadd.f32 %v3270_v38, %v3228_v10 }
 0x27b   : > { %v3087_v18 = vadd.f32 %v3086_v25, %v6191_v51  ;;  %v3199_v22 = vpop.f32.mrf.mxu1  ;;  %v3231_v11 = vmul.f32 %v3083_v35, %v3083_v35  ;;  %v3258_v51 = vadd.f32 %v3257_v63, %v3227_v53  ;;  %v3246_v4 = vadd.f32 %v3245_v47, %v3230_v7 }
 0x27c   : > { %v3200_v61 = vadd.f32 %v3199_v22, %v6193_v56  ;;  %v3088_v44 = vpop.f32.mrf.mxu0  ;;  %v3233_v37 = vmul.f32 %v3196_v42, %v3196_v42  ;;  %v3284_v56 = vadd.f32 %v3283_v1, %v3229_v39  ;;  %v3272_v46 = vadd.f32 %v3271_v6, %v3232_v5 }
 0x27d   : > { %v3234_v36 = vmul.f32 %v3087_v18, %v3087_v18  ;;  %v3089_v3 = vadd.f32 %v3088_v44, %v6195_v27  ;;  %v3201_v13 = vpop.f32.mrf.mxu1  ;;  %v3259_v27 = vadd.f32 %v3258_v51, %v3231_v11 }
 0x27e   : > { %v3236_v57 = vmul.f32 %v3200_v61, %v3200_v61  ;;  %v3202_v62 = vadd.f32 %v3201_v13, %v6197_v43  ;;  %v3092_v54 = vpop.f32.mrf.mxu0  ;;  %v3285_v43 = vadd.f32 %v3284_v56, %v3233_v37 }
 0x27f   : > { %v3235_v8 = vmul.f32 %v3089_v3, %v3089_v3  ;;  %v3093_v45 = vadd.f32 %v3092_v54, %v6199_v24  ;;  %v3205_v58 = vpop.f32.mrf.mxu1  ;;  %v3247_v12 = vadd.f32 %v3246_v4, %v3234_v36 }
 0x280   : > { %v3237_v32 = vmul.f32 %v3202_v62, %v3202_v62  ;;  %v3206_v9 = vadd.f32 %v3205_v58, %v6201_v52  ;;  %v3094_v0 = vpop.f32.mrf.mxu0  ;;  %v3273_v41 = vadd.f32 %v3272_v46, %v3236_v57 }
 0x281   : > { %v3238_v26 = vmul.f32 %v3093_v45, %v3093_v45  ;;  %v3095_v30 = vadd.f32 %v3094_v0, %v6203_v17  ;;  %v3207_v48 = vpop.f32.mrf.mxu1  ;;  %v3260_v60 = vadd.f32 %v3259_v27, %v3235_v8 }
 0x282   : > { %v3240_v23 = vmul.f32 %v3206_v9, %v3206_v9  ;;  %v3208_v29 = vadd.f32 %v3207_v48, %v6205_v19  ;;  %v3286_v31 = vadd.f32 %v3285_v43, %v3237_v32 }
 0x283   : > { %v3248_v24 = vadd.f32 %v3247_v12, %v3238_v26  ;;  %v3239_v14 = vmul.f32 %v3095_v30, %v3095_v30 }
 0x284   : > { %v3274_v50 = vadd.f32 %v3273_v41, %v3240_v23  ;;  %v3241_v15 = vmul.f32 %v3208_v29, %v3208_v29 }
 0x285   : > { %v3249_v16 = vrot.slane %v3248_v24, 4  ;;  %v3261_v52 = vadd.f32 %v3260_v60, %v3239_v14 }
 0x286   : > { %v3275_v20 = vrot.slane %v3274_v50, 4  ;;  %v3287_v55 = vadd.f32 %v3286_v31, %v3241_v15 }
 0x287   : > { %v3250_v59 = vadd.f32 %v3249_v16, %v3248_v24  ;;  %v3262_v33 = vrot.slane %v3261_v52, 4 }
 0x288   : > { %v3276_v40 = vadd.f32 %v3275_v20, %v3274_v50  ;;  %v3288_v17 = vrot.slane %v3287_v55, 4 }
 0x289   : > { %v3251_v28 = vrot.slane %v3250_v59, 2  ;;  %v3263_v35 = vadd.f32 %v3262_v33, %v3261_v52 }
 0x28a   : > { %v3277_v49 = vrot.slane %v3276_v40, 2  ;;  %v3289_v34 = vadd.f32 %v3288_v17, %v3287_v55 }
 0x28b   : > { %v3252_v38 = vadd.f32 %v3251_v28, %v3250_v59  ;;  %v3264_v19 = vrot.slane %v3263_v35, 2 }
 0x28c   : > { %v3278_v10 = vadd.f32 %v3277_v49, %v3276_v40  ;;  %v3290_v42 = vrot.slane %v3289_v34, 2 }
 0x28d   : > { %v3253_v25 = vrot.slane %v3252_v38, 1  ;;  %v3265_v63 = vadd.f32 %v3264_v19, %v3263_v35 }
 0x28e   : > { %v3279_v53 = vrot.slane %v3278_v10, 1  ;;  %v3291_v7 = vadd.f32 %v3290_v42, %v3289_v34 }
 0x28f   : > { %v3266_v18 = vrot.slane %v3265_v63, 1  ;;  %v3254_v1 = vadd.f32 %v3253_v25, %v3252_v38 }
 0x290   : > { %v3292_v22 = vrot.slane %v3291_v7, 1  ;;  %v3280_v5 = vadd.f32 %v3279_v53, %v3278_v10 }
 0x291   : > { %v3267_v39 = vadd.f32 %v3266_v18, %v3265_v63 }
 0x292   : > { %v3293_v61 = vadd.f32 %v3292_v22, %v3291_v7 }
 0x293   : > { %v3298_v44 = vcombine.low %v3254_v1, %v3267_v39 }
 0x294   : > { %v3299_v47 = vcombine.low %v3280_v5, %v3293_v61 }
 0x295   : > { %v3306_v11 = vrot.slane %v3298_v44, %v6157_v21 }
 0x296   : > { %v3313_v36 = vrot.slane %v3299_v47, %v6157_v21 }
 0x298   : > { %v3314_v3 = vcombine.low %v3306_v11, %v3313_v36 }
 0x29a   : > { %v3321_v13 = vrot.slane %v3314_v3, %v6157_v21 }
 0x29c   : > { %3945 = vst.msk [vmem:[%s6164_s19 + $0x1] ss:$2 sm:$0xf] %vm6167_vm0, %v3321_v13 }
 0x29d PF: > { %p14_p7 = scmp.ge.s32.totalorder %s4241_s6, 4   ;;  %s6260_s12 = smov %s4139_s13 }
 0x29e   : > { %s6261_s13 = smov %s4143_s14  ;;  %s6262_s14 = smov %s4252_s10 }
 0x29f   : > { %s6263_s15 = smov %s4241_s6  ;;  %16 = sbr.rel (!%p14_p7) target bundleno = 4 (0x4), region = 88 }
 0x2a4   :  { %3347 = vsyncpa [#allocation3], 1 }
 0x2a5   :  { %3349 = vsyncpa [#allocation3 + $0x1], 1 }
 0x2a6   :  { %3350 = vsyncpa [#allocation5], 1 }

</bundles_post_ra>
